<compile_context>
chip_gen: v7x
topology: tpu7x:2x2x1
jax: 0.10.0
libtpu: 0.0.40
codegen_flags: <defaults>
</compile_context>

<pallas_src>
import math

import jax
import jax.numpy as jnp
from jax.experimental import pallas as pl
from jax.experimental.pallas import tpu as pltpu

# ----------------------------- model configuration -----------------------------
BATCH = 2
SEQ_LEN = 8
MAX_SENSORS = 8
SENSOR_INPUT_DIM = 1          # implied by the reshape in forward()
SENSOR_EMBED_DIM = 16
TRANSFORMER_DIM = 32
NHEAD = 4
NLAYERS = 2
MOE_HIDDEN_DIM = 32
NUM_EXPERTS = 3
MOE_OUTPUT_DIM = 16
PRED_HORIZONS = 3
FAIL_HORIZONS = 2

HEAD_DIM = TRANSFORMER_DIM // NHEAD                    # 8
COMBINED_DIM = TRANSFORMER_DIM + MOE_OUTPUT_DIM        # 48
OUT_LANES = 128                                        # lane-dense output slab width
SLAB_LANES = 128                                       # weight slab lane width

EXP_LANES = NUM_EXPERTS * MOE_HIDDEN_DIM               # 96 (expert W1 lanes)
MOE_IN_COLS = EXP_LANES + NUM_EXPERTS                  # 99 ([W1_0|W1_1|W1_2|gate])
MOE_OUT_ALL = NUM_EXPERTS * MOE_OUTPUT_DIM             # 48

# input slab layout (lanes)
INP_MASKCOL = SEQ_LEN                                  # lane 8: per-row mask
INP_MASK2D = 16                                        # lanes 16..23: (B, S) mask rows
INP_WIDTH = INP_MASK2D + MAX_SENSORS                   # 24


# ----------------------------- weight-slab layout -----------------------------
def _param_shapes():
    H, D = SENSOR_EMBED_DIM, TRANSFORMER_DIM
    shapes = [
        ("lstm_wih_t", (SENSOR_INPUT_DIM, 4 * H)),
        ("lstm_whh_t", (H, 4 * H)),
        ("lstm_b", (1, 4 * H)),
        ("proj_w_t", (H, D)),
        ("proj_b", (1, D)),
        ("pos_enc", (MAX_SENSORS, D)),
    ]
    for l in range(NLAYERS):
        pre = f"l{l}_"
        shapes += [
            (pre + "in_proj_w_t", (D, 3 * D)),
            (pre + "in_proj_b", (1, 3 * D)),
            (pre + "out_proj_w_t", (D, D)),
            (pre + "out_proj_b", (1, D)),
            (pre + "ln1_g", (1, D)), (pre + "ln1_b", (1, D)),
            (pre + "ff1_w_t", (D, 4 * D)), (pre + "ff1_b", (1, 4 * D)),
            (pre + "ff2_w_t", (4 * D, D)), (pre + "ff2_b", (1, D)),
            (pre + "ln2_g", (1, D)), (pre + "ln2_b", (1, D)),
        ]
    shapes += [
        ("moe_in_w", (D, MOE_IN_COLS)),
        ("moe_in_b", (1, MOE_IN_COLS)),
        ("moe_w2_blk", (EXP_LANES, MOE_OUT_ALL)),
        ("moe_b2_cat", (1, MOE_OUT_ALL)),
        ("head_A", (D, OUT_LANES)),
        ("head_B", (MOE_OUTPUT_DIM, OUT_LANES)),
        ("head_bias", (1, OUT_LANES)),
    ]
    return shapes


_PARAM_SHAPES = _param_shapes()
_LAYOUT = {}
_row = 0
for _name, _shape in _PARAM_SHAPES:
    _LAYOUT[_name] = (_row, _shape[0], _shape[1])
    _row += ((_shape[0] + 7) // 8) * 8        # keep every block 8-row (sublane) aligned
SLAB_ROWS = _row


# ----------------------------- in-kernel helpers -----------------------------
def _layernorm(x, g, b, eps=1e-5):
    mu = jnp.mean(x, axis=-1, keepdims=True)
    var = jnp.mean((x - mu) ** 2, axis=-1, keepdims=True)
    return (x - mu) * jax.lax.rsqrt(var + eps) * g + b


def _softmax_lastdim(x, approx=True):
    m = jnp.max(x, axis=-1, keepdims=True)
    p = jnp.exp(x - m)
    s = jnp.sum(p, axis=-1, keepdims=True)
    if approx:
        return p * pl.reciprocal(s, approx=True)
    return p / s


# ----------------------------- fused kernel -----------------------------
def fused_forward_kernel(inp_ref, w_ref, out_ref):
    f32 = jnp.float32
    B, S, T = BATCH, MAX_SENSORS, SEQ_LEN
    H, D, d = SENSOR_EMBED_DIM, TRANSFORMER_DIM, HEAD_DIM
    BS = B * S

    def w(name):
        r0, rows, cols = _LAYOUT[name]
        return w_ref[r0:r0 + rows, 0:cols]

    # ----------------------------- inputs -----------------------------
    x_all = inp_ref[:, 0:T]                                # (BS, T)
    mask_col = inp_ref[:, INP_MASKCOL:INP_MASKCOL + 1]     # (BS, 1)
    mask2d = inp_ref[0:B, INP_MASK2D:INP_MASK2D + S]       # (B, S)

    # ---------------- LSTM sensor encoder (statically unrolled over T) ----------
    wih = w("lstm_wih_t")                                  # (1, 4H)
    whh = w("lstm_whh_t")                                  # (H, 4H)
    lb = w("lstm_b")                                       # (1, 4H)
    # hoisted input-gate contributions (independent of the recurrence)
    xg = [x_all[:, t:t + 1] * wih + lb for t in range(T)]  # each (BS, 4H)

    h = jnp.zeros((BS, H), f32)
    c = jnp.zeros((BS, H), f32)
    for t in range(T):                                     # static -> full unroll
        gates = xg[t] + jnp.dot(h, whh, preferred_element_type=f32)
        sg = jax.nn.sigmoid(gates)                         # one full-width EUP pass
        tg = jnp.tanh(gates)                               # one full-width EUP pass
        i_g = sg[:, 0 * H:1 * H]
        f_g = sg[:, 1 * H:2 * H]
        o_g = sg[:, 3 * H:4 * H]
        g_g = tg[:, 2 * H:3 * H]
        c = f_g * c + i_g * g_g
        h = o_g * jnp.tanh(c)

    emb = h * mask_col                                     # masked sensor embeddings (BS, H)

    # ------------------ input projection + positional encoding ------------------
    x2d = jnp.dot(emb, w("proj_w_t"), preferred_element_type=f32) + w("proj_b")
    x = x2d.reshape(B, S, D) + w("pos_enc")[None, :, :]

    key_bias = jnp.where(mask2d == 0.0, -1e9, 0.0).astype(f32)   # (B, S)
    kb = key_bias[:, None, :]                                    # hoisted (B, 1, S)
    scale = 1.0 / math.sqrt(d)

    # ------------------------- transformer encoder layers -----------------------
    for l in range(NLAYERS):
        pre = f"l{l}_"
        x2d = x.reshape(BS, D)
        qkv = jnp.dot(x2d, w(pre + "in_proj_w_t"),
                      preferred_element_type=f32) + w(pre + "in_proj_b")   # (BS, 3D)
        qkv3 = qkv.reshape(B, S, 3 * D)

        # per-head scores, stacked along the leading axis -> ONE softmax
        scores = []
        for hh in range(NHEAD):
            qh = qkv3[:, :, hh * d:(hh + 1) * d]
            kh = qkv3[:, :, D + hh * d:D + (hh + 1) * d]
            s = jnp.einsum("bqd,bkd->bqk", qh, kh,
                           preferred_element_type=f32) * scale + kb
            scores.append(s)
        p_all = _softmax_lastdim(jnp.concatenate(scores, axis=0))          # (NHEAD*B, S, S)

        # P.V and out_proj: accumulate per-head row-block matmuls (no concat)
        outw = w(pre + "out_proj_w_t")                                     # (D, D)
        attn_out = w(pre + "out_proj_b")                                   # (1, D)
        for hh in range(NHEAD):
            vh = qkv3[:, :, 2 * D + hh * d:2 * D + (hh + 1) * d]
            ph = p_all[hh * B:(hh + 1) * B]                                # (B, S, S)
            ah = jnp.einsum("bqk,bkd->bqd", ph, vh,
                            preferred_element_type=f32).reshape(BS, d)
            attn_out = attn_out + jnp.dot(ah, outw[hh * d:(hh + 1) * d, :],
                                          preferred_element_type=f32)

        # residual + post-norm (PyTorch TransformerEncoderLayer default)
        y = _layernorm(x2d + attn_out, w(pre + "ln1_g"), w(pre + "ln1_b"))
        ff = jnp.maximum(jnp.dot(y, w(pre + "ff1_w_t"),
                                 preferred_element_type=f32) + w(pre + "ff1_b"), 0.0)
        ff = jnp.dot(ff, w(pre + "ff2_w_t"), preferred_element_type=f32) + w(pre + "ff2_b")
        x = _layernorm(y + ff, w(pre + "ln2_g"), w(pre + "ln2_b")).reshape(B, S, D)

    t_out = x                                              # (B, S, D)
    t_out2d = x.reshape(BS, D)

    # -------------------------------- masked mean --------------------------------
    summed = jnp.sum(t_out * mask2d[:, :, None], axis=1)   # (B, D)
    cnt = jnp.maximum(jnp.sum(mask2d, axis=1, keepdims=True), 1.0)
    g_feat = summed / cnt                                  # (B, D)

    # --------------------------- MoE (gate + experts fused) ----------------------
    gh = jnp.dot(g_feat, w("moe_in_w"), preferred_element_type=f32) + w("moe_in_b")  # (B, 99)
    gate_w = _softmax_lastdim(gh[:, EXP_LANES:EXP_LANES + NUM_EXPERTS], approx=False)  # (B, 3)
    h_all = jnp.maximum(gh[:, 0:EXP_LANES], 0.0)                                     # one ReLU, (B, 96)
    out_all = jnp.dot(h_all, w("moe_w2_blk"),
                      preferred_element_type=f32) + w("moe_b2_cat")                  # (B, 48)
    moe_out = (gate_w[:, 0:1] * out_all[:, 0:MOE_OUTPUT_DIM]
               + gate_w[:, 1:2] * out_all[:, MOE_OUTPUT_DIM:2 * MOE_OUTPUT_DIM]
               + gate_w[:, 2:3] * out_all[:, 2 * MOE_OUTPUT_DIM:3 * MOE_OUTPUT_DIM])  # (B, 16)

    # ------------------------------------ heads ----------------------------------
    # lane layout of the 128-wide output: [pred(3) | rca(1) | fail(2) | zero pad]
    glob = jnp.dot(moe_out, w("head_B"), preferred_element_type=f32) + w("head_bias")  # (B, 128)
    glob_bs = jnp.broadcast_to(glob[:, None, :], (B, S, OUT_LANES)).reshape(BS, OUT_LANES)
    out_ref[...] = jnp.dot(t_out2d, w("head_A"), preferred_element_type=f32) + glob_bs


# ----------------------------- parameters -----------------------------
def init_params(key):
    keys = iter(jax.random.split(key, 64))

    def nrm(shape, scale=0.05):
        return scale * jax.random.normal(next(keys), shape, dtype=jnp.float32)

    D = TRANSFORMER_DIM
    H = SENSOR_EMBED_DIM
    p = {}
    # SensorEncoder (LSTM), PyTorch gate order [i, f, g, o]
    p["lstm_wih_t"] = nrm((SENSOR_INPUT_DIM, 4 * H))
    p["lstm_whh_t"] = nrm((H, 4 * H))
    p["lstm_b"] = nrm((1, 4 * H))                  # b_ih + b_hh combined
    # transformer_input_proj
    p["proj_w_t"] = nrm((H, D))
    p["proj_b"] = nrm((1, D))
    # InterSensorTransformer positional encoder
    p["pos_enc"] = nrm((MAX_SENSORS, D))
    layers = []
    for _ in range(NLAYERS):
        layers.append(dict(
            in_proj_w_t=nrm((D, 3 * D)), in_proj_b=nrm((1, 3 * D)),
            out_proj_w_t=nrm((D, D)), out_proj_b=nrm((1, D)),
            ln1_g=jnp.ones((1, D), jnp.float32), ln1_b=jnp.zeros((1, D), jnp.float32),
            ff1_w_t=nrm((D, 4 * D)), ff1_b=nrm((1, 4 * D)),
            ff2_w_t=nrm((4 * D, D)), ff2_b=nrm((1, D)),
            ln2_g=jnp.ones((1, D), jnp.float32), ln2_b=jnp.zeros((1, D), jnp.float32),
        ))
    p["layers"] = layers
    # GatingNetwork
    p["gate_w_t"] = nrm((D, NUM_EXPERTS))
    p["gate_b"] = nrm((1, NUM_EXPERTS))
    # Experts
    experts = []
    for _ in range(NUM_EXPERTS):
        experts.append(dict(
            w1_t=nrm((D, MOE_HIDDEN_DIM)), b1=nrm((1, MOE_HIDDEN_DIM)),
            w2_t=nrm((MOE_HIDDEN_DIM, MOE_OUTPUT_DIM)), b2=nrm((1, MOE_OUTPUT_DIM)),
        ))
    p["experts"] = experts
    # Heads
    C = COMBINED_DIM
    p["pred_w_t"] = nrm((C, PRED_HORIZONS)); p["pred_b"] = nrm((1, PRED_HORIZONS))
    p["fail_w_t"] = nrm((MOE_OUTPUT_DIM, FAIL_HORIZONS)); p["fail_b"] = nrm((1, FAIL_HORIZONS))
    p["rca_w_t"] = nrm((C, 1)); p["rca_b"] = nrm((1, 1))
    return p


def pack_params(p):
    """Fuse + flatten all params into one (SLAB_ROWS, 128) f32 slab (single DMA)."""
    D = TRANSFORMER_DIM
    MH, MO = MOE_HIDDEN_DIM, MOE_OUTPUT_DIM
    named = {
        "lstm_wih_t": p["lstm_wih_t"], "lstm_whh_t": p["lstm_whh_t"], "lstm_b": p["lstm_b"],
        "proj_w_t": p["proj_w_t"], "proj_b": p["proj_b"], "pos_enc": p["pos_enc"],
    }
    for l, lp in enumerate(p["layers"]):
        pre = f"l{l}_"
        for k in ("in_proj_w_t", "in_proj_b", "out_proj_w_t", "out_proj_b",
                  "ln1_g", "ln1_b", "ff1_w_t", "ff1_b", "ff2_w_t", "ff2_b",
                  "ln2_g", "ln2_b"):
            named[pre + k] = lp[k]

    # MoE first layer: expert W1 blocks lane-aligned at 0/32/64, gate columns last.
    named["moe_in_w"] = jnp.concatenate(
        [e["w1_t"] for e in p["experts"]] + [p["gate_w_t"]], axis=1)          # (D, 99)
    named["moe_in_b"] = jnp.concatenate(
        [e["b1"] for e in p["experts"]] + [p["gate_b"]], axis=1)              # (1, 99)
    # MoE second layer: block-diagonal stacked W2 -> one matmul in-kernel.
    w2blk = jnp.zeros((EXP_LANES, MOE_OUT_ALL), jnp.float32)
    for e in range(NUM_EXPERTS):
        w2blk = w2blk.at[e * MH:(e + 1) * MH, e * MO:(e + 1) * MO].set(p["experts"][e]["w2_t"])
    named["moe_w2_blk"] = w2blk
    named["moe_b2_cat"] = jnp.concatenate([e["b2"] for e in p["experts"]], axis=1)  # (1, 48)

    # Heads padded to 128 lanes: lanes [pred(3) | rca(1) | fail(2) | 0...].
    head_A = jnp.zeros((D, OUT_LANES), jnp.float32)
    head_A = head_A.at[:, 0:PRED_HORIZONS].set(p["pred_w_t"][:D])
    head_A = head_A.at[:, PRED_HORIZONS:PRED_HORIZONS + 1].set(p["rca_w_t"][:D])
    head_B = jnp.zeros((MO, OUT_LANES), jnp.float32)
    head_B = head_B.at[:, 0:PRED_HORIZONS].set(p["pred_w_t"][D:])
    head_B = head_B.at[:, PRED_HORIZONS:PRED_HORIZONS + 1].set(p["rca_w_t"][D:])
    head_B = head_B.at[:, PRED_HORIZONS + 1:PRED_HORIZONS + 1 + FAIL_HORIZONS].set(p["fail_w_t"])
    head_bias = jnp.zeros((1, OUT_LANES), jnp.float32)
    head_bias = head_bias.at[:, 0:PRED_HORIZONS].set(p["pred_b"])
    head_bias = head_bias.at[:, PRED_HORIZONS:PRED_HORIZONS + 1].set(p["rca_b"])
    head_bias = head_bias.at[:, PRED_HORIZONS + 1:PRED_HORIZONS + 1 + FAIL_HORIZONS].set(p["fail_b"])
    named["head_A"] = head_A
    named["head_B"] = head_B
    named["head_bias"] = head_bias

    blocks = []
    for name, shape in _PARAM_SHAPES:
        a = named[name]
        assert tuple(a.shape) == shape, (name, a.shape, shape)
        rows_pad = ((shape[0] + 7) // 8) * 8
        blocks.append(jnp.pad(a, ((0, rows_pad - shape[0]), (0, SLAB_LANES - shape[1]))))
    slab = jnp.concatenate(blocks, axis=0)
    assert slab.shape == (SLAB_ROWS, SLAB_LANES)
    return slab


# ----------------------------- forward pass -----------------------------
@jax.jit
def forward(wslab, x_features, sensor_mask):
    B, T, S = x_features.shape                       # S == MAX_SENSORS
    BS = B * S
    mask_f = sensor_mask.astype(jnp.float32)
    # Same layout transform PyTorch performs: (B,T,S) -> (B,S,T) -> (B*S, T)
    x_seq = jnp.transpose(x_features, (0, 2, 1)).reshape(BS, T)

    # Pack x + mask into one small input slab (one DMA).
    inp = jnp.zeros((BS, INP_WIDTH), jnp.float32)
    inp = inp.at[:, 0:T].set(x_seq)
    inp = inp.at[:, INP_MASKCOL].set(mask_f.reshape(BS))
    inp = inp.at[:B, INP_MASK2D:INP_MASK2D + S].set(mask_f)

    slab = pl.pallas_call(
        fused_forward_kernel,
        grid=(1,),
        in_specs=[pl.BlockSpec((BS, INP_WIDTH), lambda i: (0, 0)),
                  pl.BlockSpec((SLAB_ROWS, SLAB_LANES), lambda i: (0, 0))],
        out_specs=pl.BlockSpec((BS, OUT_LANES), lambda i: (0, 0)),
        out_shape=jax.ShapeDtypeStruct((BS, OUT_LANES), jnp.float32),
    )(inp, wslab)

    pred = slab[:, :PRED_HORIZONS].reshape(B, S, PRED_HORIZONS)
    rca = slab[:, PRED_HORIZONS].reshape(B, S)
    fail = slab.reshape(B, S, OUT_LANES)[:, 0, PRED_HORIZONS + 1:PRED_HORIZONS + 1 + FAIL_HORIZONS]
    return pred, fail, rca


# ----------------------------- main -----------------------------
if __name__ == "__main__":
    params = init_params(jax.random.PRNGKey(0))
    wslab = pack_params(params)

    kx, _ = jax.random.split(jax.random.PRNGKey(0))
    x_features = jax.random.normal(kx, (BATCH, SEQ_LEN, MAX_SENSORS), dtype=jnp.float32)
    sensor_mask = jnp.array([[1, 1, 1, 1, 1, 1, 0, 0],
                             [1, 1, 1, 0, 0, 0, 0, 0]], dtype=jnp.float32)

    pred, fail, rca = forward(wslab, x_features, sensor_mask)
    jax.block_until_ready((pred, fail, rca))

    assert pred.shape == (BATCH, MAX_SENSORS, PRED_HORIZONS)
    assert fail.shape == (BATCH, FAIL_HORIZONS)
    assert rca.shape == (BATCH, MAX_SENSORS)
    assert bool(jnp.all(jnp.isfinite(pred)))
    assert bool(jnp.all(jnp.isfinite(fail)))
    assert bool(jnp.all(jnp.isfinite(rca)))
    print("KERNEL_OK")
</pallas_src>

<mosaic_0001>
module attributes {stable_mosaic.version = 11 : i64} {
  func.func @fused_forward_kernel(%arg0: i32, %arg1: memref<16x24xf32, #tpu.memory_space<vmem>>, %arg2: memref<840x128xf32, #tpu.memory_space<vmem>>, %arg3: memref<16x128xf32, #tpu.memory_space<vmem>>) attributes {dimension_semantics = [#tpu.dimension_semantics<arbitrary>], iteration_bounds = array<i64: 1>, scalar_prefetch = 0 : i64, scratch_operands = 0 : i64, tpu.core_type = #tpu.core_type<tc>, window_params = [{pipeline_mode = #tpu.pipeline_mode<synchronous>, transform_indices = @transform_0, window_bounds = array<i64: 16, 24>}, {pipeline_mode = #tpu.pipeline_mode<synchronous>, transform_indices = @transform_1, window_bounds = array<i64: 840, 128>}, {pipeline_mode = #tpu.pipeline_mode<synchronous>, transform_indices = @transform_2, window_bounds = array<i64: 16, 128>}]} {
    %c0 = arith.constant 0 : index
    %c0_0 = arith.constant 0 : index
    %0 = vector.load %arg1[%c0, %c0_0] : memref<16x24xf32, #tpu.memory_space<vmem>>, vector<16x8xf32>
    %c0_1 = arith.constant 0 : index
    %c8 = arith.constant 8 : index
    %1 = vector.load %arg1[%c0_1, %c8] : memref<16x24xf32, #tpu.memory_space<vmem>>, vector<16x1xf32>
    %c0_2 = arith.constant 0 : index
    %c16 = arith.constant 16 : index
    %2 = vector.load %arg1[%c0_2, %c16] : memref<16x24xf32, #tpu.memory_space<vmem>>, vector<2x8xf32>
    %c0_3 = arith.constant 0 : index
    %c0_4 = arith.constant 0 : index
    %3 = vector.load %arg2[%c0_3, %c0_4] : memref<840x128xf32, #tpu.memory_space<vmem>>, vector<1x64xf32>
    %c8_5 = arith.constant 8 : index
    %c0_6 = arith.constant 0 : index
    %4 = vector.load %arg2[%c8_5, %c0_6] : memref<840x128xf32, #tpu.memory_space<vmem>>, vector<16x64xf32>
    %c24 = arith.constant 24 : index
    %c0_7 = arith.constant 0 : index
    %5 = vector.load %arg2[%c24, %c0_7] : memref<840x128xf32, #tpu.memory_space<vmem>>, vector<1x64xf32>
    %6 = vector.extract_strided_slice %0 {offsets = [0, 0], sizes = [16, 1], strides = [1, 1]} : vector<16x8xf32> to vector<16x1xf32>
    %7 = vector.broadcast %6 : vector<16x1xf32> to vector<16x64xf32>
    %8 = vector.broadcast %3 : vector<1x64xf32> to vector<16x64xf32>
    %9 = arith.mulf %7, %8 : vector<16x64xf32>
    %10 = vector.broadcast %5 : vector<1x64xf32> to vector<16x64xf32>
    %11 = arith.addf %9, %10 : vector<16x64xf32>
    %12 = vector.extract_strided_slice %0 {offsets = [0, 1], sizes = [16, 1], strides = [1, 1]} : vector<16x8xf32> to vector<16x1xf32>
    %13 = vector.broadcast %12 : vector<16x1xf32> to vector<16x64xf32>
    %14 = vector.broadcast %3 : vector<1x64xf32> to vector<16x64xf32>
    %15 = arith.mulf %13, %14 : vector<16x64xf32>
    %16 = vector.broadcast %5 : vector<1x64xf32> to vector<16x64xf32>
    %17 = arith.addf %15, %16 : vector<16x64xf32>
    %18 = vector.extract_strided_slice %0 {offsets = [0, 2], sizes = [16, 1], strides = [1, 1]} : vector<16x8xf32> to vector<16x1xf32>
    %19 = vector.broadcast %18 : vector<16x1xf32> to vector<16x64xf32>
    %20 = vector.broadcast %3 : vector<1x64xf32> to vector<16x64xf32>
    %21 = arith.mulf %19, %20 : vector<16x64xf32>
    %22 = vector.broadcast %5 : vector<1x64xf32> to vector<16x64xf32>
    %23 = arith.addf %21, %22 : vector<16x64xf32>
    %24 = vector.extract_strided_slice %0 {offsets = [0, 3], sizes = [16, 1], strides = [1, 1]} : vector<16x8xf32> to vector<16x1xf32>
    %25 = vector.broadcast %24 : vector<16x1xf32> to vector<16x64xf32>
    %26 = vector.broadcast %3 : vector<1x64xf32> to vector<16x64xf32>
    %27 = arith.mulf %25, %26 : vector<16x64xf32>
    %28 = vector.broadcast %5 : vector<1x64xf32> to vector<16x64xf32>
    %29 = arith.addf %27, %28 : vector<16x64xf32>
    %30 = vector.extract_strided_slice %0 {offsets = [0, 4], sizes = [16, 1], strides = [1, 1]} : vector<16x8xf32> to vector<16x1xf32>
    %31 = vector.broadcast %30 : vector<16x1xf32> to vector<16x64xf32>
    %32 = vector.broadcast %3 : vector<1x64xf32> to vector<16x64xf32>
    %33 = arith.mulf %31, %32 : vector<16x64xf32>
    %34 = vector.broadcast %5 : vector<1x64xf32> to vector<16x64xf32>
    %35 = arith.addf %33, %34 : vector<16x64xf32>
    %36 = vector.extract_strided_slice %0 {offsets = [0, 5], sizes = [16, 1], strides = [1, 1]} : vector<16x8xf32> to vector<16x1xf32>
    %37 = vector.broadcast %36 : vector<16x1xf32> to vector<16x64xf32>
    %38 = vector.broadcast %3 : vector<1x64xf32> to vector<16x64xf32>
    %39 = arith.mulf %37, %38 : vector<16x64xf32>
    %40 = vector.broadcast %5 : vector<1x64xf32> to vector<16x64xf32>
    %41 = arith.addf %39, %40 : vector<16x64xf32>
    %42 = vector.extract_strided_slice %0 {offsets = [0, 6], sizes = [16, 1], strides = [1, 1]} : vector<16x8xf32> to vector<16x1xf32>
    %43 = vector.broadcast %42 : vector<16x1xf32> to vector<16x64xf32>
    %44 = vector.broadcast %3 : vector<1x64xf32> to vector<16x64xf32>
    %45 = arith.mulf %43, %44 : vector<16x64xf32>
    %46 = vector.broadcast %5 : vector<1x64xf32> to vector<16x64xf32>
    %47 = arith.addf %45, %46 : vector<16x64xf32>
    %48 = vector.extract_strided_slice %0 {offsets = [0, 7], sizes = [16, 1], strides = [1, 1]} : vector<16x8xf32> to vector<16x1xf32>
    %49 = vector.broadcast %48 : vector<16x1xf32> to vector<16x64xf32>
    %50 = vector.broadcast %3 : vector<1x64xf32> to vector<16x64xf32>
    %51 = arith.mulf %49, %50 : vector<16x64xf32>
    %52 = vector.broadcast %5 : vector<1x64xf32> to vector<16x64xf32>
    %53 = arith.addf %51, %52 : vector<16x64xf32>
    %cst = arith.constant 0.000000e+00 : f32
    %54 = vector.broadcast %cst : f32 to vector<16x16xf32>
    %cst_8 = arith.constant 0.000000e+00 : f32
    %55 = vector.broadcast %cst_8 : f32 to vector<16x16xf32>
    %cst_9 = arith.constant dense<0.000000e+00> : vector<16x64xf32>
    %56 = tpu.matmul %54, %4, %cst_9 {dimension_numbers = #tpu.dot_dimension_numbers<[1], [0], [0], [1], [0, 0, 1, 1], [], []>} : vector<16x16xf32>, vector<16x64xf32>, vector<16x64xf32> -> vector<16x64xf32>
    %57 = arith.addf %11, %56 : vector<16x64xf32>
    %58 = arith.negf %57 : vector<16x64xf32>
    %59 = math.exp %58 : vector<16x64xf32>
    %cst_10 = arith.constant 1.000000e+00 : f32
    %60 = vector.broadcast %cst_10 : f32 to vector<16x64xf32>
    %61 = arith.addf %60, %59 : vector<16x64xf32>
    %62 = arith.divf %60, %61 : vector<16x64xf32>
    %63 = math.tanh %57 : vector<16x64xf32>
    %64 = vector.extract_strided_slice %62 {offsets = [0, 0], sizes = [16, 16], strides = [1, 1]} : vector<16x64xf32> to vector<16x16xf32>
    %65 = vector.extract_strided_slice %62 {offsets = [0, 16], sizes = [16, 16], strides = [1, 1]} : vector<16x64xf32> to vector<16x16xf32>
    %66 = vector.extract_strided_slice %62 {offsets = [0, 48], sizes = [16, 16], strides = [1, 1]} : vector<16x64xf32> to vector<16x16xf32>
    %67 = vector.extract_strided_slice %63 {offsets = [0, 32], sizes = [16, 16], strides = [1, 1]} : vector<16x64xf32> to vector<16x16xf32>
    %68 = arith.mulf %65, %55 : vector<16x16xf32>
    %69 = arith.mulf %64, %67 : vector<16x16xf32>
    %70 = arith.addf %68, %69 : vector<16x16xf32>
    %71 = math.tanh %70 : vector<16x16xf32>
    %72 = arith.mulf %66, %71 : vector<16x16xf32>
    %cst_11 = arith.constant dense<0.000000e+00> : vector<16x64xf32>
    %73 = tpu.matmul %72, %4, %cst_11 {dimension_numbers = #tpu.dot_dimension_numbers<[1], [0], [0], [1], [0, 0, 1, 1], [], []>} : vector<16x16xf32>, vector<16x64xf32>, vector<16x64xf32> -> vector<16x64xf32>
    %74 = arith.addf %17, %73 : vector<16x64xf32>
    %75 = arith.negf %74 : vector<16x64xf32>
    %76 = math.exp %75 : vector<16x64xf32>
    %cst_12 = arith.constant 1.000000e+00 : f32
    %77 = vector.broadcast %cst_12 : f32 to vector<16x64xf32>
    %78 = arith.addf %77, %76 : vector<16x64xf32>
    %79 = arith.divf %77, %78 : vector<16x64xf32>
    %80 = math.tanh %74 : vector<16x64xf32>
    %81 = vector.extract_strided_slice %79 {offsets = [0, 0], sizes = [16, 16], strides = [1, 1]} : vector<16x64xf32> to vector<16x16xf32>
    %82 = vector.extract_strided_slice %79 {offsets = [0, 16], sizes = [16, 16], strides = [1, 1]} : vector<16x64xf32> to vector<16x16xf32>
    %83 = vector.extract_strided_slice %79 {offsets = [0, 48], sizes = [16, 16], strides = [1, 1]} : vector<16x64xf32> to vector<16x16xf32>
    %84 = vector.extract_strided_slice %80 {offsets = [0, 32], sizes = [16, 16], strides = [1, 1]} : vector<16x64xf32> to vector<16x16xf32>
    %85 = arith.mulf %82, %70 : vector<16x16xf32>
    %86 = arith.mulf %81, %84 : vector<16x16xf32>
    %87 = arith.addf %85, %86 : vector<16x16xf32>
    %88 = math.tanh %87 : vector<16x16xf32>
    %89 = arith.mulf %83, %88 : vector<16x16xf32>
    %cst_13 = arith.constant dense<0.000000e+00> : vector<16x64xf32>
    %90 = tpu.matmul %89, %4, %cst_13 {dimension_numbers = #tpu.dot_dimension_numbers<[1], [0], [0], [1], [0, 0, 1, 1], [], []>} : vector<16x16xf32>, vector<16x64xf32>, vector<16x64xf32> -> vector<16x64xf32>
    %91 = arith.addf %23, %90 : vector<16x64xf32>
    %92 = arith.negf %91 : vector<16x64xf32>
    %93 = math.exp %92 : vector<16x64xf32>
    %cst_14 = arith.constant 1.000000e+00 : f32
    %94 = vector.broadcast %cst_14 : f32 to vector<16x64xf32>
    %95 = arith.addf %94, %93 : vector<16x64xf32>
    %96 = arith.divf %94, %95 : vector<16x64xf32>
    %97 = math.tanh %91 : vector<16x64xf32>
    %98 = vector.extract_strided_slice %96 {offsets = [0, 0], sizes = [16, 16], strides = [1, 1]} : vector<16x64xf32> to vector<16x16xf32>
    %99 = vector.extract_strided_slice %96 {offsets = [0, 16], sizes = [16, 16], strides = [1, 1]} : vector<16x64xf32> to vector<16x16xf32>
    %100 = vector.extract_strided_slice %96 {offsets = [0, 48], sizes = [16, 16], strides = [1, 1]} : vector<16x64xf32> to vector<16x16xf32>
    %101 = vector.extract_strided_slice %97 {offsets = [0, 32], sizes = [16, 16], strides = [1, 1]} : vector<16x64xf32> to vector<16x16xf32>
    %102 = arith.mulf %99, %87 : vector<16x16xf32>
    %103 = arith.mulf %98, %101 : vector<16x16xf32>
    %104 = arith.addf %102, %103 : vector<16x16xf32>
    %105 = math.tanh %104 : vector<16x16xf32>
    %106 = arith.mulf %100, %105 : vector<16x16xf32>
    %cst_15 = arith.constant dense<0.000000e+00> : vector<16x64xf32>
    %107 = tpu.matmul %106, %4, %cst_15 {dimension_numbers = #tpu.dot_dimension_numbers<[1], [0], [0], [1], [0, 0, 1, 1], [], []>} : vector<16x16xf32>, vector<16x64xf32>, vector<16x64xf32> -> vector<16x64xf32>
    %108 = arith.addf %29, %107 : vector<16x64xf32>
    %109 = arith.negf %108 : vector<16x64xf32>
    %110 = math.exp %109 : vector<16x64xf32>
    %cst_16 = arith.constant 1.000000e+00 : f32
    %111 = vector.broadcast %cst_16 : f32 to vector<16x64xf32>
    %112 = arith.addf %111, %110 : vector<16x64xf32>
    %113 = arith.divf %111, %112 : vector<16x64xf32>
    %114 = math.tanh %108 : vector<16x64xf32>
    %115 = vector.extract_strided_slice %113 {offsets = [0, 0], sizes = [16, 16], strides = [1, 1]} : vector<16x64xf32> to vector<16x16xf32>
    %116 = vector.extract_strided_slice %113 {offsets = [0, 16], sizes = [16, 16], strides = [1, 1]} : vector<16x64xf32> to vector<16x16xf32>
    %117 = vector.extract_strided_slice %113 {offsets = [0, 48], sizes = [16, 16], strides = [1, 1]} : vector<16x64xf32> to vector<16x16xf32>
    %118 = vector.extract_strided_slice %114 {offsets = [0, 32], sizes = [16, 16], strides = [1, 1]} : vector<16x64xf32> to vector<16x16xf32>
    %119 = arith.mulf %116, %104 : vector<16x16xf32>
    %120 = arith.mulf %115, %118 : vector<16x16xf32>
    %121 = arith.addf %119, %120 : vector<16x16xf32>
    %122 = math.tanh %121 : vector<16x16xf32>
    %123 = arith.mulf %117, %122 : vector<16x16xf32>
    %cst_17 = arith.constant dense<0.000000e+00> : vector<16x64xf32>
    %124 = tpu.matmul %123, %4, %cst_17 {dimension_numbers = #tpu.dot_dimension_numbers<[1], [0], [0], [1], [0, 0, 1, 1], [], []>} : vector<16x16xf32>, vector<16x64xf32>, vector<16x64xf32> -> vector<16x64xf32>
    %125 = arith.addf %35, %124 : vector<16x64xf32>
    %126 = arith.negf %125 : vector<16x64xf32>
    %127 = math.exp %126 : vector<16x64xf32>
    %cst_18 = arith.constant 1.000000e+00 : f32
    %128 = vector.broadcast %cst_18 : f32 to vector<16x64xf32>
    %129 = arith.addf %128, %127 : vector<16x64xf32>
    %130 = arith.divf %128, %129 : vector<16x64xf32>
    %131 = math.tanh %125 : vector<16x64xf32>
    %132 = vector.extract_strided_slice %130 {offsets = [0, 0], sizes = [16, 16], strides = [1, 1]} : vector<16x64xf32> to vector<16x16xf32>
    %133 = vector.extract_strided_slice %130 {offsets = [0, 16], sizes = [16, 16], strides = [1, 1]} : vector<16x64xf32> to vector<16x16xf32>
    %134 = vector.extract_strided_slice %130 {offsets = [0, 48], sizes = [16, 16], strides = [1, 1]} : vector<16x64xf32> to vector<16x16xf32>
    %135 = vector.extract_strided_slice %131 {offsets = [0, 32], sizes = [16, 16], strides = [1, 1]} : vector<16x64xf32> to vector<16x16xf32>
    %136 = arith.mulf %133, %121 : vector<16x16xf32>
    %137 = arith.mulf %132, %135 : vector<16x16xf32>
    %138 = arith.addf %136, %137 : vector<16x16xf32>
    %139 = math.tanh %138 : vector<16x16xf32>
    %140 = arith.mulf %134, %139 : vector<16x16xf32>
    %cst_19 = arith.constant dense<0.000000e+00> : vector<16x64xf32>
    %141 = tpu.matmul %140, %4, %cst_19 {dimension_numbers = #tpu.dot_dimension_numbers<[1], [0], [0], [1], [0, 0, 1, 1], [], []>} : vector<16x16xf32>, vector<16x64xf32>, vector<16x64xf32> -> vector<16x64xf32>
    %142 = arith.addf %41, %141 : vector<16x64xf32>
    %143 = arith.negf %142 : vector<16x64xf32>
    %144 = math.exp %143 : vector<16x64xf32>
    %cst_20 = arith.constant 1.000000e+00 : f32
    %145 = vector.broadcast %cst_20 : f32 to vector<16x64xf32>
    %146 = arith.addf %145, %144 : vector<16x64xf32>
    %147 = arith.divf %145, %146 : vector<16x64xf32>
    %148 = math.tanh %142 : vector<16x64xf32>
    %149 = vector.extract_strided_slice %147 {offsets = [0, 0], sizes = [16, 16], strides = [1, 1]} : vector<16x64xf32> to vector<16x16xf32>
    %150 = vector.extract_strided_slice %147 {offsets = [0, 16], sizes = [16, 16], strides = [1, 1]} : vector<16x64xf32> to vector<16x16xf32>
    %151 = vector.extract_strided_slice %147 {offsets = [0, 48], sizes = [16, 16], strides = [1, 1]} : vector<16x64xf32> to vector<16x16xf32>
    %152 = vector.extract_strided_slice %148 {offsets = [0, 32], sizes = [16, 16], strides = [1, 1]} : vector<16x64xf32> to vector<16x16xf32>
    %153 = arith.mulf %150, %138 : vector<16x16xf32>
    %154 = arith.mulf %149, %152 : vector<16x16xf32>
    %155 = arith.addf %153, %154 : vector<16x16xf32>
    %156 = math.tanh %155 : vector<16x16xf32>
    %157 = arith.mulf %151, %156 : vector<16x16xf32>
    %cst_21 = arith.constant dense<0.000000e+00> : vector<16x64xf32>
    %158 = tpu.matmul %157, %4, %cst_21 {dimension_numbers = #tpu.dot_dimension_numbers<[1], [0], [0], [1], [0, 0, 1, 1], [], []>} : vector<16x16xf32>, vector<16x64xf32>, vector<16x64xf32> -> vector<16x64xf32>
    %159 = arith.addf %47, %158 : vector<16x64xf32>
    %160 = arith.negf %159 : vector<16x64xf32>
    %161 = math.exp %160 : vector<16x64xf32>
    %cst_22 = arith.constant 1.000000e+00 : f32
    %162 = vector.broadcast %cst_22 : f32 to vector<16x64xf32>
    %163 = arith.addf %162, %161 : vector<16x64xf32>
    %164 = arith.divf %162, %163 : vector<16x64xf32>
    %165 = math.tanh %159 : vector<16x64xf32>
    %166 = vector.extract_strided_slice %164 {offsets = [0, 0], sizes = [16, 16], strides = [1, 1]} : vector<16x64xf32> to vector<16x16xf32>
    %167 = vector.extract_strided_slice %164 {offsets = [0, 16], sizes = [16, 16], strides = [1, 1]} : vector<16x64xf32> to vector<16x16xf32>
    %168 = vector.extract_strided_slice %164 {offsets = [0, 48], sizes = [16, 16], strides = [1, 1]} : vector<16x64xf32> to vector<16x16xf32>
    %169 = vector.extract_strided_slice %165 {offsets = [0, 32], sizes = [16, 16], strides = [1, 1]} : vector<16x64xf32> to vector<16x16xf32>
    %170 = arith.mulf %167, %155 : vector<16x16xf32>
    %171 = arith.mulf %166, %169 : vector<16x16xf32>
    %172 = arith.addf %170, %171 : vector<16x16xf32>
    %173 = math.tanh %172 : vector<16x16xf32>
    %174 = arith.mulf %168, %173 : vector<16x16xf32>
    %cst_23 = arith.constant dense<0.000000e+00> : vector<16x64xf32>
    %175 = tpu.matmul %174, %4, %cst_23 {dimension_numbers = #tpu.dot_dimension_numbers<[1], [0], [0], [1], [0, 0, 1, 1], [], []>} : vector<16x16xf32>, vector<16x64xf32>, vector<16x64xf32> -> vector<16x64xf32>
    %176 = arith.addf %53, %175 : vector<16x64xf32>
    %177 = arith.negf %176 : vector<16x64xf32>
    %178 = math.exp %177 : vector<16x64xf32>
    %cst_24 = arith.constant 1.000000e+00 : f32
    %179 = vector.broadcast %cst_24 : f32 to vector<16x64xf32>
    %180 = arith.addf %179, %178 : vector<16x64xf32>
    %181 = arith.divf %179, %180 : vector<16x64xf32>
    %182 = math.tanh %176 : vector<16x64xf32>
    %183 = vector.extract_strided_slice %181 {offsets = [0, 0], sizes = [16, 16], strides = [1, 1]} : vector<16x64xf32> to vector<16x16xf32>
    %184 = vector.extract_strided_slice %181 {offsets = [0, 16], sizes = [16, 16], strides = [1, 1]} : vector<16x64xf32> to vector<16x16xf32>
    %185 = vector.extract_strided_slice %181 {offsets = [0, 48], sizes = [16, 16], strides = [1, 1]} : vector<16x64xf32> to vector<16x16xf32>
    %186 = vector.extract_strided_slice %182 {offsets = [0, 32], sizes = [16, 16], strides = [1, 1]} : vector<16x64xf32> to vector<16x16xf32>
    %187 = arith.mulf %184, %172 : vector<16x16xf32>
    %188 = arith.mulf %183, %186 : vector<16x16xf32>
    %189 = arith.addf %187, %188 : vector<16x16xf32>
    %190 = math.tanh %189 : vector<16x16xf32>
    %191 = arith.mulf %185, %190 : vector<16x16xf32>
    %192 = vector.broadcast %1 : vector<16x1xf32> to vector<16x16xf32>
    %193 = arith.mulf %191, %192 : vector<16x16xf32>
    %c32 = arith.constant 32 : index
    %c0_25 = arith.constant 0 : index
    %194 = vector.load %arg2[%c32, %c0_25] : memref<840x128xf32, #tpu.memory_space<vmem>>, vector<16x32xf32>
    %cst_26 = arith.constant dense<0.000000e+00> : vector<16x32xf32>
    %195 = tpu.matmul %193, %194, %cst_26 {dimension_numbers = #tpu.dot_dimension_numbers<[1], [0], [0], [1], [0, 0, 1, 1], [], []>} : vector<16x16xf32>, vector<16x32xf32>, vector<16x32xf32> -> vector<16x32xf32>
    %c48 = arith.constant 48 : index
    %c0_27 = arith.constant 0 : index
    %196 = vector.load %arg2[%c48, %c0_27] : memref<840x128xf32, #tpu.memory_space<vmem>>, vector<1x32xf32>
    %197 = vector.broadcast %196 : vector<1x32xf32> to vector<16x32xf32>
    %198 = arith.addf %195, %197 : vector<16x32xf32>
    %199 = vector.shape_cast %198 : vector<16x32xf32> to vector<2x8x32xf32>
    %c56 = arith.constant 56 : index
    %c0_28 = arith.constant 0 : index
    %200 = vector.load %arg2[%c56, %c0_28] : memref<840x128xf32, #tpu.memory_space<vmem>>, vector<8x32xf32>
    %201 = vector.shape_cast %200 : vector<8x32xf32> to vector<1x8x32xf32>
    %202 = vector.broadcast %201 : vector<1x8x32xf32> to vector<2x8x32xf32>
    %203 = arith.addf %199, %202 : vector<2x8x32xf32>
    %cst_29 = arith.constant 0.000000e+00 : f32
    %204 = vector.broadcast %cst_29 : f32 to vector<2x8xf32>
    %205 = arith.cmpf oeq, %2, %204 : vector<2x8xf32>
    %cst_30 = arith.constant -1.000000e+09 : f32
    %cst_31 = arith.constant 0.000000e+00 : f32
    %206 = vector.broadcast %cst_30 : f32 to vector<2x8xf32>
    %207 = vector.broadcast %cst_31 : f32 to vector<2x8xf32>
    %208 = arith.select %205, %206, %207 : vector<2x8xi1>, vector<2x8xf32>
    %209 = vector.shape_cast %208 : vector<2x8xf32> to vector<2x1x8xf32>
    %210 = vector.shape_cast %203 : vector<2x8x32xf32> to vector<16x32xf32>
    %c64 = arith.constant 64 : index
    %c0_32 = arith.constant 0 : index
    %211 = vector.load %arg2[%c64, %c0_32] : memref<840x128xf32, #tpu.memory_space<vmem>>, vector<32x96xf32>
    %cst_33 = arith.constant dense<0.000000e+00> : vector<16x96xf32>
    %212 = tpu.matmul %210, %211, %cst_33 {dimension_numbers = #tpu.dot_dimension_numbers<[1], [0], [0], [1], [0, 0, 1, 1], [], []>} : vector<16x32xf32>, vector<32x96xf32>, vector<16x96xf32> -> vector<16x96xf32>
    %c96 = arith.constant 96 : index
    %c0_34 = arith.constant 0 : index
    %213 = vector.load %arg2[%c96, %c0_34] : memref<840x128xf32, #tpu.memory_space<vmem>>, vector<1x96xf32>
    %214 = vector.broadcast %213 : vector<1x96xf32> to vector<16x96xf32>
    %215 = arith.addf %212, %214 : vector<16x96xf32>
    %216 = vector.shape_cast %215 : vector<16x96xf32> to vector<2x8x96xf32>
    %217 = vector.extract_strided_slice %216 {offsets = [0, 0, 0], sizes = [2, 8, 8], strides = [1, 1, 1]} : vector<2x8x96xf32> to vector<2x8x8xf32>
    %218 = vector.extract_strided_slice %216 {offsets = [0, 0, 32], sizes = [2, 8, 8], strides = [1, 1, 1]} : vector<2x8x96xf32> to vector<2x8x8xf32>
    "tpu.trace_start"() <{level = 10 : i32, message = "bqd,bkd->bqk"}> : () -> ()
    %cst_35 = arith.constant dense<0.000000e+00> : vector<2x8x8xf32>
    %219 = tpu.matmul %217, %218, %cst_35 {dimension_numbers = #tpu.dot_dimension_numbers<[2], [2], [1], [1], [0, 0, 0, 1, 1, 1], [0], [0]>} : vector<2x8x8xf32>, vector<2x8x8xf32>, vector<2x8x8xf32> -> vector<2x8x8xf32>
    "tpu.trace_stop"() : () -> ()
    %cst_36 = arith.constant 0.353553385 : f32
    %220 = vector.broadcast %cst_36 : f32 to vector<2x8x8xf32>
    %221 = arith.mulf %219, %220 : vector<2x8x8xf32>
    %222 = vector.broadcast %209 : vector<2x1x8xf32> to vector<2x8x8xf32>
    %223 = arith.addf %221, %222 : vector<2x8x8xf32>
    %224 = vector.extract_strided_slice %216 {offsets = [0, 0, 8], sizes = [2, 8, 8], strides = [1, 1, 1]} : vector<2x8x96xf32> to vector<2x8x8xf32>
    %225 = vector.extract_strided_slice %216 {offsets = [0, 0, 40], sizes = [2, 8, 8], strides = [1, 1, 1]} : vector<2x8x96xf32> to vector<2x8x8xf32>
    "tpu.trace_start"() <{level = 10 : i32, message = "bqd,bkd->bqk"}> : () -> ()
    %cst_37 = arith.constant dense<0.000000e+00> : vector<2x8x8xf32>
    %226 = tpu.matmul %224, %225, %cst_37 {dimension_numbers = #tpu.dot_dimension_numbers<[2], [2], [1], [1], [0, 0, 0, 1, 1, 1], [0], [0]>} : vector<2x8x8xf32>, vector<2x8x8xf32>, vector<2x8x8xf32> -> vector<2x8x8xf32>
    "tpu.trace_stop"() : () -> ()
    %cst_38 = arith.constant 0.353553385 : f32
    %227 = vector.broadcast %cst_38 : f32 to vector<2x8x8xf32>
    %228 = arith.mulf %226, %227 : vector<2x8x8xf32>
    %229 = vector.broadcast %209 : vector<2x1x8xf32> to vector<2x8x8xf32>
    %230 = arith.addf %228, %229 : vector<2x8x8xf32>
    %231 = vector.extract_strided_slice %216 {offsets = [0, 0, 16], sizes = [2, 8, 8], strides = [1, 1, 1]} : vector<2x8x96xf32> to vector<2x8x8xf32>
    %232 = vector.extract_strided_slice %216 {offsets = [0, 0, 48], sizes = [2, 8, 8], strides = [1, 1, 1]} : vector<2x8x96xf32> to vector<2x8x8xf32>
    "tpu.trace_start"() <{level = 10 : i32, message = "bqd,bkd->bqk"}> : () -> ()
    %cst_39 = arith.constant dense<0.000000e+00> : vector<2x8x8xf32>
    %233 = tpu.matmul %231, %232, %cst_39 {dimension_numbers = #tpu.dot_dimension_numbers<[2], [2], [1], [1], [0, 0, 0, 1, 1, 1], [0], [0]>} : vector<2x8x8xf32>, vector<2x8x8xf32>, vector<2x8x8xf32> -> vector<2x8x8xf32>
    "tpu.trace_stop"() : () -> ()
    %cst_40 = arith.constant 0.353553385 : f32
    %234 = vector.broadcast %cst_40 : f32 to vector<2x8x8xf32>
    %235 = arith.mulf %233, %234 : vector<2x8x8xf32>
    %236 = vector.broadcast %209 : vector<2x1x8xf32> to vector<2x8x8xf32>
    %237 = arith.addf %235, %236 : vector<2x8x8xf32>
    %238 = vector.extract_strided_slice %216 {offsets = [0, 0, 24], sizes = [2, 8, 8], strides = [1, 1, 1]} : vector<2x8x96xf32> to vector<2x8x8xf32>
    %239 = vector.extract_strided_slice %216 {offsets = [0, 0, 56], sizes = [2, 8, 8], strides = [1, 1, 1]} : vector<2x8x96xf32> to vector<2x8x8xf32>
    "tpu.trace_start"() <{level = 10 : i32, message = "bqd,bkd->bqk"}> : () -> ()
    %cst_41 = arith.constant dense<0.000000e+00> : vector<2x8x8xf32>
    %240 = tpu.matmul %238, %239, %cst_41 {dimension_numbers = #tpu.dot_dimension_numbers<[2], [2], [1], [1], [0, 0, 0, 1, 1, 1], [0], [0]>} : vector<2x8x8xf32>, vector<2x8x8xf32>, vector<2x8x8xf32> -> vector<2x8x8xf32>
    "tpu.trace_stop"() : () -> ()
    %cst_42 = arith.constant 0.353553385 : f32
    %241 = vector.broadcast %cst_42 : f32 to vector<2x8x8xf32>
    %242 = arith.mulf %240, %241 : vector<2x8x8xf32>
    %243 = vector.broadcast %209 : vector<2x1x8xf32> to vector<2x8x8xf32>
    %244 = arith.addf %242, %243 : vector<2x8x8xf32>
    %245 = tpu.concatenate %223, %230, %237, %244 in 0 : vector<2x8x8xf32>, vector<2x8x8xf32>, vector<2x8x8xf32>, vector<2x8x8xf32> -> vector<8x8x8xf32>
    %cst_43 = arith.constant dense<0xFF800000> : vector<8x8xf32>
    %246 = vector.multi_reduction <maximumf>, %245, %cst_43 [2] : vector<8x8x8xf32> to vector<8x8xf32>
    %247 = vector.shape_cast %246 : vector<8x8xf32> to vector<8x8x1xf32>
    %248 = vector.broadcast %247 : vector<8x8x1xf32> to vector<8x8x8xf32>
    %249 = arith.subf %245, %248 : vector<8x8x8xf32>
    %250 = math.exp %249 : vector<8x8x8xf32>
    %cst_44 = arith.constant dense<0.000000e+00> : vector<8x8xf32>
    %251 = vector.multi_reduction <add>, %250, %cst_44 [2] : vector<8x8x8xf32> to vector<8x8xf32>
    %252 = vector.shape_cast %251 : vector<8x8xf32> to vector<8x8x1xf32>
    %253 = tpu.reciprocal %252 {approx = true} : vector<8x8x1xf32> -> vector<8x8x1xf32>
    %254 = vector.broadcast %253 : vector<8x8x1xf32> to vector<8x8x8xf32>
    %255 = arith.mulf %250, %254 : vector<8x8x8xf32>
    %c104 = arith.constant 104 : index
    %c0_45 = arith.constant 0 : index
    %256 = vector.load %arg2[%c104, %c0_45] : memref<840x128xf32, #tpu.memory_space<vmem>>, vector<32x32xf32>
    %c136 = arith.constant 136 : index
    %c0_46 = arith.constant 0 : index
    %257 = vector.load %arg2[%c136, %c0_46] : memref<840x128xf32, #tpu.memory_space<vmem>>, vector<1x32xf32>
    %258 = vector.extract_strided_slice %216 {offsets = [0, 0, 64], sizes = [2, 8, 8], strides = [1, 1, 1]} : vector<2x8x96xf32> to vector<2x8x8xf32>
    %259 = vector.extract_strided_slice %255 {offsets = [0, 0, 0], sizes = [2, 8, 8], strides = [1, 1, 1]} : vector<8x8x8xf32> to vector<2x8x8xf32>
    "tpu.trace_start"() <{level = 10 : i32, message = "bqk,bkd->bqd"}> : () -> ()
    %cst_47 = arith.constant dense<0.000000e+00> : vector<2x8x8xf32>
    %260 = tpu.matmul %259, %258, %cst_47 {dimension_numbers = #tpu.dot_dimension_numbers<[2], [1], [1], [2], [0, 0, 0, 1, 1, 2], [0], [0]>} : vector<2x8x8xf32>, vector<2x8x8xf32>, vector<2x8x8xf32> -> vector<2x8x8xf32>
    "tpu.trace_stop"() : () -> ()
    %261 = vector.shape_cast %260 : vector<2x8x8xf32> to vector<16x8xf32>
    %262 = vector.extract_strided_slice %256 {offsets = [0, 0], sizes = [8, 32], strides = [1, 1]} : vector<32x32xf32> to vector<8x32xf32>
    %cst_48 = arith.constant dense<0.000000e+00> : vector<16x32xf32>
    %263 = tpu.matmul %261, %262, %cst_48 {dimension_numbers = #tpu.dot_dimension_numbers<[1], [0], [0], [1], [0, 0, 1, 1], [], []>} : vector<16x8xf32>, vector<8x32xf32>, vector<16x32xf32> -> vector<16x32xf32>
    %264 = vector.broadcast %257 : vector<1x32xf32> to vector<16x32xf32>
    %265 = arith.addf %264, %263 : vector<16x32xf32>
    %266 = vector.extract_strided_slice %216 {offsets = [0, 0, 72], sizes = [2, 8, 8], strides = [1, 1, 1]} : vector<2x8x96xf32> to vector<2x8x8xf32>
    %267 = vector.extract_strided_slice %255 {offsets = [2, 0, 0], sizes = [2, 8, 8], strides = [1, 1, 1]} : vector<8x8x8xf32> to vector<2x8x8xf32>
    "tpu.trace_start"() <{level = 10 : i32, message = "bqk,bkd->bqd"}> : () -> ()
    %cst_49 = arith.constant dense<0.000000e+00> : vector<2x8x8xf32>
    %268 = tpu.matmul %267, %266, %cst_49 {dimension_numbers = #tpu.dot_dimension_numbers<[2], [1], [1], [2], [0, 0, 0, 1, 1, 2], [0], [0]>} : vector<2x8x8xf32>, vector<2x8x8xf32>, vector<2x8x8xf32> -> vector<2x8x8xf32>
    "tpu.trace_stop"() : () -> ()
    %269 = vector.shape_cast %268 : vector<2x8x8xf32> to vector<16x8xf32>
    %270 = vector.extract_strided_slice %256 {offsets = [8, 0], sizes = [8, 32], strides = [1, 1]} : vector<32x32xf32> to vector<8x32xf32>
    %cst_50 = arith.constant dense<0.000000e+00> : vector<16x32xf32>
    %271 = tpu.matmul %269, %270, %cst_50 {dimension_numbers = #tpu.dot_dimension_numbers<[1], [0], [0], [1], [0, 0, 1, 1], [], []>} : vector<16x8xf32>, vector<8x32xf32>, vector<16x32xf32> -> vector<16x32xf32>
    %272 = arith.addf %265, %271 : vector<16x32xf32>
    %273 = vector.extract_strided_slice %216 {offsets = [0, 0, 80], sizes = [2, 8, 8], strides = [1, 1, 1]} : vector<2x8x96xf32> to vector<2x8x8xf32>
    %274 = vector.extract_strided_slice %255 {offsets = [4, 0, 0], sizes = [2, 8, 8], strides = [1, 1, 1]} : vector<8x8x8xf32> to vector<2x8x8xf32>
    "tpu.trace_start"() <{level = 10 : i32, message = "bqk,bkd->bqd"}> : () -> ()
    %cst_51 = arith.constant dense<0.000000e+00> : vector<2x8x8xf32>
    %275 = tpu.matmul %274, %273, %cst_51 {dimension_numbers = #tpu.dot_dimension_numbers<[2], [1], [1], [2], [0, 0, 0, 1, 1, 2], [0], [0]>} : vector<2x8x8xf32>, vector<2x8x8xf32>, vector<2x8x8xf32> -> vector<2x8x8xf32>
    "tpu.trace_stop"() : () -> ()
    %276 = vector.shape_cast %275 : vector<2x8x8xf32> to vector<16x8xf32>
    %277 = vector.extract_strided_slice %256 {offsets = [16, 0], sizes = [8, 32], strides = [1, 1]} : vector<32x32xf32> to vector<8x32xf32>
    %cst_52 = arith.constant dense<0.000000e+00> : vector<16x32xf32>
    %278 = tpu.matmul %276, %277, %cst_52 {dimension_numbers = #tpu.dot_dimension_numbers<[1], [0], [0], [1], [0, 0, 1, 1], [], []>} : vector<16x8xf32>, vector<8x32xf32>, vector<16x32xf32> -> vector<16x32xf32>
    %279 = arith.addf %272, %278 : vector<16x32xf32>
    %280 = vector.extract_strided_slice %216 {offsets = [0, 0, 88], sizes = [2, 8, 8], strides = [1, 1, 1]} : vector<2x8x96xf32> to vector<2x8x8xf32>
    %281 = vector.extract_strided_slice %255 {offsets = [6, 0, 0], sizes = [2, 8, 8], strides = [1, 1, 1]} : vector<8x8x8xf32> to vector<2x8x8xf32>
    "tpu.trace_start"() <{level = 10 : i32, message = "bqk,bkd->bqd"}> : () -> ()
    %cst_53 = arith.constant dense<0.000000e+00> : vector<2x8x8xf32>
    %282 = tpu.matmul %281, %280, %cst_53 {dimension_numbers = #tpu.dot_dimension_numbers<[2], [1], [1], [2], [0, 0, 0, 1, 1, 2], [0], [0]>} : vector<2x8x8xf32>, vector<2x8x8xf32>, vector<2x8x8xf32> -> vector<2x8x8xf32>
    "tpu.trace_stop"() : () -> ()
    %283 = vector.shape_cast %282 : vector<2x8x8xf32> to vector<16x8xf32>
    %284 = vector.extract_strided_slice %256 {offsets = [24, 0], sizes = [8, 32], strides = [1, 1]} : vector<32x32xf32> to vector<8x32xf32>
    %cst_54 = arith.constant dense<0.000000e+00> : vector<16x32xf32>
    %285 = tpu.matmul %283, %284, %cst_54 {dimension_numbers = #tpu.dot_dimension_numbers<[1], [0], [0], [1], [0, 0, 1, 1], [], []>} : vector<16x8xf32>, vector<8x32xf32>, vector<16x32xf32> -> vector<16x32xf32>
    %286 = arith.addf %279, %285 : vector<16x32xf32>
    %287 = arith.addf %210, %286 : vector<16x32xf32>
    %c144 = arith.constant 144 : index
    %c0_55 = arith.constant 0 : index
    %288 = vector.load %arg2[%c144, %c0_55] : memref<840x128xf32, #tpu.memory_space<vmem>>, vector<1x32xf32>
    %c152 = arith.constant 152 : index
    %c0_56 = arith.constant 0 : index
    %289 = vector.load %arg2[%c152, %c0_56] : memref<840x128xf32, #tpu.memory_space<vmem>>, vector<1x32xf32>
    %cst_57 = arith.constant dense<0.000000e+00> : vector<16xf32>
    %290 = vector.multi_reduction <add>, %287, %cst_57 [1] : vector<16x32xf32> to vector<16xf32>
    %291 = vector.shape_cast %290 : vector<16xf32> to vector<16x1xf32>
    %cst_58 = arith.constant 3.200000e+01 : f32
    %292 = vector.broadcast %cst_58 : f32 to vector<16x1xf32>
    %293 = arith.divf %291, %292 : vector<16x1xf32>
    %294 = vector.broadcast %293 : vector<16x1xf32> to vector<16x32xf32>
    %295 = arith.subf %287, %294 : vector<16x32xf32>
    %296 = arith.mulf %295, %295 : vector<16x32xf32>
    %cst_59 = arith.constant dense<0.000000e+00> : vector<16xf32>
    %297 = vector.multi_reduction <add>, %296, %cst_59 [1] : vector<16x32xf32> to vector<16xf32>
    %298 = vector.shape_cast %297 : vector<16xf32> to vector<16x1xf32>
    %cst_60 = arith.constant 3.200000e+01 : f32
    %299 = vector.broadcast %cst_60 : f32 to vector<16x1xf32>
    %300 = arith.divf %298, %299 : vector<16x1xf32>
    %301 = vector.broadcast %293 : vector<16x1xf32> to vector<16x32xf32>
    %302 = arith.subf %287, %301 : vector<16x32xf32>
    %cst_61 = arith.constant 9.99999974E-6 : f32
    %303 = vector.broadcast %cst_61 : f32 to vector<16x1xf32>
    %304 = arith.addf %300, %303 : vector<16x1xf32>
    %305 = math.rsqrt %304 : vector<16x1xf32>
    %306 = vector.broadcast %305 : vector<16x1xf32> to vector<16x32xf32>
    %307 = arith.mulf %302, %306 : vector<16x32xf32>
    %308 = vector.broadcast %288 : vector<1x32xf32> to vector<16x32xf32>
    %309 = arith.mulf %307, %308 : vector<16x32xf32>
    %310 = vector.broadcast %289 : vector<1x32xf32> to vector<16x32xf32>
    %311 = arith.addf %309, %310 : vector<16x32xf32>
    %c160 = arith.constant 160 : index
    %c0_62 = arith.constant 0 : index
    %312 = vector.load %arg2[%c160, %c0_62] : memref<840x128xf32, #tpu.memory_space<vmem>>, vector<32x128xf32>
    %cst_63 = arith.constant dense<0.000000e+00> : vector<16x128xf32>
    %313 = tpu.matmul %311, %312, %cst_63 {dimension_numbers = #tpu.dot_dimension_numbers<[1], [0], [0], [1], [0, 0, 1, 1], [], []>} : vector<16x32xf32>, vector<32x128xf32>, vector<16x128xf32> -> vector<16x128xf32>
    %c192 = arith.constant 192 : index
    %c0_64 = arith.constant 0 : index
    %314 = vector.load %arg2[%c192, %c0_64] : memref<840x128xf32, #tpu.memory_space<vmem>>, vector<1x128xf32>
    %315 = vector.broadcast %314 : vector<1x128xf32> to vector<16x128xf32>
    %316 = arith.addf %313, %315 : vector<16x128xf32>
    %cst_65 = arith.constant 0.000000e+00 : f32
    %317 = vector.broadcast %cst_65 : f32 to vector<16x128xf32>
    %318 = arith.maximumf %316, %317 : vector<16x128xf32>
    %c200 = arith.constant 200 : index
    %c0_66 = arith.constant 0 : index
    %319 = vector.load %arg2[%c200, %c0_66] : memref<840x128xf32, #tpu.memory_space<vmem>>, vector<128x32xf32>
    %cst_67 = arith.constant dense<0.000000e+00> : vector<16x32xf32>
    %320 = tpu.matmul %318, %319, %cst_67 {dimension_numbers = #tpu.dot_dimension_numbers<[1], [0], [0], [1], [0, 0, 1, 1], [], []>} : vector<16x128xf32>, vector<128x32xf32>, vector<16x32xf32> -> vector<16x32xf32>
    %c328 = arith.constant 328 : index
    %c0_68 = arith.constant 0 : index
    %321 = vector.load %arg2[%c328, %c0_68] : memref<840x128xf32, #tpu.memory_space<vmem>>, vector<1x32xf32>
    %322 = vector.broadcast %321 : vector<1x32xf32> to vector<16x32xf32>
    %323 = arith.addf %320, %322 : vector<16x32xf32>
    %324 = arith.addf %311, %323 : vector<16x32xf32>
    %c336 = arith.constant 336 : index
    %c0_69 = arith.constant 0 : index
    %325 = vector.load %arg2[%c336, %c0_69] : memref<840x128xf32, #tpu.memory_space<vmem>>, vector<1x32xf32>
    %c344 = arith.constant 344 : index
    %c0_70 = arith.constant 0 : index
    %326 = vector.load %arg2[%c344, %c0_70] : memref<840x128xf32, #tpu.memory_space<vmem>>, vector<1x32xf32>
    %cst_71 = arith.constant dense<0.000000e+00> : vector<16xf32>
    %327 = vector.multi_reduction <add>, %324, %cst_71 [1] : vector<16x32xf32> to vector<16xf32>
    %328 = vector.shape_cast %327 : vector<16xf32> to vector<16x1xf32>
    %cst_72 = arith.constant 3.200000e+01 : f32
    %329 = vector.broadcast %cst_72 : f32 to vector<16x1xf32>
    %330 = arith.divf %328, %329 : vector<16x1xf32>
    %331 = vector.broadcast %330 : vector<16x1xf32> to vector<16x32xf32>
    %332 = arith.subf %324, %331 : vector<16x32xf32>
    %333 = arith.mulf %332, %332 : vector<16x32xf32>
    %cst_73 = arith.constant dense<0.000000e+00> : vector<16xf32>
    %334 = vector.multi_reduction <add>, %333, %cst_73 [1] : vector<16x32xf32> to vector<16xf32>
    %335 = vector.shape_cast %334 : vector<16xf32> to vector<16x1xf32>
    %cst_74 = arith.constant 3.200000e+01 : f32
    %336 = vector.broadcast %cst_74 : f32 to vector<16x1xf32>
    %337 = arith.divf %335, %336 : vector<16x1xf32>
    %338 = vector.broadcast %330 : vector<16x1xf32> to vector<16x32xf32>
    %339 = arith.subf %324, %338 : vector<16x32xf32>
    %cst_75 = arith.constant 9.99999974E-6 : f32
    %340 = vector.broadcast %cst_75 : f32 to vector<16x1xf32>
    %341 = arith.addf %337, %340 : vector<16x1xf32>
    %342 = math.rsqrt %341 : vector<16x1xf32>
    %343 = vector.broadcast %342 : vector<16x1xf32> to vector<16x32xf32>
    %344 = arith.mulf %339, %343 : vector<16x32xf32>
    %345 = vector.broadcast %325 : vector<1x32xf32> to vector<16x32xf32>
    %346 = arith.mulf %344, %345 : vector<16x32xf32>
    %347 = vector.broadcast %326 : vector<1x32xf32> to vector<16x32xf32>
    %348 = arith.addf %346, %347 : vector<16x32xf32>
    %349 = vector.shape_cast %348 : vector<16x32xf32> to vector<2x8x32xf32>
    %350 = vector.shape_cast %349 : vector<2x8x32xf32> to vector<16x32xf32>
    %c352 = arith.constant 352 : index
    %c0_76 = arith.constant 0 : index
    %351 = vector.load %arg2[%c352, %c0_76] : memref<840x128xf32, #tpu.memory_space<vmem>>, vector<32x96xf32>
    %cst_77 = arith.constant dense<0.000000e+00> : vector<16x96xf32>
    %352 = tpu.matmul %350, %351, %cst_77 {dimension_numbers = #tpu.dot_dimension_numbers<[1], [0], [0], [1], [0, 0, 1, 1], [], []>} : vector<16x32xf32>, vector<32x96xf32>, vector<16x96xf32> -> vector<16x96xf32>
    %c384 = arith.constant 384 : index
    %c0_78 = arith.constant 0 : index
    %353 = vector.load %arg2[%c384, %c0_78] : memref<840x128xf32, #tpu.memory_space<vmem>>, vector<1x96xf32>
    %354 = vector.broadcast %353 : vector<1x96xf32> to vector<16x96xf32>
    %355 = arith.addf %352, %354 : vector<16x96xf32>
    %356 = vector.shape_cast %355 : vector<16x96xf32> to vector<2x8x96xf32>
    %357 = vector.extract_strided_slice %356 {offsets = [0, 0, 0], sizes = [2, 8, 8], strides = [1, 1, 1]} : vector<2x8x96xf32> to vector<2x8x8xf32>
    %358 = vector.extract_strided_slice %356 {offsets = [0, 0, 32], sizes = [2, 8, 8], strides = [1, 1, 1]} : vector<2x8x96xf32> to vector<2x8x8xf32>
    "tpu.trace_start"() <{level = 10 : i32, message = "bqd,bkd->bqk"}> : () -> ()
    %cst_79 = arith.constant dense<0.000000e+00> : vector<2x8x8xf32>
    %359 = tpu.matmul %357, %358, %cst_79 {dimension_numbers = #tpu.dot_dimension_numbers<[2], [2], [1], [1], [0, 0, 0, 1, 1, 1], [0], [0]>} : vector<2x8x8xf32>, vector<2x8x8xf32>, vector<2x8x8xf32> -> vector<2x8x8xf32>
    "tpu.trace_stop"() : () -> ()
    %cst_80 = arith.constant 0.353553385 : f32
    %360 = vector.broadcast %cst_80 : f32 to vector<2x8x8xf32>
    %361 = arith.mulf %359, %360 : vector<2x8x8xf32>
    %362 = vector.broadcast %209 : vector<2x1x8xf32> to vector<2x8x8xf32>
    %363 = arith.addf %361, %362 : vector<2x8x8xf32>
    %364 = vector.extract_strided_slice %356 {offsets = [0, 0, 8], sizes = [2, 8, 8], strides = [1, 1, 1]} : vector<2x8x96xf32> to vector<2x8x8xf32>
    %365 = vector.extract_strided_slice %356 {offsets = [0, 0, 40], sizes = [2, 8, 8], strides = [1, 1, 1]} : vector<2x8x96xf32> to vector<2x8x8xf32>
    "tpu.trace_start"() <{level = 10 : i32, message = "bqd,bkd->bqk"}> : () -> ()
    %cst_81 = arith.constant dense<0.000000e+00> : vector<2x8x8xf32>
    %366 = tpu.matmul %364, %365, %cst_81 {dimension_numbers = #tpu.dot_dimension_numbers<[2], [2], [1], [1], [0, 0, 0, 1, 1, 1], [0], [0]>} : vector<2x8x8xf32>, vector<2x8x8xf32>, vector<2x8x8xf32> -> vector<2x8x8xf32>
    "tpu.trace_stop"() : () -> ()
    %cst_82 = arith.constant 0.353553385 : f32
    %367 = vector.broadcast %cst_82 : f32 to vector<2x8x8xf32>
    %368 = arith.mulf %366, %367 : vector<2x8x8xf32>
    %369 = vector.broadcast %209 : vector<2x1x8xf32> to vector<2x8x8xf32>
    %370 = arith.addf %368, %369 : vector<2x8x8xf32>
    %371 = vector.extract_strided_slice %356 {offsets = [0, 0, 16], sizes = [2, 8, 8], strides = [1, 1, 1]} : vector<2x8x96xf32> to vector<2x8x8xf32>
    %372 = vector.extract_strided_slice %356 {offsets = [0, 0, 48], sizes = [2, 8, 8], strides = [1, 1, 1]} : vector<2x8x96xf32> to vector<2x8x8xf32>
    "tpu.trace_start"() <{level = 10 : i32, message = "bqd,bkd->bqk"}> : () -> ()
    %cst_83 = arith.constant dense<0.000000e+00> : vector<2x8x8xf32>
    %373 = tpu.matmul %371, %372, %cst_83 {dimension_numbers = #tpu.dot_dimension_numbers<[2], [2], [1], [1], [0, 0, 0, 1, 1, 1], [0], [0]>} : vector<2x8x8xf32>, vector<2x8x8xf32>, vector<2x8x8xf32> -> vector<2x8x8xf32>
    "tpu.trace_stop"() : () -> ()
    %cst_84 = arith.constant 0.353553385 : f32
    %374 = vector.broadcast %cst_84 : f32 to vector<2x8x8xf32>
    %375 = arith.mulf %373, %374 : vector<2x8x8xf32>
    %376 = vector.broadcast %209 : vector<2x1x8xf32> to vector<2x8x8xf32>
    %377 = arith.addf %375, %376 : vector<2x8x8xf32>
    %378 = vector.extract_strided_slice %356 {offsets = [0, 0, 24], sizes = [2, 8, 8], strides = [1, 1, 1]} : vector<2x8x96xf32> to vector<2x8x8xf32>
    %379 = vector.extract_strided_slice %356 {offsets = [0, 0, 56], sizes = [2, 8, 8], strides = [1, 1, 1]} : vector<2x8x96xf32> to vector<2x8x8xf32>
    "tpu.trace_start"() <{level = 10 : i32, message = "bqd,bkd->bqk"}> : () -> ()
    %cst_85 = arith.constant dense<0.000000e+00> : vector<2x8x8xf32>
    %380 = tpu.matmul %378, %379, %cst_85 {dimension_numbers = #tpu.dot_dimension_numbers<[2], [2], [1], [1], [0, 0, 0, 1, 1, 1], [0], [0]>} : vector<2x8x8xf32>, vector<2x8x8xf32>, vector<2x8x8xf32> -> vector<2x8x8xf32>
    "tpu.trace_stop"() : () -> ()
    %cst_86 = arith.constant 0.353553385 : f32
    %381 = vector.broadcast %cst_86 : f32 to vector<2x8x8xf32>
    %382 = arith.mulf %380, %381 : vector<2x8x8xf32>
    %383 = vector.broadcast %209 : vector<2x1x8xf32> to vector<2x8x8xf32>
    %384 = arith.addf %382, %383 : vector<2x8x8xf32>
    %385 = tpu.concatenate %363, %370, %377, %384 in 0 : vector<2x8x8xf32>, vector<2x8x8xf32>, vector<2x8x8xf32>, vector<2x8x8xf32> -> vector<8x8x8xf32>
    %cst_87 = arith.constant dense<0xFF800000> : vector<8x8xf32>
    %386 = vector.multi_reduction <maximumf>, %385, %cst_87 [2] : vector<8x8x8xf32> to vector<8x8xf32>
    %387 = vector.shape_cast %386 : vector<8x8xf32> to vector<8x8x1xf32>
    %388 = vector.broadcast %387 : vector<8x8x1xf32> to vector<8x8x8xf32>
    %389 = arith.subf %385, %388 : vector<8x8x8xf32>
    %390 = math.exp %389 : vector<8x8x8xf32>
    %cst_88 = arith.constant dense<0.000000e+00> : vector<8x8xf32>
    %391 = vector.multi_reduction <add>, %390, %cst_88 [2] : vector<8x8x8xf32> to vector<8x8xf32>
    %392 = vector.shape_cast %391 : vector<8x8xf32> to vector<8x8x1xf32>
    %393 = tpu.reciprocal %392 {approx = true} : vector<8x8x1xf32> -> vector<8x8x1xf32>
    %394 = vector.broadcast %393 : vector<8x8x1xf32> to vector<8x8x8xf32>
    %395 = arith.mulf %390, %394 : vector<8x8x8xf32>
    %c392 = arith.constant 392 : index
    %c0_89 = arith.constant 0 : index
    %396 = vector.load %arg2[%c392, %c0_89] : memref<840x128xf32, #tpu.memory_space<vmem>>, vector<32x32xf32>
    %c424 = arith.constant 424 : index
    %c0_90 = arith.constant 0 : index
    %397 = vector.load %arg2[%c424, %c0_90] : memref<840x128xf32, #tpu.memory_space<vmem>>, vector<1x32xf32>
    %398 = vector.extract_strided_slice %356 {offsets = [0, 0, 64], sizes = [2, 8, 8], strides = [1, 1, 1]} : vector<2x8x96xf32> to vector<2x8x8xf32>
    %399 = vector.extract_strided_slice %395 {offsets = [0, 0, 0], sizes = [2, 8, 8], strides = [1, 1, 1]} : vector<8x8x8xf32> to vector<2x8x8xf32>
    "tpu.trace_start"() <{level = 10 : i32, message = "bqk,bkd->bqd"}> : () -> ()
    %cst_91 = arith.constant dense<0.000000e+00> : vector<2x8x8xf32>
    %400 = tpu.matmul %399, %398, %cst_91 {dimension_numbers = #tpu.dot_dimension_numbers<[2], [1], [1], [2], [0, 0, 0, 1, 1, 2], [0], [0]>} : vector<2x8x8xf32>, vector<2x8x8xf32>, vector<2x8x8xf32> -> vector<2x8x8xf32>
    "tpu.trace_stop"() : () -> ()
    %401 = vector.shape_cast %400 : vector<2x8x8xf32> to vector<16x8xf32>
    %402 = vector.extract_strided_slice %396 {offsets = [0, 0], sizes = [8, 32], strides = [1, 1]} : vector<32x32xf32> to vector<8x32xf32>
    %cst_92 = arith.constant dense<0.000000e+00> : vector<16x32xf32>
    %403 = tpu.matmul %401, %402, %cst_92 {dimension_numbers = #tpu.dot_dimension_numbers<[1], [0], [0], [1], [0, 0, 1, 1], [], []>} : vector<16x8xf32>, vector<8x32xf32>, vector<16x32xf32> -> vector<16x32xf32>
    %404 = vector.broadcast %397 : vector<1x32xf32> to vector<16x32xf32>
    %405 = arith.addf %404, %403 : vector<16x32xf32>
    %406 = vector.extract_strided_slice %356 {offsets = [0, 0, 72], sizes = [2, 8, 8], strides = [1, 1, 1]} : vector<2x8x96xf32> to vector<2x8x8xf32>
    %407 = vector.extract_strided_slice %395 {offsets = [2, 0, 0], sizes = [2, 8, 8], strides = [1, 1, 1]} : vector<8x8x8xf32> to vector<2x8x8xf32>
    "tpu.trace_start"() <{level = 10 : i32, message = "bqk,bkd->bqd"}> : () -> ()
    %cst_93 = arith.constant dense<0.000000e+00> : vector<2x8x8xf32>
    %408 = tpu.matmul %407, %406, %cst_93 {dimension_numbers = #tpu.dot_dimension_numbers<[2], [1], [1], [2], [0, 0, 0, 1, 1, 2], [0], [0]>} : vector<2x8x8xf32>, vector<2x8x8xf32>, vector<2x8x8xf32> -> vector<2x8x8xf32>
    "tpu.trace_stop"() : () -> ()
    %409 = vector.shape_cast %408 : vector<2x8x8xf32> to vector<16x8xf32>
    %410 = vector.extract_strided_slice %396 {offsets = [8, 0], sizes = [8, 32], strides = [1, 1]} : vector<32x32xf32> to vector<8x32xf32>
    %cst_94 = arith.constant dense<0.000000e+00> : vector<16x32xf32>
    %411 = tpu.matmul %409, %410, %cst_94 {dimension_numbers = #tpu.dot_dimension_numbers<[1], [0], [0], [1], [0, 0, 1, 1], [], []>} : vector<16x8xf32>, vector<8x32xf32>, vector<16x32xf32> -> vector<16x32xf32>
    %412 = arith.addf %405, %411 : vector<16x32xf32>
    %413 = vector.extract_strided_slice %356 {offsets = [0, 0, 80], sizes = [2, 8, 8], strides = [1, 1, 1]} : vector<2x8x96xf32> to vector<2x8x8xf32>
    %414 = vector.extract_strided_slice %395 {offsets = [4, 0, 0], sizes = [2, 8, 8], strides = [1, 1, 1]} : vector<8x8x8xf32> to vector<2x8x8xf32>
    "tpu.trace_start"() <{level = 10 : i32, message = "bqk,bkd->bqd"}> : () -> ()
    %cst_95 = arith.constant dense<0.000000e+00> : vector<2x8x8xf32>
    %415 = tpu.matmul %414, %413, %cst_95 {dimension_numbers = #tpu.dot_dimension_numbers<[2], [1], [1], [2], [0, 0, 0, 1, 1, 2], [0], [0]>} : vector<2x8x8xf32>, vector<2x8x8xf32>, vector<2x8x8xf32> -> vector<2x8x8xf32>
    "tpu.trace_stop"() : () -> ()
    %416 = vector.shape_cast %415 : vector<2x8x8xf32> to vector<16x8xf32>
    %417 = vector.extract_strided_slice %396 {offsets = [16, 0], sizes = [8, 32], strides = [1, 1]} : vector<32x32xf32> to vector<8x32xf32>
    %cst_96 = arith.constant dense<0.000000e+00> : vector<16x32xf32>
    %418 = tpu.matmul %416, %417, %cst_96 {dimension_numbers = #tpu.dot_dimension_numbers<[1], [0], [0], [1], [0, 0, 1, 1], [], []>} : vector<16x8xf32>, vector<8x32xf32>, vector<16x32xf32> -> vector<16x32xf32>
    %419 = arith.addf %412, %418 : vector<16x32xf32>
    %420 = vector.extract_strided_slice %356 {offsets = [0, 0, 88], sizes = [2, 8, 8], strides = [1, 1, 1]} : vector<2x8x96xf32> to vector<2x8x8xf32>
    %421 = vector.extract_strided_slice %395 {offsets = [6, 0, 0], sizes = [2, 8, 8], strides = [1, 1, 1]} : vector<8x8x8xf32> to vector<2x8x8xf32>
    "tpu.trace_start"() <{level = 10 : i32, message = "bqk,bkd->bqd"}> : () -> ()
    %cst_97 = arith.constant dense<0.000000e+00> : vector<2x8x8xf32>
    %422 = tpu.matmul %421, %420, %cst_97 {dimension_numbers = #tpu.dot_dimension_numbers<[2], [1], [1], [2], [0, 0, 0, 1, 1, 2], [0], [0]>} : vector<2x8x8xf32>, vector<2x8x8xf32>, vector<2x8x8xf32> -> vector<2x8x8xf32>
    "tpu.trace_stop"() : () -> ()
    %423 = vector.shape_cast %422 : vector<2x8x8xf32> to vector<16x8xf32>
    %424 = vector.extract_strided_slice %396 {offsets = [24, 0], sizes = [8, 32], strides = [1, 1]} : vector<32x32xf32> to vector<8x32xf32>
    %cst_98 = arith.constant dense<0.000000e+00> : vector<16x32xf32>
    %425 = tpu.matmul %423, %424, %cst_98 {dimension_numbers = #tpu.dot_dimension_numbers<[1], [0], [0], [1], [0, 0, 1, 1], [], []>} : vector<16x8xf32>, vector<8x32xf32>, vector<16x32xf32> -> vector<16x32xf32>
    %426 = arith.addf %419, %425 : vector<16x32xf32>
    %427 = arith.addf %350, %426 : vector<16x32xf32>
    %c432 = arith.constant 432 : index
    %c0_99 = arith.constant 0 : index
    %428 = vector.load %arg2[%c432, %c0_99] : memref<840x128xf32, #tpu.memory_space<vmem>>, vector<1x32xf32>
    %c440 = arith.constant 440 : index
    %c0_100 = arith.constant 0 : index
    %429 = vector.load %arg2[%c440, %c0_100] : memref<840x128xf32, #tpu.memory_space<vmem>>, vector<1x32xf32>
    %cst_101 = arith.constant dense<0.000000e+00> : vector<16xf32>
    %430 = vector.multi_reduction <add>, %427, %cst_101 [1] : vector<16x32xf32> to vector<16xf32>
    %431 = vector.shape_cast %430 : vector<16xf32> to vector<16x1xf32>
    %cst_102 = arith.constant 3.200000e+01 : f32
    %432 = vector.broadcast %cst_102 : f32 to vector<16x1xf32>
    %433 = arith.divf %431, %432 : vector<16x1xf32>
    %434 = vector.broadcast %433 : vector<16x1xf32> to vector<16x32xf32>
    %435 = arith.subf %427, %434 : vector<16x32xf32>
    %436 = arith.mulf %435, %435 : vector<16x32xf32>
    %cst_103 = arith.constant dense<0.000000e+00> : vector<16xf32>
    %437 = vector.multi_reduction <add>, %436, %cst_103 [1] : vector<16x32xf32> to vector<16xf32>
    %438 = vector.shape_cast %437 : vector<16xf32> to vector<16x1xf32>
    %cst_104 = arith.constant 3.200000e+01 : f32
    %439 = vector.broadcast %cst_104 : f32 to vector<16x1xf32>
    %440 = arith.divf %438, %439 : vector<16x1xf32>
    %441 = vector.broadcast %433 : vector<16x1xf32> to vector<16x32xf32>
    %442 = arith.subf %427, %441 : vector<16x32xf32>
    %cst_105 = arith.constant 9.99999974E-6 : f32
    %443 = vector.broadcast %cst_105 : f32 to vector<16x1xf32>
    %444 = arith.addf %440, %443 : vector<16x1xf32>
    %445 = math.rsqrt %444 : vector<16x1xf32>
    %446 = vector.broadcast %445 : vector<16x1xf32> to vector<16x32xf32>
    %447 = arith.mulf %442, %446 : vector<16x32xf32>
    %448 = vector.broadcast %428 : vector<1x32xf32> to vector<16x32xf32>
    %449 = arith.mulf %447, %448 : vector<16x32xf32>
    %450 = vector.broadcast %429 : vector<1x32xf32> to vector<16x32xf32>
    %451 = arith.addf %449, %450 : vector<16x32xf32>
    %c448 = arith.constant 448 : index
    %c0_106 = arith.constant 0 : index
    %452 = vector.load %arg2[%c448, %c0_106] : memref<840x128xf32, #tpu.memory_space<vmem>>, vector<32x128xf32>
    %cst_107 = arith.constant dense<0.000000e+00> : vector<16x128xf32>
    %453 = tpu.matmul %451, %452, %cst_107 {dimension_numbers = #tpu.dot_dimension_numbers<[1], [0], [0], [1], [0, 0, 1, 1], [], []>} : vector<16x32xf32>, vector<32x128xf32>, vector<16x128xf32> -> vector<16x128xf32>
    %c480 = arith.constant 480 : index
    %c0_108 = arith.constant 0 : index
    %454 = vector.load %arg2[%c480, %c0_108] : memref<840x128xf32, #tpu.memory_space<vmem>>, vector<1x128xf32>
    %455 = vector.broadcast %454 : vector<1x128xf32> to vector<16x128xf32>
    %456 = arith.addf %453, %455 : vector<16x128xf32>
    %cst_109 = arith.constant 0.000000e+00 : f32
    %457 = vector.broadcast %cst_109 : f32 to vector<16x128xf32>
    %458 = arith.maximumf %456, %457 : vector<16x128xf32>
    %c488 = arith.constant 488 : index
    %c0_110 = arith.constant 0 : index
    %459 = vector.load %arg2[%c488, %c0_110] : memref<840x128xf32, #tpu.memory_space<vmem>>, vector<128x32xf32>
    %cst_111 = arith.constant dense<0.000000e+00> : vector<16x32xf32>
    %460 = tpu.matmul %458, %459, %cst_111 {dimension_numbers = #tpu.dot_dimension_numbers<[1], [0], [0], [1], [0, 0, 1, 1], [], []>} : vector<16x128xf32>, vector<128x32xf32>, vector<16x32xf32> -> vector<16x32xf32>
    %c616 = arith.constant 616 : index
    %c0_112 = arith.constant 0 : index
    %461 = vector.load %arg2[%c616, %c0_112] : memref<840x128xf32, #tpu.memory_space<vmem>>, vector<1x32xf32>
    %462 = vector.broadcast %461 : vector<1x32xf32> to vector<16x32xf32>
    %463 = arith.addf %460, %462 : vector<16x32xf32>
    %464 = arith.addf %451, %463 : vector<16x32xf32>
    %c624 = arith.constant 624 : index
    %c0_113 = arith.constant 0 : index
    %465 = vector.load %arg2[%c624, %c0_113] : memref<840x128xf32, #tpu.memory_space<vmem>>, vector<1x32xf32>
    %c632 = arith.constant 632 : index
    %c0_114 = arith.constant 0 : index
    %466 = vector.load %arg2[%c632, %c0_114] : memref<840x128xf32, #tpu.memory_space<vmem>>, vector<1x32xf32>
    %cst_115 = arith.constant dense<0.000000e+00> : vector<16xf32>
    %467 = vector.multi_reduction <add>, %464, %cst_115 [1] : vector<16x32xf32> to vector<16xf32>
    %468 = vector.shape_cast %467 : vector<16xf32> to vector<16x1xf32>
    %cst_116 = arith.constant 3.200000e+01 : f32
    %469 = vector.broadcast %cst_116 : f32 to vector<16x1xf32>
    %470 = arith.divf %468, %469 : vector<16x1xf32>
    %471 = vector.broadcast %470 : vector<16x1xf32> to vector<16x32xf32>
    %472 = arith.subf %464, %471 : vector<16x32xf32>
    %473 = arith.mulf %472, %472 : vector<16x32xf32>
    %cst_117 = arith.constant dense<0.000000e+00> : vector<16xf32>
    %474 = vector.multi_reduction <add>, %473, %cst_117 [1] : vector<16x32xf32> to vector<16xf32>
    %475 = vector.shape_cast %474 : vector<16xf32> to vector<16x1xf32>
    %cst_118 = arith.constant 3.200000e+01 : f32
    %476 = vector.broadcast %cst_118 : f32 to vector<16x1xf32>
    %477 = arith.divf %475, %476 : vector<16x1xf32>
    %478 = vector.broadcast %470 : vector<16x1xf32> to vector<16x32xf32>
    %479 = arith.subf %464, %478 : vector<16x32xf32>
    %cst_119 = arith.constant 9.99999974E-6 : f32
    %480 = vector.broadcast %cst_119 : f32 to vector<16x1xf32>
    %481 = arith.addf %477, %480 : vector<16x1xf32>
    %482 = math.rsqrt %481 : vector<16x1xf32>
    %483 = vector.broadcast %482 : vector<16x1xf32> to vector<16x32xf32>
    %484 = arith.mulf %479, %483 : vector<16x32xf32>
    %485 = vector.broadcast %465 : vector<1x32xf32> to vector<16x32xf32>
    %486 = arith.mulf %484, %485 : vector<16x32xf32>
    %487 = vector.broadcast %466 : vector<1x32xf32> to vector<16x32xf32>
    %488 = arith.addf %486, %487 : vector<16x32xf32>
    %489 = vector.shape_cast %488 : vector<16x32xf32> to vector<2x8x32xf32>
    %490 = vector.shape_cast %489 : vector<2x8x32xf32> to vector<16x32xf32>
    %491 = vector.shape_cast %2 : vector<2x8xf32> to vector<2x8x1xf32>
    %492 = vector.broadcast %491 : vector<2x8x1xf32> to vector<2x8x32xf32>
    %493 = arith.mulf %489, %492 : vector<2x8x32xf32>
    %cst_120 = arith.constant dense<0.000000e+00> : vector<2x32xf32>
    %494 = vector.multi_reduction <add>, %493, %cst_120 [1] : vector<2x8x32xf32> to vector<2x32xf32>
    %cst_121 = arith.constant dense<0.000000e+00> : vector<2xf32>
    %495 = vector.multi_reduction <add>, %2, %cst_121 [1] : vector<2x8xf32> to vector<2xf32>
    %496 = vector.shape_cast %495 : vector<2xf32> to vector<2x1xf32>
    %cst_122 = arith.constant 1.000000e+00 : f32
    %497 = vector.broadcast %cst_122 : f32 to vector<2x1xf32>
    %498 = arith.maximumf %496, %497 : vector<2x1xf32>
    %499 = vector.broadcast %498 : vector<2x1xf32> to vector<2x32xf32>
    %500 = arith.divf %494, %499 : vector<2x32xf32>
    %c640 = arith.constant 640 : index
    %c0_123 = arith.constant 0 : index
    %501 = vector.load %arg2[%c640, %c0_123] : memref<840x128xf32, #tpu.memory_space<vmem>>, vector<32x99xf32>
    %cst_124 = arith.constant dense<0.000000e+00> : vector<2x99xf32>
    %502 = tpu.matmul %500, %501, %cst_124 {dimension_numbers = #tpu.dot_dimension_numbers<[1], [0], [0], [1], [0, 0, 1, 1], [], []>} : vector<2x32xf32>, vector<32x99xf32>, vector<2x99xf32> -> vector<2x99xf32>
    %c672 = arith.constant 672 : index
    %c0_125 = arith.constant 0 : index
    %503 = vector.load %arg2[%c672, %c0_125] : memref<840x128xf32, #tpu.memory_space<vmem>>, vector<1x99xf32>
    %504 = vector.broadcast %503 : vector<1x99xf32> to vector<2x99xf32>
    %505 = arith.addf %502, %504 : vector<2x99xf32>
    %506 = vector.extract_strided_slice %505 {offsets = [0, 96], sizes = [2, 3], strides = [1, 1]} : vector<2x99xf32> to vector<2x3xf32>
    %cst_126 = arith.constant dense<0xFF800000> : vector<2xf32>
    %507 = vector.multi_reduction <maximumf>, %506, %cst_126 [1] : vector<2x3xf32> to vector<2xf32>
    %508 = vector.shape_cast %507 : vector<2xf32> to vector<2x1xf32>
    %509 = vector.broadcast %508 : vector<2x1xf32> to vector<2x3xf32>
    %510 = arith.subf %506, %509 : vector<2x3xf32>
    %511 = math.exp %510 : vector<2x3xf32>
    %cst_127 = arith.constant dense<0.000000e+00> : vector<2xf32>
    %512 = vector.multi_reduction <add>, %511, %cst_127 [1] : vector<2x3xf32> to vector<2xf32>
    %513 = vector.shape_cast %512 : vector<2xf32> to vector<2x1xf32>
    %514 = vector.broadcast %513 : vector<2x1xf32> to vector<2x3xf32>
    %515 = arith.divf %511, %514 : vector<2x3xf32>
    %516 = vector.extract_strided_slice %505 {offsets = [0, 0], sizes = [2, 96], strides = [1, 1]} : vector<2x99xf32> to vector<2x96xf32>
    %cst_128 = arith.constant 0.000000e+00 : f32
    %517 = vector.broadcast %cst_128 : f32 to vector<2x96xf32>
    %518 = arith.maximumf %516, %517 : vector<2x96xf32>
    %c680 = arith.constant 680 : index
    %c0_129 = arith.constant 0 : index
    %519 = vector.load %arg2[%c680, %c0_129] : memref<840x128xf32, #tpu.memory_space<vmem>>, vector<96x48xf32>
    %cst_130 = arith.constant dense<0.000000e+00> : vector<2x48xf32>
    %520 = tpu.matmul %518, %519, %cst_130 {dimension_numbers = #tpu.dot_dimension_numbers<[1], [0], [0], [1], [0, 0, 1, 1], [], []>} : vector<2x96xf32>, vector<96x48xf32>, vector<2x48xf32> -> vector<2x48xf32>
    %c776 = arith.constant 776 : index
    %c0_131 = arith.constant 0 : index
    %521 = vector.load %arg2[%c776, %c0_131] : memref<840x128xf32, #tpu.memory_space<vmem>>, vector<1x48xf32>
    %522 = vector.broadcast %521 : vector<1x48xf32> to vector<2x48xf32>
    %523 = arith.addf %520, %522 : vector<2x48xf32>
    %524 = vector.extract_strided_slice %515 {offsets = [0, 0], sizes = [2, 1], strides = [1, 1]} : vector<2x3xf32> to vector<2x1xf32>
    %525 = vector.extract_strided_slice %523 {offsets = [0, 0], sizes = [2, 16], strides = [1, 1]} : vector<2x48xf32> to vector<2x16xf32>
    %526 = vector.broadcast %524 : vector<2x1xf32> to vector<2x16xf32>
    %527 = arith.mulf %526, %525 : vector<2x16xf32>
    %528 = vector.extract_strided_slice %515 {offsets = [0, 1], sizes = [2, 1], strides = [1, 1]} : vector<2x3xf32> to vector<2x1xf32>
    %529 = vector.extract_strided_slice %523 {offsets = [0, 16], sizes = [2, 16], strides = [1, 1]} : vector<2x48xf32> to vector<2x16xf32>
    %530 = vector.broadcast %528 : vector<2x1xf32> to vector<2x16xf32>
    %531 = arith.mulf %530, %529 : vector<2x16xf32>
    %532 = arith.addf %527, %531 : vector<2x16xf32>
    %533 = vector.extract_strided_slice %515 {offsets = [0, 2], sizes = [2, 1], strides = [1, 1]} : vector<2x3xf32> to vector<2x1xf32>
    %534 = vector.extract_strided_slice %523 {offsets = [0, 32], sizes = [2, 16], strides = [1, 1]} : vector<2x48xf32> to vector<2x16xf32>
    %535 = vector.broadcast %533 : vector<2x1xf32> to vector<2x16xf32>
    %536 = arith.mulf %535, %534 : vector<2x16xf32>
    %537 = arith.addf %532, %536 : vector<2x16xf32>
    %c816 = arith.constant 816 : index
    %c0_132 = arith.constant 0 : index
    %538 = vector.load %arg2[%c816, %c0_132] : memref<840x128xf32, #tpu.memory_space<vmem>>, vector<16x128xf32>
    %cst_133 = arith.constant dense<0.000000e+00> : vector<2x128xf32>
    %539 = tpu.matmul %537, %538, %cst_133 {dimension_numbers = #tpu.dot_dimension_numbers<[1], [0], [0], [1], [0, 0, 1, 1], [], []>} : vector<2x16xf32>, vector<16x128xf32>, vector<2x128xf32> -> vector<2x128xf32>
    %c832 = arith.constant 832 : index
    %c0_134 = arith.constant 0 : index
    %540 = vector.load %arg2[%c832, %c0_134] : memref<840x128xf32, #tpu.memory_space<vmem>>, vector<1x128xf32>
    %541 = vector.broadcast %540 : vector<1x128xf32> to vector<2x128xf32>
    %542 = arith.addf %539, %541 : vector<2x128xf32>
    %543 = vector.shape_cast %542 : vector<2x128xf32> to vector<2x1x128xf32>
    %544 = vector.shape_cast %543 : vector<2x1x128xf32> to vector<2x1x128xf32>
    %545 = vector.broadcast %544 : vector<2x1x128xf32> to vector<2x8x128xf32>
    %546 = vector.shape_cast %545 : vector<2x8x128xf32> to vector<16x128xf32>
    %c784 = arith.constant 784 : index
    %c0_135 = arith.constant 0 : index
    %547 = vector.load %arg2[%c784, %c0_135] : memref<840x128xf32, #tpu.memory_space<vmem>>, vector<32x128xf32>
    %cst_136 = arith.constant dense<0.000000e+00> : vector<16x128xf32>
    %548 = tpu.matmul %490, %547, %cst_136 {dimension_numbers = #tpu.dot_dimension_numbers<[1], [0], [0], [1], [0, 0, 1, 1], [], []>} : vector<16x32xf32>, vector<32x128xf32>, vector<16x128xf32> -> vector<16x128xf32>
    %549 = arith.addf %548, %546 : vector<16x128xf32>
    %c0_137 = arith.constant 0 : index
    %c0_138 = arith.constant 0 : index
    %550 = vector.load %arg3[%c0_137, %c0_138] : memref<16x128xf32, #tpu.memory_space<vmem>>, vector<16x128xf32>
    tpu.vector_store %arg3[%c0_137, %c0_138], %549 {strides = array<i32>} : memref<16x128xf32, #tpu.memory_space<vmem>>, vector<16x128xf32>,
    return
  }
  func.func @transform_0(%arg0: i32) -> (i32, i32) {
    %c0_i32 = arith.constant 0 : i32
    %c0_i32_0 = arith.constant 0 : i32
    %c0_i32_1 = arith.constant 0 : i32
    return %c0_i32, %c0_i32_0 : i32, i32
  }
  func.func @transform_1(%arg0: i32) -> (i32, i32) {
    %c0_i32 = arith.constant 0 : i32
    %c0_i32_0 = arith.constant 0 : i32
    %c0_i32_1 = arith.constant 0 : i32
    return %c0_i32, %c0_i32_0 : i32, i32
  }
  func.func @transform_2(%arg0: i32) -> (i32, i32) {
    %c0_i32 = arith.constant 0 : i32
    %c0_i32_0 = arith.constant 0 : i32
    %c0_i32_1 = arith.constant 0 : i32
    return %c0_i32, %c0_i32_0 : i32, i32
  }
}

</mosaic_0001>

<bundles_post_ra>
// kernel: squeeze.2
= control target key start
LH: loop header
LB: loop body
LE: loop exit
PB: predicated region body
PF: predicated region fallthrough
CT: control target
= control target key end

     0   :  { %s85_s0 = inlined_call_operand.vmem [shape: f32[16], index: 0, kind: input, shape index: {}]   ;;  %s86_s1 = inlined_call_operand.hbm [shape: f32[2,8], index: 1, kind: output, shape index: {}]  }
   0x1   :  { %v5_v0 = vld [vmem:[%s85_s0] sm:$0x1] }
   0x2   :  { %2 = vsyncpa [#allocation1], 0  ;;  %6 = vst [vmem:[#allocation3] sm:$0x1] %v5_v0  ;;  %vm8_vm0 = vcmask 64512   ;;  %s58_s0 = smov 120  }
   0x3   :  { %s59_s8 = smov [#allocation0]  }
   0x4   :  { %s26_s9 = sshll.u32 %s59_s8, 4  ;;  %s27_s9 = int_to_ptr.vmem [resolvable:$true] %s26_s9 }
   0x5   :  { %s34_s10 = scalar_lea.vmem %s27_s9, 32  ;;  %p39_p1 = scmp.lt.s32.totalorder %s27_s9, %s27_s9 }
   0x6   :  { %p35_p0 = scmp.ne.s32.totalorder %s27_s9, %s34_s10  ;;  %p40_p2 = scmp.lt.s32.totalorder %s34_s10, %s34_s10 }
   0x8   :  { %p41_p3 = por %p40_p2, %p39_p1 }
   0x9   :  { %v10_v1 = vld [vmem:[#allocation3] sm:$0x1]  }
   0xa   :  { %v7_v2 = vld [vmem:[#allocation3] sm:$0x1]   ;;  %11 = vrot.lane.b32.xlu0 %v10_v1, %s58_s0  ;;  %p42_p4 = pnand %p41_p3, %p35_p0 }
   0xb   :  { %9 = vst.msk [vmem:[#allocation2] sm:$0x1] %vm8_vm0, %v7_v2  }
  0x7c   :  { %v12_v3 = vpop.permute.xlu0 %11  }
  0x7d   :  { %15 = vst.msk [vmem:[#allocation2 + $0x1] sm:$0x1] %vm8_vm0, %v12_v3  }
  0x84   :  { %v19_v4 = vld [vmem:[#allocation2] sm:$0x3] }
  0x85   :  { %21 = vst [vmem:[#allocation0] sm:$0x3] %v19_v4 }
  0x86   :  { %45 = shalt.err (!%p42_p4)
}
  0x87   :  { %s46_s13 = scalar_lea.hbm %s86_s1, 32 }
  0x88   :  { %p47_p5 = scmp.ne.s32.totalorder %s86_s1, %s46_s13  ;;  %p50_p6 = scmp.lt.u32.totalorder %s46_s13, %s86_s1 }
  0x8a   :  { %p52_p7 = pnand %p50_p6, %p47_p5 }
  0x8c   :  { %55 = shalt.err (!%p52_p7)
}
  0x8d   :  { %29 = dma.vmem_to_hbm [thread:$0]  %s27_s9, 32, %s86_s1, [#allocation1]  }
  0x8e   :  { %56 = dma.done.wait [#allocation1], 32  }
  0x8f   :  { %57 = vsyncadd [#allocation1], 4294967264 }
  0x90   :  { %31 = vsyncpa [#allocation1], 1 }

// kernel: forward.1
= control target key start
LH: loop header
LB: loop body
LE: loop exit
PB: predicated region body
PF: predicated region fallthrough
CT: control target
= control target key end

     0   :  { %7 = vsyncpa [#allocation3], 0  ;;  %s7159_s9 = smov [#allocation2]   ;;  %s7858_s0 = inlined_call_operand.vmem [shape: f32[16,24], index: 0, kind: input, shape index: {}]   ;;  %s7859_s1 = inlined_call_operand.hbm [shape: f32[840,128], index: 1, kind: input, shape index: {}]   ;;  %s7860_s2 = inlined_call_operand.vmem [shape: f32[16,128], index: 2, kind: output, shape index: {}]  }
   0x1   :  { %s15_s10 = sshll.u32 %s7159_s9, 4  ;;  %s7135_s13 = scalar_lea.hbm %s7859_s1, 13440  ;;  %s16_s10 = int_to_ptr.vmem [resolvable:$true] %s15_s10 }
   0x2   :  { %p7136_p0 = scmp.ne.s32.totalorder %s7859_s1, %s7135_s13  ;;  %p7139_p1 = scmp.lt.u32.totalorder %s7135_s13, %s7859_s1 }
   0x4   :  { %p7141_p2 = pnand %p7139_p1, %p7136_p0 }
   0x6   :  { %7144 = shalt.err (!%p7141_p2)
}
   0x7   :  { %s7145_s18 = scalar_lea.vmem %s16_s10, 13440  ;;  %p7150_p4 = scmp.lt.s32.totalorder %s16_s10, %s16_s10 }
   0x8   :  { %p7146_p3 = scmp.ne.s32.totalorder %s16_s10, %s7145_s18  ;;  %p7151_p5 = scmp.lt.s32.totalorder %s7145_s18, %s7145_s18 }
   0xa   :  { %p7152_p6 = por %p7151_p5, %p7150_p4 }
   0xc   :  { %p7153_p7 = pnand %p7152_p6, %p7146_p3 }
   0xe   :  { %7156 = shalt.err (!%p7153_p7)
}
   0xf   :  { %s7160_s19 = smov 128   ;;  %s7161_s20 = smov 8  }
  0x10   :  { %21 = dma.hbm_to_vmem [thread:$0]  %s7859_s1, 13440, %s16_s10, [#allocation3], %s7160_s19, %s7160_s19, %s7161_s20  }
  0x11   :  { %7157 = dma.done.wait [#allocation3], 13440  }
  0x12   :  { %7158 = vsyncadd [#allocation3], 4294953856  ;;  %v7162_v0 = vmov 0.0   ;;  %v7163_v1 = vmov 0   ;;  %v29_v2 = vld [vmem:[#allocation2 + $0x8] sm:$0xff]  ;;  %v30_v3 = vld [vmem:[#allocation2 + $0x10] sm:$0xff] }
  0x13   :  { %6254 = vmatprep.mubr.f32.mxu1 %v7162_v0  ;;  %6898 = vset.pattern.permute.xlu0 %v7163_v1  ;;  %v7222_v4 = vld [vmem:[%s7858_s0] sm:$0xff]  ;;  %v7224_v5 = vpack.c.bf16 %v30_v3, %v29_v2  ;;  %v7230_v6 = vld [vmem:[%s7858_s0 + $0x8] sm:$0xff]  ;;  %v7245_v11 = vld [vmem:[#allocation2 + $0x18] ss:$0 sm:$0xff]  ;;  %s7164_s26 = smov 96   ;;  %s7165_s27 = smov 16  }
  0x14   :  { %34 = vperm.xlu0 %6898, %v7222_v4   ;;  %v7242_v8 = vld [vmem:[#allocation2] ss:$0 sm:$0xff]  ;;  %s7166_s28 = smov 32   ;;  %v7167_v41 = vmov 1   ;;  %s7168_s29 = smov 80   ;;  %vm138_vm0 = vcmask 130048  }
  0x15   :  { %6684 = vmatprep.subr.bf16.mxu1 %v7224_v5  ;;  %6692 = vmatprep.subr.bf16.mxu0 %v7224_v5  ;;  %vm1351_vm1 = vcmask 261120   ;;  %vm7177_vm3 = vmmov 0   ;;  %s7178_s4 = smov 112   ;;  %s7179_s5 = smov 88   ;;  %vm1436_vm4 = vcmask 64512   ;;  %vm5469_vm5 = vcmask 58368  }
  0x16   :  { %6686 = vmatpush3.bf16.msra.mxu1 %v7224_v5  ;;  %6694 = vmatpush3.bf16.msra.mxu0 %v7224_v5  ;;  %s7180_s6 = smov 120   ;;  %s7181_s7 = smov 72   ;;  %vm5494_vm6 = vcmask 1041409   ;;  %vm5568_vm7 = vcmask 804608   ;;  %vm5603_vm8 = vcmask 785408   ;;  %vm5579_vm9 = vcmask 17408  }
  0x17   :  { %6688 = vmatprep.subr.bf16.mxu1 %v7224_v5  ;;  %6700 = vmatprep.subr.bf16.mxu0 %v7224_v5  ;;  %s7182_s8 = smov 104   ;;  %s7183_s9 = smov 64  }
  0x18   :  { %39 = vperm.xlu0 %6898, %v7230_v6   ;;  %6900 = vset.pattern.permute.xlu1 %v7167_v41  ;;  %s7184_s10 = smov 56   ;;  %s7185_s11 = smov 48  }
  0x19   :  { %6255 = vmatmul.mubr.f32.vlgmr.msra.gmra.mrb[0].mxu1 %v7162_v0  ;;  %s7186_s12 = smov 40  }
  0x1a   :  { %6690 = vmatpush3.bf16.msra.mxu1 %v7224_v5 }
  0x1b   :  { %6696 = vmatprep.subr.bf16.mxu1 %v7224_v5 }
  0x1c   :  { %6899 = vset.pattern.permute.xlu0 %v7167_v41 }
  0x93   :  { %v35_v7 = vpop.permute.xlu0 %34 }
  0x94   :  { %v46_v10 = vmul.f32 %v7242_v8, %v35_v7 }
  0x96   :  { %v52_v13 = vadd.f32 %v7245_v11, %v46_v10 }
  0x97   :  { %v40_v9 = vpop.permute.xlu0 %39 }
  0x98   :  { %v47_v12 = vmul.f32 %v7242_v8, %v40_v9 }
  0x9a   :  { %v53_v14 = vadd.f32 %v7245_v11, %v47_v12 }
  0xec   :  { %v6256_v15 = vpop.f32.mrb[0].mxu1 }
  0xed   :  { %v208_v16 = vpop.f32.mrb[1].mxu1  ;;  %v218_v18 = vadd.f32 %v6256_v15, %v53_v14 }
  0xee   :  { %v217_v17 = vadd.f32 %v208_v16, %v52_v13 }
  0xef   :  { %v5911_v22 = vmul.f32 -1.442695, %v218_v18 }
  0xf0   :  { %6918 = vtanh.f32 %v217_v17  ;;  %v5910_v21 = vmul.f32 -1.442695, %v217_v17 }
  0xf1   :  { %6920 = vtanh.f32 %v218_v18 }
  0xf2   :  { %6922 = vpow2.f32 %v5910_v21 }
  0xf3   :  { %6924 = vpow2.f32 %v5911_v22  ;;  %v7169_v22 = vmov 2  }
  0xfa   :  { %v6919_v19 = vpop.eup %6918 }
  0xfb   :  { %237 = vrot.lane.b32.xlu1 %v6919_v19, %s7164_s26  ;;  %v6921_v20 = vpop.eup %6920 }
  0xfc   :  { %v6923_v23 = vpop.eup %6922 }
  0xfd   :  { %v225_v24 = vadd.f32 1.0, %v6923_v23  ;;  %v6925_v25 = vpop.eup %6924 }
  0xfe   :  { %v226_v26 = vadd.f32 1.0, %v6925_v25 }
  0xff   :  { %239 = vrot.lane.b32.xlu1 %v6921_v20, %s7164_s26  ;;  %6926 = vrcp.f32 %v225_v24 }
 0x100   :  { %6928 = vrcp.f32 %v226_v26 }
 0x109   :  { %v6927_v27 = vpop.eup %6926 }
 0x10a   :  { %v6929_v30 = vpop.eup %6928  ;;  %v233_v33 = vmul.f32 0.0, %v6927_v27 }
 0x10b   :  { %v234_v36 = vmul.f32 0.0, %v6929_v30 }
 0x16d   :  { %v238_v28 = vpop.permute.xlu1 %237 }
 0x16e   :  { %v243_v29 = vmul.f32 %v6927_v27, %v238_v28 }
 0x170   :  { %247 = vrot.lane.b32.xlu0 %v243_v29, %s7165_s27 }
 0x171   :  { %v240_v31 = vpop.permute.xlu1 %239 }
 0x172   :  { %v244_v32 = vmul.f32 %v6929_v30, %v240_v31 }
 0x174   :  { %249 = vrot.lane.b32.xlu1 %v244_v32, %s7165_s27 }
 0x1e2   :  { %v248_v34 = vpop.permute.xlu0 %247 }
 0x1e3   :  { %v7254_v35 = vadd.f32 %v248_v34, %v233_v33 }
 0x1e5   :  { %6930 = vtanh.f32 %v7254_v35 }
 0x1e6   :  { %v250_v37 = vpop.permute.xlu1 %249 }
 0x1e7   :  { %v254_v38 = vadd.f32 %v250_v37, %v234_v36 }
 0x1e9   :  { %6932 = vtanh.f32 %v254_v38 }
 0x1ef   :  { %v6931_v39 = vpop.eup %6930 }
 0x1f0   :  { %259 = vrot.lane.b32.xlu0 %v6931_v39, %s7166_s28 }
 0x1f3   :  { %v6933_v40 = vpop.eup %6932 }
 0x1f4   :  { %261 = vrot.lane.b32.xlu1 %v6933_v40, %s7166_s28 }
 0x262   :  { %v260_v42 = vpop.permute.xlu0 %259 }
 0x263   :  { %v265_v43 = vmul.f32 %v6927_v27, %v260_v42 }
 0x265   :  { %269 = vrot.lane.b32.xlu0 %v265_v43, %s7168_s29 }
 0x266   :  { %v262_v44 = vpop.permute.xlu1 %261 }
 0x267   :  { %v266_v45 = vmul.f32 %v6929_v30, %v262_v44 }
 0x269   :  { %271 = vrot.lane.b32.xlu1 %v266_v45, %s7168_s29  ;;  %55 = vperm.xlu0 %6899, %v7222_v4  }
 0x26d   :  { %59 = vperm.xlu1 %6900, %v7230_v6   ;;  %6902 = vset.pattern.permute.xlu0 %v7169_v22 }
 0x271   :  { %6901 = vset.pattern.permute.xlu1 %v7169_v22 }
 0x2d7   :  { %v270_v46 = vpop.permute.xlu0 %269 }
 0x2d8   :  { %6261 = vmatprep.mubr.msk.f32.mxu1 %vm138_vm0, %v270_v46 }
 0x2db   :  { %v272_v47 = vpop.permute.xlu1 %271 }
 0x2dc   :  { %6262 = vmatmul.mubr.msk.f32.vlgmr.msra.gmra.mrb[2].mxu1 %vm138_vm0, %v272_v47 }
 0x2dd   :  { %6698 = vmatpush3.bf16.msra.mxu1 %v7224_v5 }
 0x2de   :  { %6704 = vmatprep.subr.bf16.mxu1 %v7224_v5 }
 0x2e8   :  { %v56_v49 = vpop.permute.xlu0 %55 }
 0x2e9   :  { %v62_v51 = vmul.f32 %v7242_v8, %v56_v49 }
 0x2eb   :  { %v64_v53 = vadd.f32 %v7245_v11, %v62_v51 }
 0x2ec   :  { %v60_v48 = vpop.permute.xlu1 %59 }
 0x2ed   :  { %v63_v50 = vmul.f32 %v7242_v8, %v60_v48 }
 0x2ef   :  { %v65_v52 = vadd.f32 %v7245_v11, %v63_v50 }
 0x3af   :  { %v6263_v54 = vpop.f32.mrb[2].mxu1 }
 0x3b0   :  { %v353_v55 = vadd.f32 %v6263_v54, %v65_v52  ;;  %v343_v56 = vpop.f32.mrb[3].mxu1 }
 0x3b1   :  { %v352_v57 = vadd.f32 %v343_v56, %v64_v53 }
 0x3b2   :  { %6934 = vtanh.f32 %v353_v55  ;;  %v5915_v60 = vmul.f32 -1.442695, %v353_v55 }
 0x3b3   :  { %6936 = vtanh.f32 %v352_v57  ;;  %v5914_v61 = vmul.f32 -1.442695, %v352_v57 }
 0x3b4   :  { %6938 = vpow2.f32 %v5915_v60 }
 0x3b5   :  { %6940 = vpow2.f32 %v5914_v61  ;;  %v7170_v61 = vmov 3  }
 0x3bc   :  { %v6935_v58 = vpop.eup %6934 }
 0x3bd   :  { %v6937_v59 = vpop.eup %6936  ;;  %374 = vrot.lane.b32.xlu0 %v6935_v58, %s7164_s26 }
 0x3be   :  { %372 = vrot.lane.b32.xlu1 %v6937_v59, %s7164_s26  ;;  %v6939_v62 = vpop.eup %6938 }
 0x3bf   :  { %v6941_v63 = vpop.eup %6940  ;;  %v361_v1 = vadd.f32 1.0, %v6939_v62 }
 0x3c0   :  { %v360_v2 = vadd.f32 1.0, %v6941_v63 }
 0x3c1   :  { %6942 = vrcp.f32 %v361_v1 }
 0x3c2   :  { %6944 = vrcp.f32 %v360_v2 }
 0x3cb   :  { %v6943_v3 = vpop.eup %6942 }
 0x3cc   :  { %v6945_v9 = vpop.eup %6944  ;;  %v369_v14 = vmul.f32 %v6943_v3, %v254_v38 }
 0x3cd   :  { %v368_v16 = vmul.f32 %v6945_v9, %v7254_v35 }
 0x42f   :  { %v375_v7 = vpop.permute.xlu0 %374 }
 0x430   :  { %v379_v10 = vmul.f32 %v6943_v3, %v375_v7  ;;  %v373_v12 = vpop.permute.xlu1 %372 }
 0x431   :  { %v378_v13 = vmul.f32 %v6945_v9, %v373_v12 }
 0x432   :  { %384 = vrot.lane.b32.xlu0 %v379_v10, %s7165_s27 }
 0x433   :  { %382 = vrot.lane.b32.xlu1 %v378_v13, %s7165_s27 }
 0x4a4   :  { %v385_v15 = vpop.permute.xlu0 %384 }
 0x4a5   :  { %v7276_v17 = vadd.f32 %v385_v15, %v369_v14  ;;  %v383_v18 = vpop.permute.xlu1 %382 }
 0x4a6   :  { %v388_v19 = vadd.f32 %v383_v18, %v368_v16 }
 0x4a7   :  { %6946 = vtanh.f32 %v7276_v17 }
 0x4a8   :  { %6948 = vtanh.f32 %v388_v19 }
 0x4b1   :  { %v6947_v20 = vpop.eup %6946 }
 0x4b2   :  { %v6949_v21 = vpop.eup %6948  ;;  %396 = vrot.lane.b32.xlu0 %v6947_v20, %s7166_s28 }
 0x4b3   :  { %394 = vrot.lane.b32.xlu1 %v6949_v21, %s7166_s28 }
 0x524   :  { %v397_v23 = vpop.permute.xlu0 %396 }
 0x525   :  { %v401_v24 = vmul.f32 %v6943_v3, %v397_v23  ;;  %v395_v25 = vpop.permute.xlu1 %394 }
 0x526   :  { %v400_v26 = vmul.f32 %v6945_v9, %v395_v25 }
 0x527   :  { %406 = vrot.lane.b32.xlu0 %v401_v24, %s7168_s29 }
 0x528   :  { %404 = vrot.lane.b32.xlu1 %v400_v26, %s7168_s29 }
 0x52b   :  { %71 = vperm.xlu0 %6902, %v7230_v6  }
 0x52c   :  { %67 = vperm.xlu1 %6901, %v7222_v4  }
 0x52f   :  { %6903 = vset.pattern.permute.xlu0 %v7170_v61 }
 0x530   :  { %6904 = vset.pattern.permute.xlu1 %v7170_v61 }
 0x599   :  { %v407_v28 = vpop.permute.xlu0 %406 }
 0x59a   :  { %v405_v27 = vpop.permute.xlu1 %404 }
 0x59b   :  { %6268 = vmatprep.mubr.msk.f32.mxu0 %vm138_vm0, %v405_v27 }
 0x59c   :  { %6269 = vmatmul.mubr.msk.f32.vlgmr.msra.gmra.mrb[0].mxu0 %vm138_vm0, %v407_v28 }
 0x59d   :  { %6702 = vmatpush3.bf16.msra.mxu0 %v7224_v5 }
 0x59e   :  { %6708 = vmatprep.subr.bf16.mxu0 %v7224_v5 }
 0x5aa   :  { %v72_v30 = vpop.permute.xlu0 %71 }
 0x5ab   :  { %v68_v29 = vpop.permute.xlu1 %67  ;;  %v75_v32 = vmul.f32 %v7242_v8, %v72_v30 }
 0x5ac   :  { %v74_v31 = vmul.f32 %v7242_v8, %v68_v29 }
 0x5ad   :  { %v77_v34 = vadd.f32 %v7245_v11, %v75_v32 }
 0x5ae   :  { %v76_v33 = vadd.f32 %v7245_v11, %v74_v31 }
 0x66f   :  { %v6270_v35 = vpop.f32.mrb[0].mxu0 }
 0x670   :  { %v478_v36 = vpop.f32.mrb[1].mxu0  ;;  %v488_v38 = vadd.f32 %v6270_v35, %v77_v34 }
 0x671   :  { %v487_v37 = vadd.f32 %v478_v36, %v76_v33 }
 0x672   :  { %v5919_v42 = vmul.f32 -1.442695, %v488_v38 }
 0x673   :  { %6950 = vtanh.f32 %v487_v37  ;;  %v5918_v41 = vmul.f32 -1.442695, %v487_v37 }
 0x674   :  { %6952 = vtanh.f32 %v488_v38 }
 0x675   :  { %6954 = vpow2.f32 %v5918_v41 }
 0x676   :  { %6956 = vpow2.f32 %v5919_v42  ;;  %v7171_v42 = vmov 4  }
 0x67d   :  { %v6951_v39 = vpop.eup %6950 }
 0x67e   :  { %507 = vrot.lane.b32.xlu1 %v6951_v39, %s7164_s26  ;;  %v6953_v40 = vpop.eup %6952 }
 0x67f   :  { %v6955_v43 = vpop.eup %6954 }
 0x680   :  { %v495_v44 = vadd.f32 1.0, %v6955_v43  ;;  %v6957_v45 = vpop.eup %6956 }
 0x681   :  { %v496_v46 = vadd.f32 1.0, %v6957_v45 }
 0x682   :  { %509 = vrot.lane.b32.xlu1 %v6953_v40, %s7164_s26  ;;  %6958 = vrcp.f32 %v495_v44 }
 0x683   :  { %6960 = vrcp.f32 %v496_v46 }
 0x68c   :  { %v6959_v47 = vpop.eup %6958 }
 0x68d   :  { %v6961_v50 = vpop.eup %6960  ;;  %v503_v53 = vmul.f32 %v6959_v47, %v388_v19 }
 0x68e   :  { %v504_v56 = vmul.f32 %v6961_v50, %v7276_v17 }
 0x6f0   :  { %v508_v48 = vpop.permute.xlu1 %507 }
 0x6f1   :  { %v513_v49 = vmul.f32 %v6959_v47, %v508_v48 }
 0x6f3   :  { %517 = vrot.lane.b32.xlu0 %v513_v49, %s7165_s27 }
 0x6f4   :  { %v510_v51 = vpop.permute.xlu1 %509 }
 0x6f5   :  { %v514_v52 = vmul.f32 %v6961_v50, %v510_v51 }
 0x6f7   :  { %519 = vrot.lane.b32.xlu1 %v514_v52, %s7165_s27 }
 0x765   :  { %v518_v54 = vpop.permute.xlu0 %517 }
 0x766   :  { %v7297_v55 = vadd.f32 %v518_v54, %v503_v53 }
 0x768   :  { %6962 = vtanh.f32 %v7297_v55 }
 0x769   :  { %v520_v57 = vpop.permute.xlu1 %519 }
 0x76a   :  { %v524_v58 = vadd.f32 %v520_v57, %v504_v56 }
 0x76c   :  { %6964 = vtanh.f32 %v524_v58 }
 0x772   :  { %v6963_v59 = vpop.eup %6962 }
 0x773   :  { %529 = vrot.lane.b32.xlu0 %v6963_v59, %s7166_s28 }
 0x776   :  { %v6965_v60 = vpop.eup %6964 }
 0x777   :  { %531 = vrot.lane.b32.xlu1 %v6965_v60, %s7166_s28 }
 0x7e5   :  { %v530_v62 = vpop.permute.xlu0 %529 }
 0x7e6   :  { %v535_v63 = vmul.f32 %v6959_v47, %v530_v62 }
 0x7e8   :  { %539 = vrot.lane.b32.xlu0 %v535_v63, %s7168_s29 }
 0x7e9   :  { %v532_v1 = vpop.permute.xlu1 %531 }
 0x7ea   :  { %v536_v2 = vmul.f32 %v6961_v50, %v532_v1 }
 0x7ec   :  { %541 = vrot.lane.b32.xlu1 %v536_v2, %s7168_s29  ;;  %79 = vperm.xlu0 %6903, %v7222_v4  }
 0x7f0   :  { %83 = vperm.xlu1 %6904, %v7230_v6   ;;  %6906 = vset.pattern.permute.xlu0 %v7171_v42 }
 0x7f4   :  { %6905 = vset.pattern.permute.xlu1 %v7171_v42 }
 0x85a   :  { %v540_v3 = vpop.permute.xlu0 %539 }
 0x85b   :  { %6275 = vmatprep.mubr.msk.f32.mxu1 %vm138_vm0, %v540_v3 }
 0x85e   :  { %v542_v7 = vpop.permute.xlu1 %541 }
 0x85f   :  { %6276 = vmatmul.mubr.msk.f32.vlgmr.msra.gmra.mrb[4].mxu1 %vm138_vm0, %v542_v7 }
 0x860   :  { %6706 = vmatpush3.bf16.msra.mxu1 %v7224_v5 }
 0x861   :  { %6712 = vmatprep.subr.bf16.mxu1 %v7224_v5 }
 0x86b   :  { %v80_v10 = vpop.permute.xlu0 %79 }
 0x86c   :  { %v86_v13 = vmul.f32 %v7242_v8, %v80_v10 }
 0x86e   :  { %v88_v15 = vadd.f32 %v7245_v11, %v86_v13 }
 0x86f   :  { %v84_v9 = vpop.permute.xlu1 %83 }
 0x870   :  { %v87_v12 = vmul.f32 %v7242_v8, %v84_v9 }
 0x872   :  { %v89_v14 = vadd.f32 %v7245_v11, %v87_v12 }
 0x932   :  { %v6277_v16 = vpop.f32.mrb[4].mxu1 }
 0x933   :  { %v623_v17 = vadd.f32 %v6277_v16, %v89_v14  ;;  %v613_v18 = vpop.f32.mrb[5].mxu1 }
 0x934   :  { %v622_v19 = vadd.f32 %v613_v18, %v88_v15 }
 0x935   :  { %6966 = vtanh.f32 %v623_v17  ;;  %v5923_v22 = vmul.f32 -1.442695, %v623_v17 }
 0x936   :  { %6968 = vtanh.f32 %v622_v19  ;;  %v5922_v23 = vmul.f32 -1.442695, %v622_v19 }
 0x937   :  { %6970 = vpow2.f32 %v5923_v22 }
 0x938   :  { %6972 = vpow2.f32 %v5922_v23  ;;  %v7172_v23 = vmov 5  }
 0x93f   :  { %v6967_v20 = vpop.eup %6966 }
 0x940   :  { %v6969_v21 = vpop.eup %6968  ;;  %644 = vrot.lane.b32.xlu0 %v6967_v20, %s7164_s26 }
 0x941   :  { %642 = vrot.lane.b32.xlu1 %v6969_v21, %s7164_s26  ;;  %v6971_v24 = vpop.eup %6970 }
 0x942   :  { %v6973_v25 = vpop.eup %6972  ;;  %v631_v26 = vadd.f32 1.0, %v6971_v24 }
 0x943   :  { %v630_v27 = vadd.f32 1.0, %v6973_v25 }
 0x944   :  { %6974 = vrcp.f32 %v631_v26 }
 0x945   :  { %6976 = vrcp.f32 %v630_v27 }
 0x94e   :  { %v6975_v28 = vpop.eup %6974 }
 0x94f   :  { %v6977_v30 = vpop.eup %6976  ;;  %v639_v34 = vmul.f32 %v6975_v28, %v524_v58 }
 0x950   :  { %v638_v36 = vmul.f32 %v6977_v30, %v7297_v55 }
 0x9b2   :  { %v645_v29 = vpop.permute.xlu0 %644 }
 0x9b3   :  { %v649_v31 = vmul.f32 %v6975_v28, %v645_v29  ;;  %v643_v32 = vpop.permute.xlu1 %642 }
 0x9b4   :  { %v648_v33 = vmul.f32 %v6977_v30, %v643_v32 }
 0x9b5   :  { %654 = vrot.lane.b32.xlu0 %v649_v31, %s7165_s27 }
 0x9b6   :  { %652 = vrot.lane.b32.xlu1 %v648_v33, %s7165_s27 }
 0xa27   :  { %v655_v35 = vpop.permute.xlu0 %654 }
 0xa28   :  { %v7320_v37 = vadd.f32 %v655_v35, %v639_v34  ;;  %v653_v38 = vpop.permute.xlu1 %652 }
 0xa29   :  { %v658_v39 = vadd.f32 %v653_v38, %v638_v36 }
 0xa2a   :  { %6978 = vtanh.f32 %v7320_v37 }
 0xa2b   :  { %6980 = vtanh.f32 %v658_v39 }
 0xa34   :  { %v6979_v40 = vpop.eup %6978 }
 0xa35   :  { %v6981_v41 = vpop.eup %6980  ;;  %666 = vrot.lane.b32.xlu0 %v6979_v40, %s7166_s28 }
 0xa36   :  { %664 = vrot.lane.b32.xlu1 %v6981_v41, %s7166_s28 }
 0xaa7   :  { %v667_v43 = vpop.permute.xlu0 %666 }
 0xaa8   :  { %v671_v44 = vmul.f32 %v6975_v28, %v667_v43  ;;  %v665_v45 = vpop.permute.xlu1 %664 }
 0xaa9   :  { %v670_v46 = vmul.f32 %v6977_v30, %v665_v45 }
 0xaaa   :  { %676 = vrot.lane.b32.xlu0 %v671_v44, %s7168_s29 }
 0xaab   :  { %674 = vrot.lane.b32.xlu1 %v670_v46, %s7168_s29 }
 0xaae   :  { %95 = vperm.xlu0 %6906, %v7230_v6  }
 0xaaf   :  { %91 = vperm.xlu1 %6905, %v7222_v4  }
 0xab2   :  { %6907 = vset.pattern.permute.xlu0 %v7172_v23 }
 0xab3   :  { %6908 = vset.pattern.permute.xlu1 %v7172_v23 }
 0xb1c   :  { %v677_v48 = vpop.permute.xlu0 %676 }
 0xb1d   :  { %v675_v47 = vpop.permute.xlu1 %674 }
 0xb1e   :  { %6282 = vmatprep.mubr.msk.f32.mxu0 %vm138_vm0, %v675_v47 }
 0xb1f   :  { %6283 = vmatmul.mubr.msk.f32.vlgmr.msra.gmra.mrb[2].mxu0 %vm138_vm0, %v677_v48 }
 0xb20   :  { %6710 = vmatpush3.bf16.msra.mxu0 %v7224_v5 }
 0xb2d   :  { %v96_v50 = vpop.permute.xlu0 %95 }
 0xb2e   :  { %v92_v49 = vpop.permute.xlu1 %91  ;;  %v99_v52 = vmul.f32 %v7242_v8, %v96_v50 }
 0xb2f   :  { %v98_v51 = vmul.f32 %v7242_v8, %v92_v49 }
 0xb30   :  { %v101_v54 = vadd.f32 %v7245_v11, %v99_v52 }
 0xb31   :  { %v100_v53 = vadd.f32 %v7245_v11, %v98_v51 }
 0xbf2   :  { %v6284_v55 = vpop.f32.mrb[2].mxu0 }
 0xbf3   :  { %v748_v56 = vpop.f32.mrb[3].mxu0  ;;  %v758_v58 = vadd.f32 %v6284_v55, %v101_v54 }
 0xbf4   :  { %v757_v57 = vadd.f32 %v748_v56, %v100_v53 }
 0xbf5   :  { %v5927_v62 = vmul.f32 -1.442695, %v758_v58 }
 0xbf6   :  { %6982 = vtanh.f32 %v757_v57  ;;  %v5926_v61 = vmul.f32 -1.442695, %v757_v57 }
 0xbf7   :  { %6984 = vtanh.f32 %v758_v58 }
 0xbf8   :  { %6986 = vpow2.f32 %v5926_v61  ;;  %v7173_v61 = vmov 6  }
 0xbf9   :  { %6988 = vpow2.f32 %v5927_v62 }
 0xc00   :  { %v6983_v59 = vpop.eup %6982 }
 0xc01   :  { %777 = vrot.lane.b32.xlu1 %v6983_v59, %s7164_s26  ;;  %v6985_v60 = vpop.eup %6984 }
 0xc02   :  { %v6987_v63 = vpop.eup %6986 }
 0xc03   :  { %v765_v1 = vadd.f32 1.0, %v6987_v63  ;;  %v6989_v2 = vpop.eup %6988 }
 0xc04   :  { %v766_v3 = vadd.f32 1.0, %v6989_v2 }
 0xc05   :  { %779 = vrot.lane.b32.xlu1 %v6985_v60, %s7164_s26  ;;  %6990 = vrcp.f32 %v765_v1 }
 0xc06   :  { %6992 = vrcp.f32 %v766_v3 }
 0xc0f   :  { %v6991_v7 = vpop.eup %6990 }
 0xc10   :  { %v6993_v12 = vpop.eup %6992  ;;  %v773_v15 = vmul.f32 %v6991_v7, %v658_v39 }
 0xc11   :  { %v774_v18 = vmul.f32 %v6993_v12, %v7320_v37 }
 0xc73   :  { %v778_v9 = vpop.permute.xlu1 %777 }
 0xc74   :  { %v783_v10 = vmul.f32 %v6991_v7, %v778_v9 }
 0xc76   :  { %787 = vrot.lane.b32.xlu0 %v783_v10, %s7165_s27 }
 0xc77   :  { %v780_v13 = vpop.permute.xlu1 %779 }
 0xc78   :  { %v784_v14 = vmul.f32 %v6993_v12, %v780_v13 }
 0xc7a   :  { %789 = vrot.lane.b32.xlu1 %v784_v14, %s7165_s27 }
 0xce8   :  { %v788_v16 = vpop.permute.xlu0 %787 }
 0xce9   :  { %v793_v17 = vadd.f32 %v788_v16, %v773_v15 }
 0xceb   :  { %6994 = vtanh.f32 %v793_v17 }
 0xcec   :  { %v790_v19 = vpop.permute.xlu1 %789 }
 0xced   :  { %v794_v20 = vadd.f32 %v790_v19, %v774_v18 }
 0xcef   :  { %6996 = vtanh.f32 %v794_v20 }
 0xcf5   :  { %v6995_v21 = vpop.eup %6994 }
 0xcf6   :  { %799 = vrot.lane.b32.xlu0 %v6995_v21, %s7166_s28 }
 0xcf9   :  { %v6997_v22 = vpop.eup %6996 }
 0xcfa   :  { %801 = vrot.lane.b32.xlu1 %v6997_v22, %s7166_s28 }
 0xd68   :  { %v800_v24 = vpop.permute.xlu0 %799 }
 0xd69   :  { %v805_v25 = vmul.f32 %v6991_v7, %v800_v24 }
 0xd6b   :  { %809 = vrot.lane.b32.xlu0 %v805_v25, %s7168_s29 }
 0xd6c   :  { %v802_v26 = vpop.permute.xlu1 %801 }
 0xd6d   :  { %v806_v27 = vmul.f32 %v6993_v12, %v802_v26 }
 0xd6f   :  { %811 = vrot.lane.b32.xlu1 %v806_v27, %s7168_s29  ;;  %103 = vperm.xlu0 %6907, %v7222_v4  }
 0xd73   :  { %107 = vperm.xlu1 %6908, %v7230_v6   ;;  %6910 = vset.pattern.permute.xlu0 %v7173_v61 }
 0xd77   :  { %6909 = vset.pattern.permute.xlu1 %v7173_v61 }
 0xddd   :  { %v810_v28 = vpop.permute.xlu0 %809 }
 0xdde   :  { %6289 = vmatprep.mubr.msk.f32.mxu1 %vm138_vm0, %v810_v28 }
 0xde1   :  { %v812_v29 = vpop.permute.xlu1 %811 }
 0xde2   :  { %6290 = vmatmul.mubr.msk.f32.vlgmr.msra.gmra.mrb[6].mxu1 %vm138_vm0, %v812_v29 }
 0xde3   :  { %6714 = vmatpush3.bf16.msra.mxu1 %v7224_v5 }
 0xdee   :  { %v104_v31 = vpop.permute.xlu0 %103 }
 0xdef   :  { %v110_v33 = vmul.f32 %v7242_v8, %v104_v31 }
 0xdf1   :  { %v112_v35 = vadd.f32 %v7245_v11, %v110_v33 }
 0xdf2   :  { %v108_v30 = vpop.permute.xlu1 %107 }
 0xdf3   :  { %v111_v32 = vmul.f32 %v7242_v8, %v108_v30 }
 0xdf5   :  { %v113_v34 = vadd.f32 %v7245_v11, %v111_v32 }
 0xeb5   :  { %v6291_v36 = vpop.f32.mrb[6].mxu1 }
 0xeb6   :  { %v893_v37 = vadd.f32 %v6291_v36, %v113_v34  ;;  %v883_v38 = vpop.f32.mrb[7].mxu1 }
 0xeb7   :  { %v892_v39 = vadd.f32 %v883_v38, %v112_v35 }
 0xeb8   :  { %6998 = vtanh.f32 %v893_v37  ;;  %v5931_v5 = vmul.f32 -1.442695, %v893_v37 }
 0xeb9   :  { %7000 = vtanh.f32 %v892_v39  ;;  %v5930_v42 = vmul.f32 -1.442695, %v892_v39 }
 0xeba   :  { %7002 = vpow2.f32 %v5931_v5  ;;  %v7174_v5 = vmov 7  }
 0xebb   :  { %7004 = vpow2.f32 %v5930_v42 }
 0xec2   :  { %v6999_v40 = vpop.eup %6998 }
 0xec3   :  { %v7001_v41 = vpop.eup %7000  ;;  %914 = vrot.lane.b32.xlu0 %v6999_v40, %s7164_s26 }
 0xec4   :  { %912 = vrot.lane.b32.xlu1 %v7001_v41, %s7164_s26  ;;  %v7003_v43 = vpop.eup %7002 }
 0xec5   :  { %v7005_v44 = vpop.eup %7004  ;;  %v901_v45 = vadd.f32 1.0, %v7003_v43 }
 0xec6   :  { %v900_v46 = vadd.f32 1.0, %v7005_v44 }
 0xec7   :  { %7006 = vrcp.f32 %v901_v45 }
 0xec8   :  { %7008 = vrcp.f32 %v900_v46 }
 0xed1   :  { %v7007_v47 = vpop.eup %7006 }
 0xed2   :  { %v7009_v49 = vpop.eup %7008  ;;  %v909_v53 = vmul.f32 %v7007_v47, %v794_v20 }
 0xed3   :  { %v908_v55 = vmul.f32 %v7009_v49, %v793_v17 }
 0xf35   :  { %v915_v48 = vpop.permute.xlu0 %914 }
 0xf36   :  { %v919_v50 = vmul.f32 %v7007_v47, %v915_v48  ;;  %v913_v51 = vpop.permute.xlu1 %912 }
 0xf37   :  { %v918_v52 = vmul.f32 %v7009_v49, %v913_v51 }
 0xf38   :  { %924 = vrot.lane.b32.xlu0 %v919_v50, %s7165_s27 }
 0xf39   :  { %922 = vrot.lane.b32.xlu1 %v918_v52, %s7165_s27 }
 0xfaa   :  { %v925_v54 = vpop.permute.xlu0 %924 }
 0xfab   :  { %v929_v56 = vadd.f32 %v925_v54, %v909_v53  ;;  %v923_v57 = vpop.permute.xlu1 %922 }
 0xfac   :  { %v928_v58 = vadd.f32 %v923_v57, %v908_v55 }
 0xfad   :  { %7010 = vtanh.f32 %v929_v56 }
 0xfae   :  { %7012 = vtanh.f32 %v928_v58 }
 0xfb7   :  { %v7011_v59 = vpop.eup %7010 }
 0xfb8   :  { %v7013_v60 = vpop.eup %7012  ;;  %936 = vrot.lane.b32.xlu0 %v7011_v59, %s7166_s28 }
 0xfb9   :  { %934 = vrot.lane.b32.xlu1 %v7013_v60, %s7166_s28 }
0x102a   :  { %v937_v62 = vpop.permute.xlu0 %936 }
0x102b   :  { %v941_v63 = vmul.f32 %v7007_v47, %v937_v62  ;;  %v935_v1 = vpop.permute.xlu1 %934 }
0x102c   :  { %v940_v2 = vmul.f32 %v7009_v49, %v935_v1 }
0x102d   :  { %946 = vrot.lane.b32.xlu0 %v941_v63, %s7168_s29 }
0x102e   :  { %944 = vrot.lane.b32.xlu1 %v940_v2, %s7168_s29 }
0x1031   :  { %119 = vperm.xlu0 %6910, %v7230_v6  }
0x1032   :  { %115 = vperm.xlu1 %6909, %v7222_v4  }
0x1035   :  { %6911 = vset.pattern.permute.xlu0 %v7174_v5 }
0x1036   :  { %6912 = vset.pattern.permute.xlu1 %v7174_v5 }
0x109f   :  { %v947_v7 = vpop.permute.xlu0 %946 }
0x10a0   :  { %v945_v3 = vpop.permute.xlu1 %944 }
0x10a1   :  { %6296 = vmatprep.mubr.msk.f32.mxu0 %vm138_vm0, %v945_v3 }
0x10a2   :  { %6297 = vmatmul.mubr.msk.f32.vlgmr.msra.gmra.mrb[4].mxu0 %vm138_vm0, %v947_v7 }
0x10b0   :  { %v120_v10 = vpop.permute.xlu0 %119 }
0x10b1   :  { %v116_v9 = vpop.permute.xlu1 %115  ;;  %v123_v13 = vmul.f32 %v7242_v8, %v120_v10 }
0x10b2   :  { %v122_v12 = vmul.f32 %v7242_v8, %v116_v9 }
0x10b3   :  { %v125_v15 = vadd.f32 %v7245_v11, %v123_v13 }
0x10b4   :  { %v124_v14 = vadd.f32 %v7245_v11, %v122_v12 }
0x1175   :  { %v6298_v16 = vpop.f32.mrb[4].mxu0 }
0x1176   :  { %v1018_v17 = vpop.f32.mrb[5].mxu0  ;;  %v1028_v19 = vadd.f32 %v6298_v16, %v125_v15 }
0x1177   :  { %v1027_v18 = vadd.f32 %v1018_v17, %v124_v14 }
0x1178   :  { %v5935_v23 = vmul.f32 -1.442695, %v1028_v19 }
0x1179   :  { %7014 = vtanh.f32 %v1027_v18  ;;  %v5934_v22 = vmul.f32 -1.442695, %v1027_v18 }
0x117a   :  { %7016 = vtanh.f32 %v1028_v19 }
0x117b   :  { %7018 = vpow2.f32 %v5934_v22 }
0x117c   :  { %7020 = vpow2.f32 %v5935_v23  ;;  %v1342_v23 = vld [vmem:[#allocation2 + $0x40] sm:$0xff] }
0x1183   :  { %v7015_v20 = vpop.eup %7014 }
0x1184   :  { %1047 = vrot.lane.b32.xlu1 %v7015_v20, %s7164_s26  ;;  %v7017_v21 = vpop.eup %7016 }
0x1185   :  { %v7019_v24 = vpop.eup %7018 }
0x1186   :  { %v1035_v25 = vadd.f32 1.0, %v7019_v24  ;;  %v7021_v26 = vpop.eup %7020  ;;  %v1343_v24 = vld [vmem:[#allocation2 + $0x48] sm:$0xff] }
0x1187   :  { %v1036_v27 = vadd.f32 1.0, %v7021_v26 }
0x1188   :  { %1049 = vrot.lane.b32.xlu1 %v7017_v21, %s7164_s26  ;;  %7022 = vrcp.f32 %v1035_v25  ;;  %v1222_v21 = vld [vmem:[#allocation2 + $0x20] sm:$0xff]  ;;  %v6719_v25 = vpack.c.bf16 %v1343_v24, %v1342_v23 }
0x1189   :  { %7024 = vrcp.f32 %v1036_v27 }
0x118a   :  { %6720 = vmatprep.subr.bf16.mxu1 %v6719_v25 }
0x1192   :  { %v7023_v28 = vpop.eup %7022 }
0x1193   :  { %v7025_v31 = vpop.eup %7024  ;;  %v1043_v34 = vmul.f32 %v7023_v28, %v928_v58  ;;  %v7175_v58 = vmov 8  }
0x1194   :  { %v1044_v37 = vmul.f32 %v7025_v31, %v929_v56 }
0x11f6   :  { %v1048_v29 = vpop.permute.xlu1 %1047 }
0x11f7   :  { %v1053_v30 = vmul.f32 %v7023_v28, %v1048_v29 }
0x11f9   :  { %1057 = vrot.lane.b32.xlu0 %v1053_v30, %s7165_s27 }
0x11fa   :  { %v1050_v32 = vpop.permute.xlu1 %1049 }
0x11fb   :  { %v1054_v33 = vmul.f32 %v7025_v31, %v1050_v32 }
0x11fd   :  { %1059 = vrot.lane.b32.xlu1 %v1054_v33, %s7165_s27 }
0x126b   :  { %v1058_v35 = vpop.permute.xlu0 %1057 }
0x126c   :  { %v7374_v36 = vadd.f32 %v1058_v35, %v1043_v34  ;;  %v1344_v35 = vld [vmem:[#allocation2 + $0x50] sm:$0xff] }
0x126e   :  { %7026 = vtanh.f32 %v7374_v36 }
0x126f   :  { %v1060_v38 = vpop.permute.xlu1 %1059 }
0x1270   :  { %v7377_v39 = vadd.f32 %v1060_v38, %v1044_v37  ;;  %v5940_v38 = vld [vmem:[#allocation2 + $0x30] ss:$0 sm:$0xff] }
0x1272   :  { %7028 = vtanh.f32 %v7377_v39 }
0x1278   :  { %v7027_v40 = vpop.eup %7026 }
0x1279   :  { %1069 = vrot.lane.b32.xlu0 %v7027_v40, %s7166_s28 }
0x127c   :  { %v7029_v41 = vpop.eup %7028 }
0x127d   :  { %1071 = vrot.lane.b32.xlu1 %v7029_v41, %s7166_s28  ;;  %v1314_v41 = vld [vmem:[#allocation2 + $0x38] sm:$0xff] }
0x12eb   :  { %v1070_v42 = vpop.permute.xlu0 %1069 }
0x12ec   :  { %v1075_v43 = vmul.f32 %v7023_v28, %v1070_v42 }
0x12ee   :  { %1079 = vrot.lane.b32.xlu0 %v1075_v43, %s7168_s29 }
0x12ef   :  { %v1072_v44 = vpop.permute.xlu1 %1071 }
0x12f0   :  { %v1076_v45 = vmul.f32 %v7025_v31, %v1072_v44 }
0x12f2   :  { %1081 = vrot.lane.b32.xlu1 %v1076_v45, %s7168_s29  ;;  %127 = vperm.xlu0 %6911, %v7222_v4   ;;  %v7176_v45 = vmov 1966171168  }
0x12f6   :  { %131 = vperm.xlu1 %6912, %v7230_v6   ;;  %6914 = vset.pattern.permute.xlu0 %v7175_v58 }
0x12fa   :  { %6913 = vset.pattern.permute.xlu1 %v7175_v58 }
0x1360   :  { %v1080_v46 = vpop.permute.xlu0 %1079 }
0x1361   :  { %6303 = vmatprep.mubr.msk.f32.mxu1 %vm138_vm0, %v1080_v46  ;;  %v1321_v46 = vunpack.c.l.s4 %v7176_v45 }
0x1364   :  { %v1082_v47 = vpop.permute.xlu1 %1081 }
0x1365   :  { %6304 = vmatmul.mubr.msk.f32.vlgmr.msra.gmra.mrb[8].mxu1 %vm138_vm0, %v1082_v47  ;;  %v1323_v47 = vlaneseq }
0x1366   :  { %6722 = vmatpush3.bf16.msra.mxu1 %v6719_v25 }
0x1371   :  { %v128_v49 = vpop.permute.xlu0 %127 }
0x1372   :  { %v134_v51 = vmul.f32 %v7242_v8, %v128_v49  ;;  %v1322_v49 = vunpack.c.0.s8 %v1321_v46 }
0x1374   :  { %v136_v53 = vadd.f32 %v7245_v11, %v134_v51 }
0x1375   :  { %v132_v48 = vpop.permute.xlu1 %131 }
0x1376   :  { %v135_v50 = vmul.f32 %v7242_v8, %v132_v48  ;;  %v27_v48 = vld [vmem:[%s7858_s0] sm:$0x3] }
0x1377   :  { %vm1317_vm2 = vcmp.eq.f32.partialorder %v27_v48, 0.0 }
0x1378   :  { %v137_v52 = vadd.f32 %v7245_v11, %v135_v50  ;;  %v7419_v50 = vshrl.u32 %v1323_v47, 7 }
0x137a   :  { %v7422_v51 = vsub.s32 %v1322_v49, %v7419_v50 }
0x1438   :  { %v6305_v54 = vpop.f32.mrb[8].mxu1 }
0x1439   :  { %v1163_v55 = vadd.f32 %v6305_v54, %v137_v52  ;;  %v1153_v56 = vpop.f32.mrb[9].mxu1  ;;  %v1318_v52 = vsel %vm1317_vm2, -1e+09, %v7162_v0  ;;  %v5943_v54 = vld [vmem:[#allocation2 + $0x60] ss:$0 sm:$0xff] }
0x143a   :  { %v1162_v57 = vadd.f32 %v1153_v56, %v136_v53  ;;  %v1326_v53 = vrot.slane %v1318_v52, %v7422_v51  ;;  %v7432_v56 = vsub.s32 0, %v7419_v50 }
0x143b   :  { %7030 = vtanh.f32 %v1163_v55  ;;  %v5939_v8 = vmul.f32 -1.442695, %v1163_v55 }
0x143c   :  { %7032 = vtanh.f32 %v1162_v57  ;;  %v5938_v61 = vmul.f32 -1.442695, %v1162_v57  ;;  %v1334_v55 = vrot.slane %v1326_v53, %v7422_v51  ;;  %v1327_v57 = vcombine.high %v1326_v53, %v1326_v53 }
0x143d   :  { %7034 = vpow2.f32 %v5939_v8 }
0x143e   :  { %7036 = vpow2.f32 %v5938_v61  ;;  %v1593_v61 = vrot.slane %v1334_v55, %v7432_v56 }
0x1445   :  { %v7031_v59 = vpop.eup %7030 }
0x1446   :  { %v7033_v60 = vpop.eup %7032  ;;  %1184 = vrot.lane.b32.xlu0 %v7031_v59, %s7164_s26 }
0x1447   :  { %1182 = vrot.lane.b32.xlu1 %v7033_v60, %s7164_s26  ;;  %v7035_v11 = vpop.eup %7034 }
0x1448   :  { %v7037_v62 = vpop.eup %7036  ;;  %v1171_v63 = vadd.f32 1.0, %v7035_v11  ;;  %v1341_v11 = vrot.slane %v1327_v57, %v7422_v51 }
0x1449   :  { %v1170_v1 = vadd.f32 1.0, %v7037_v62 }
0x144a   :  { %7038 = vrcp.f32 %v1171_v63  ;;  %v1597_v62 = vrot.slane %v1341_v11, %v7432_v56 }
0x144b   :  { %7040 = vrcp.f32 %v1170_v1 }
0x1454   :  { %v7039_v2 = vpop.eup %7038 }
0x1455   :  { %v7041_v7 = vpop.eup %7040  ;;  %v1179_v16 = vmul.f32 %v7039_v2, %v7377_v39 }
0x1456   :  { %v1178_v13 = vmul.f32 %v7041_v7, %v7374_v36  ;;  %v1345_v36 = vld [vmem:[#allocation2 + $0x58] sm:$0xff] }
0x1457   :  { %v6723_v37 = vpack.c.bf16 %v1345_v36, %v1344_v35 }
0x1459   :  { %6724 = vmatprep.subr.bf16.mxu1 %v6723_v37 }
0x145a   :  { %6726 = vmatpush3.bf16.msra.mxu1 %v6723_v37 }
0x145b   :  { %6334 = vmatprep.subr.mxu1 %v7162_v0 }
0x14b8   :  { %v1185_v3 = vpop.permute.xlu0 %1184 }
0x14b9   :  { %v1189_v9 = vmul.f32 %v7039_v2, %v1185_v3  ;;  %v1183_v10 = vpop.permute.xlu1 %1182 }
0x14ba   :  { %v1188_v12 = vmul.f32 %v7041_v7, %v1183_v10 }
0x14bb   :  { %1194 = vrot.lane.b32.xlu0 %v1189_v9, %s7165_s27 }
0x14bc   :  { %1192 = vrot.lane.b32.xlu1 %v1188_v12, %s7165_s27 }
0x14bf   :  { %1217 = vperm.xlu0 %6914, %v7230_v6   ;;  %v1223_v6 = vld [vmem:[#allocation2 + $0x28] sm:$0xff] }
0x14c0   :  { %1213 = vperm.xlu1 %6913, %v7222_v4   ;;  %v6715_v22 = vpack.c.bf16 %v1223_v6, %v1222_v21 }
0x14c2   :  { %6716 = vmatprep.subr.bf16.mxu0 %v6715_v22 }
0x14c3   :  { %6718 = vmatpush3.bf16.msra.mxu0 %v6715_v22 }
0x14c4   :  { %6324 = vmatprep.subr.mxu0 %v7162_v0 }
0x152d   :  { %v1195_v14 = vpop.permute.xlu0 %1194 }
0x152e   :  { %v1193_v15 = vpop.permute.xlu1 %1192  ;;  %v1199_v18 = vadd.f32 %v1195_v14, %v1179_v16 }
0x152f   :  { %v1198_v17 = vadd.f32 %v1193_v15, %v1178_v13 }
0x1531   :  { %7042 = vtanh.f32 %v1198_v17 }
0x1532   :  { %7044 = vtanh.f32 %v1199_v18 }
0x153b   :  { %v7043_v19 = vpop.eup %7042 }
0x153c   :  { %1204 = vrot.lane.b32.xlu1 %v7043_v19, %s7166_s28  ;;  %v7045_v20 = vpop.eup %7044 }
0x153e   :  { %v1218_v30 = vpop.permute.xlu0 %1217 }
0x153f   :  { %v1214_v4 = vpop.permute.xlu1 %1213 }
0x1540   :  { %1206 = vrot.lane.b32.xlu1 %v7045_v20, %s7166_s28 }
0x15ae   :  { %v1205_v26 = vpop.permute.xlu1 %1204 }
0x15af   :  { %v1210_v27 = vmul.f32 %v7041_v7, %v1205_v26 }
0x15b1   :  { %v1220_v28 = vmul.f32 %v1214_v4, %v1210_v27 }
0x15b2   :  { %v1207_v29 = vpop.permute.xlu1 %1206 }
0x15b3   :  { %v1211_v31 = vmul.f32 %v7039_v2, %v1207_v29  ;;  %1231 = vrot.lane.b32.xlu0 %v1220_v28, %s7168_s29 }
0x15b5   :  { %v1221_v32 = vmul.f32 %v1218_v30, %v1211_v31 }
0x15b7   :  { %1233 = vrot.lane.b32.xlu1 %v1221_v32, %s7168_s29 }
0x1625   :  { %v1232_v33 = vpop.permute.xlu0 %1231 }
0x1626   :  { %6310 = vmatprep.mubr.msk.f32.mxu0 %vm138_vm0, %v1232_v33 }
0x1629   :  { %v1234_v34 = vpop.permute.xlu1 %1233 }
0x162a   :  { %6311 = vmatmul.mubr.msk.f32.vlgmr.msra.gmra.mrb[6].mxu0 %vm138_vm0, %v1234_v34 }
0x162b   :  { %6326 = vmatprep.mubr.msk.f32.mxu0 %vm7177_vm3, %v7162_v0 }
0x16fd   :  { %v6312_v39 = vpop.f32.mrb[6].mxu0 }
0x16fe   :  { %v1311_v40 = vadd.f32 %v6312_v39, %v5940_v38  ;;  %v1305_v5 = vpop.f32.mrb[7].mxu0 }
0x16ff   :  { %v1306_v42 = vadd.f32 %v5940_v38, %v1305_v5 }
0x1700   :  { %v7410_v44 = vadd.f32 %v1314_v41, %v1311_v40 }
0x1701   :  { %v7408_v43 = vadd.f32 %v1314_v41, %v1306_v42 }
0x1703   :  { %6321 = vmatprep.mubr.msk.f32.mxu1 %vm1351_vm1, %v7408_v43 }
0x1704   :  { %6322 = vmatmul.mubr.msk.f32.vlgmr.msra.gmra.mrb[10].mxu1 %vm1351_vm1, %v7410_v44 }
0x1705   :  { %6336 = vmatprep.mubr.msk.f32.mxu1 %vm7177_vm3, %v7162_v0 }
0x17d7   :  { %v6323_v58 = vpop.f32.mrb[10].mxu1 }
0x17d8   :  { %v7434_v59 = vadd.f32 %v6323_v58, %v5943_v54  ;;  %v1424_v60 = vpop.f32.mrb[11].mxu1 }
0x17d9   :  { %v7436_v8 = vadd.f32 %v5943_v54, %v1424_v60 }
0x17da   :  { %1512 = vrot.lane.b32.xlu1 %v7434_v59, %s7164_s26 }
0x17db   :  { %1434 = vrot.lane.b32.xlu0 %v7436_v8, %s7164_s26 }
0x17de   :  { %1598 = vrot.lane.b32.xlu1 %v1593_v61, %s7178_s4 }
0x17df   :  { %1686 = vrot.lane.b32.xlu0 %v7434_v59, %s7179_s5 }
0x17e2   :  { %1600 = vrot.lane.b32.xlu1 %v1597_v62, %s7178_s4 }
0x17e3   :  { %1608 = vrot.lane.b32.xlu0 %v7436_v8, %s7179_s5 }
0x17e6   :  { %1684 = vrot.lane.b32.xlu1 %v7434_v59, %s7180_s6 }
0x17e7   :  { %1606 = vrot.lane.b32.xlu0 %v7436_v8, %s7180_s6 }
0x17ea   :  { %1766 = vrot.lane.b32.xlu1 %v7436_v8, %s7178_s4 }
0x17eb   :  { %1768 = vrot.lane.b32.xlu0 %v7436_v8, %s7168_s29 }
0x17ee   :  { %1844 = vrot.lane.b32.xlu1 %v7434_v59, %s7178_s4 }
0x17ef   :  { %1846 = vrot.lane.b32.xlu0 %v7434_v59, %s7168_s29 }
0x184c   :  { %v1513_v63 = vpop.permute.xlu1 %1512 }
0x184d   :  { %v1435_v1 = vpop.permute.xlu0 %1434 }
0x184e   :  { %6325 = vmatpush3.xpose.msk.msra.mxu0 %vm1436_vm4, %v1435_v1 }
0x184f   :  { %6329 = vmatprep.subr.mxu0 %v7162_v0 }
0x1850   :  { %v7465_v2 = vpop.permute.xlu1 %1598 }
0x1851   :  { %6327 = vmatmul.mubr.msk.f32.vlgmr.msra.gmra.mrb[8].mxu0 %vm1436_vm4, %v7436_v8  ;;  %v1687_v3 = vpop.permute.xlu0 %1686 }
0x1852   :  { %6330 = vmatpush3.xpose.msk.msra.mxu0 %vm1436_vm4, %v1513_v63  ;;  %6331 = vmatprep.mubr.msk.f32.mxu0 %vm7177_vm3, %v7162_v0 }
0x1853   :  { %6339 = vmatprep.subr.mxu0 %v7162_v0 }
0x1854   :  { %v7473_v7 = vpop.permute.xlu1 %1600 }
0x1855   :  { %6332 = vmatmul.mubr.msk.f32.vlgmr.msra.gmra.mrb[10].mxu0 %vm1436_vm4, %v7434_v59  ;;  %v1609_v9 = vpop.permute.xlu0 %1608 }
0x1856   :  { %6335 = vmatpush3.xpose.msk.msra.mxu1 %vm1436_vm4, %v1609_v9  ;;  %6340 = vmatpush3.xpose.msk.msra.mxu0 %vm1436_vm4, %v1687_v3 }
0x1857   :  { %6341 = vmatprep.mubr.msk.f32.mxu0 %vm7177_vm3, %v7162_v0  ;;  %6344 = vmatprep.subr.mxu1 %v7162_v0 }
0x1858   :  { %v1685_v10 = vpop.permute.xlu1 %1684  ;;  %6349 = vmatprep.subr.mxu0 %v7162_v0 }
0x1859   :  { %6342 = vmatmul.mubr.msk.f32.vlgmr.msra.gmra.mrb[12].mxu0 %vm1436_vm4, %v1685_v10  ;;  %v1607_v12 = vpop.permute.xlu0 %1606 }
0x185a   :  { %6337 = vmatmul.mubr.msk.f32.vlgmr.msra.gmra.mrb[12].mxu1 %vm1436_vm4, %v1607_v12  ;;  %6351 = vmatprep.mubr.msk.f32.mxu0 %vm7177_vm3, %v7162_v0 }
0x185b   :  { %6346 = vmatprep.mubr.msk.f32.mxu1 %vm7177_vm3, %v7162_v0 }
0x185c   :  { %v1767_v14 = vpop.permute.xlu1 %1766 }
0x185d   :  { %v1769_v13 = vpop.permute.xlu0 %1768 }
0x185e   :  { %6345 = vmatpush3.xpose.msk.msra.mxu1 %vm1436_vm4, %v1769_v13 }
0x185f   :  { %6354 = vmatprep.subr.mxu1 %v7162_v0 }
0x1860   :  { %v1845_v16 = vpop.permute.xlu1 %1844 }
0x1861   :  { %6347 = vmatmul.mubr.msk.f32.vlgmr.msra.gmra.mrb[14].mxu1 %vm1436_vm4, %v1767_v14  ;;  %v1847_v15 = vpop.permute.xlu0 %1846 }
0x1862   :  { %6350 = vmatpush3.xpose.msk.msra.mxu0 %vm1436_vm4, %v1847_v15  ;;  %6356 = vmatprep.mubr.msk.f32.mxu1 %vm7177_vm3, %v7162_v0 }
0x1863   :  { %6359 = vmatprep.subr.mxu0 %v7162_v0 }
0x1865   :  { %6352 = vmatmul.mubr.msk.f32.vlgmr.msra.gmra.mrb[14].mxu0 %vm1436_vm4, %v1845_v16 }
0x1866   :  { %6361 = vmatprep.mubr.msk.f32.mxu0 %vm7177_vm3, %v7162_v0 }
0x1924   :  { %v1507_v17 = vpop.f32.mrb[8].mxu0 }
0x1925   :  { %v1588_v18 = vmul.f32 0.35355338, %v1507_v17  ;;  %v6328_v19 = vpop.f32.mrb[9].mxu0 }
0x1927   :  { %v1604_v20 = vadd.f32 %v7465_v2, %v1588_v18 }
0x1928   :  { %v1584_v21 = vpop.f32.mrb[10].mxu0 }
0x1929   :  { %v1589_v6 = vmul.f32 0.35355338, %v1584_v21  ;;  %v6333_v22 = vpop.f32.mrb[11].mxu0  ;;  %v2086_v4 = vsel %vm1436_vm4, %v1604_v20, -inf }
0x192a   :  { %2087 = vmax.xlane.f32.xlu0 %v2086_v4 }
0x192b   :  { %v1605_v23 = vadd.f32 %v7473_v7, %v1589_v6 }
0x192c   :  { %v1758_v24 = vpop.f32.mrb[12].mxu0 }
0x192d   :  { %v1680_v25 = vpop.f32.mrb[12].mxu1  ;;  %v6343_v26 = vpop.f32.mrb[13].mxu0  ;;  %v2089_v27 = vsel %vm1436_vm4, %v1605_v23, -inf  ;;  %v1763_v33 = vmul.f32 0.35355338, %v1758_v24 }
0x192e   :  { %2090 = vmax.xlane.f32.xlu1 %v2089_v27  ;;  %v6338_v28 = vpop.f32.mrb[13].mxu1  ;;  %v1762_v54 = vmul.f32 0.35355338, %v1680_v25 }
0x192f   :  { %v1765_v34 = vadd.f32 %v1763_v33, %v7473_v7  ;;  %v2174_v33 = vld [vmem:[#allocation2 + $0x68] sm:$0xff] }
0x1930   :  { %v1764_v58 = vadd.f32 %v1762_v54, %v7465_v2 }
0x1931   :  { %v2095_v35 = vsel %vm1436_vm4, %v1765_v34, -inf }
0x1932   :  { %v2092_v63 = vsel %vm1436_vm4, %v1764_v58, -inf }
0x1934   :  { %v1840_v29 = vpop.f32.mrb[14].mxu1 }
0x1935   :  { %v6348_v30 = vpop.f32.mrb[15].mxu1  ;;  %v1922_v55 = vmul.f32 0.35355338, %v1840_v29 }
0x1937   :  { %v1924_v11 = vadd.f32 %v1922_v55, %v7465_v2 }
0x1938   :  { %v1918_v31 = vpop.f32.mrb[14].mxu0 }
0x1939   :  { %v6353_v32 = vpop.f32.mrb[15].mxu0  ;;  %v1923_v62 = vmul.f32 0.35355338, %v1918_v31  ;;  %v2098_v3 = vsel %vm1436_vm4, %v1924_v11, -inf }
0x193b   :  { %v1925_v1 = vadd.f32 %v1923_v62, %v7473_v7 }
0x193d   :  { %v2101_v9 = vsel %vm1436_vm4, %v1925_v1, -inf }
0x193f   :  { %1928 = vrot.lane.b32.xlu1 %v7436_v8, %s7181_s7 }
0x1940   :  { %2006 = vrot.lane.b32.xlu0 %v7434_v59, %s7181_s7 }
0x1943   :  { %1926 = vrot.lane.b32.xlu1 %v7436_v8, %s7182_s8 }
0x1947   :  { %2004 = vrot.lane.b32.xlu1 %v7434_v59, %s7182_s8 }
0x194b   :  { %2255 = vrot.lane.b32.xlu1 %v7434_v59, %s7183_s9 }
0x196f   :  { %2096 = vmax.xlane.f32.xlu1 %v2095_v35 }
0x19b7   :  { %v2088_v36 = vpop.xlane.xlu0 %2087 }
0x19b8   :  { %v2110_v37 = vsub.f32 %v1604_v20, %v2088_v36 }
0x19ba   :  { %v2118_v38 = vmul.f32 1.442695, %v2110_v37 }
0x19bb   :  { %v2091_v39 = vpop.xlane.xlu1 %2090  ;;  %v2007_v40 = vpop.permute.xlu0 %2006 }
0x19bc   :  { %7046 = vpow2.f32 %v2118_v38  ;;  %v2111_v41 = vsub.f32 %v1605_v23, %v2091_v39  ;;  %6360 = vmatpush3.xpose.msk.msra.mxu0 %vm1436_vm4, %v2007_v40 }
0x19bd   :  { %6369 = vmatprep.subr.mxu0 %v7162_v0 }
0x19be   :  { %v2120_v5 = vmul.f32 1.442695, %v2111_v41 }
0x19bf   :  { %v1929_v42 = vpop.permute.xlu1 %1928 }
0x19c0   :  { %7048 = vpow2.f32 %v2120_v5  ;;  %6355 = vmatpush3.xpose.msk.msra.mxu1 %vm1436_vm4, %v1929_v42 }
0x19c1   :  { %6364 = vmatprep.subr.mxu1 %v7162_v0 }
0x19c3   :  { %v1927_v45 = vpop.permute.xlu1 %1926 }
0x19c4   :  { %6357 = vmatmul.mubr.msk.f32.vlgmr.msra.gmra.mrb[16].mxu1 %vm1436_vm4, %v1927_v45 }
0x19c5   :  { %6366 = vmatprep.mubr.msk.f32.mxu1 %vm7177_vm3, %v7162_v0 }
0x19c6   :  { %v7047_v46 = vpop.eup %7046 }
0x19c7   :  { %v2005_v47 = vpop.permute.xlu1 %2004  ;;  %v2134_v48 = vsel %vm1436_vm4, %v7047_v46, 0.0 }
0x19c8   :  { %2135 = vadd.xlane.f32.xlu0 %v2134_v48  ;;  %6362 = vmatmul.mubr.msk.f32.vlgmr.msra.gmra.mrb[16].mxu0 %vm1436_vm4, %v2005_v47 }
0x19c9   :  { %6371 = vmatprep.mubr.msk.f32.mxu0 %vm7177_vm3, %v7162_v0 }
0x19ca   :  { %v7049_v49 = vpop.eup %7048 }
0x19cb   :  { %v2256_v52 = vpop.permute.xlu1 %2255  ;;  %v2137_v53 = vsel %vm1436_vm4, %v7049_v49, 0.0 }
0x19cc   :  { %2138 = vadd.xlane.f32.xlu0 %v2137_v53  ;;  %6370 = vmatpush3.msra.mxu0 %v2256_v52 }
0x19cd   :  { %6379 = vmatprep.subr.mxu0 %v7162_v0 }
0x19e2   :  { %2179 = vrot.lane.b32.xlu0 %v7436_v8, %s7183_s9 }
0x19fc   :  { %v2097_v57 = vpop.xlane.xlu1 %2096 }
0x19fd   :  { %v2113_v60 = vsub.f32 %v1765_v34, %v2097_v57 }
0x19ff   :  { %v2124_v61 = vmul.f32 1.442695, %v2113_v60 }
0x1a01   :  { %7050 = vpow2.f32 %v2124_v61  ;;  %2093 = vmax.xlane.f32.xlu0 %v2092_v63 }
0x1a05   :  { %2099 = vmax.xlane.f32.xlu0 %v2098_v3 }
0x1a09   :  { %2102 = vmax.xlane.f32.xlu0 %v2101_v9 }
0x1a0b   :  { %v7536_v10 = vpop.eup %7050 }
0x1a0c   :  { %v2143_v12 = vsel %vm1436_vm4, %v7536_v10, 0.0 }
0x1a0d   :  { %2144 = vadd.xlane.f32.xlu0 %v2143_v12 }
0x1a55   :  { %v2136_v13 = vpop.xlane.xlu0 %2135 }
0x1a56   :  { %7052 = vrcp.f32 %v2136_v13 }
0x1a59   :  { %v2139_v14 = vpop.xlane.xlu0 %2138 }
0x1a5a   :  { %7054 = vrcp.f32 %v2139_v14 }
0x1a5d   :  { %v2180_v15 = vpop.permute.xlu0 %2179 }
0x1a5e   :  { %6365 = vmatpush3.msra.mxu1 %v2180_v15 }
0x1a5f   :  { %6374 = vmatprep.subr.mxu1 %v2174_v33 }
0x1a60   :  { %v7053_v16 = vpop.eup %7052 }
0x1a61   :  { %v2166_v17 = vmul.f32 %v7053_v16, %v7047_v46  ;;  %v2175_v16 = vld [vmem:[#allocation2 + $0x70] sm:$0xff] }
0x1a63   :  { %6367 = vmatmul.mubr.msk.f32.vlgmr.msra.gmra.mrb[18].mxu1 %vm1436_vm4, %v2166_v17 }
0x1a64   :  { %v7055_v18 = vpop.eup %7054  ;;  %6375 = vmatpush3.msra.mxu1 %v2174_v33 }
0x1a65   :  { %v2167_v19 = vmul.f32 %v7055_v18, %v7049_v49  ;;  %6384 = vmatprep.subr.mxu1 %v7162_v0 }
0x1a67   :  { %6372 = vmatmul.mubr.msk.f32.vlgmr.msra.gmra.mrb[18].mxu0 %vm1436_vm4, %v2167_v19 }
0x1a68   :  { %6381 = vmatprep.mubr.msk.f32.mxu0 %vm7177_vm3, %v7162_v0 }
0x1a8e   :  { %v2094_v20 = vpop.xlane.xlu0 %2093 }
0x1a8f   :  { %v2112_v21 = vsub.f32 %v1764_v58, %v2094_v20 }
0x1a91   :  { %v2122_v6 = vmul.f32 1.442695, %v2112_v21 }
0x1a92   :  { %v2100_v22 = vpop.xlane.xlu0 %2099 }
0x1a93   :  { %7056 = vpow2.f32 %v2122_v6  ;;  %v2114_v34 = vsub.f32 %v1924_v11, %v2100_v22  ;;  %v2176_v22 = vld [vmem:[#allocation2 + $0x78] sm:$0xff] }
0x1a95   :  { %v2126_v35 = vmul.f32 1.442695, %v2114_v34 }
0x1a96   :  { %v2103_v4 = vpop.xlane.xlu0 %2102 }
0x1a97   :  { %v2115_v23 = vsub.f32 %v1925_v1, %v2103_v4  ;;  %v2000_v24 = vpop.f32.mrb[16].mxu1 }
0x1a98   :  { %v6358_v25 = vpop.f32.mrb[17].mxu1  ;;  %v2082_v37 = vmul.f32 0.35355338, %v2000_v24 }
0x1a99   :  { %v2128_v26 = vmul.f32 1.442695, %v2115_v23 }
0x1a9a   :  { %v2084_v39 = vadd.f32 %v2082_v37, %v7465_v2  ;;  %v2145_v46 = vpop.xlane.xlu0 %2144 }
0x1a9b   :  { %7058 = vpow2.f32 %v2128_v26  ;;  %v2078_v27 = vpop.f32.mrb[16].mxu0 }
0x1a9c   :  { %v6363_v28 = vpop.f32.mrb[17].mxu0  ;;  %7060 = vpow2.f32 %v2126_v35  ;;  %v2104_v40 = vsel %vm1436_vm4, %v2084_v39, -inf  ;;  %v2083_v41 = vmul.f32 0.35355338, %v2078_v27 }
0x1a9d   :  { %v7057_v29 = vpop.eup %7056 }
0x1a9e   :  { %v2140_v30 = vsel %vm1436_vm4, %v7057_v29, 0.0  ;;  %v2085_v5 = vadd.f32 %v2083_v41, %v7473_v7  ;;  %v5966_v41 = vld [vmem:[#allocation2 + $0x88] ss:$0 sm:$0xff] }
0x1a9f   :  { %2141 = vadd.xlane.f32.xlu1 %v2140_v30 }
0x1aa0   :  { %v2107_v42 = vsel %vm1436_vm4, %v2085_v5, -inf }
0x1aa5   :  { %v7545_v31 = vpop.eup %7058 }
0x1aa6   :  { %v2149_v32 = vsel %vm1436_vm4, %v7545_v31, 0.0  ;;  %v7061_v36 = vpop.eup %7060 }
0x1aa7   :  { %2150 = vadd.xlane.f32.xlu0 %v2149_v32  ;;  %v2146_v38 = vsel %vm1436_vm4, %v7061_v36, 0.0 }
0x1ab0   :  { %2418 = vrot.lane.b32.xlu1 %v7436_v8, %s7184_s10 }
0x1abd   :  { %2494 = vrot.lane.b32.xlu0 %v7434_v59, %s7184_s10 }
0x1ad4   :  { %2147 = vadd.xlane.f32.xlu1 %v2146_v38 }
0x1adc   :  { %2105 = vmax.xlane.f32.xlu0 %v2104_v40 }
0x1ae5   :  { %2653 = vrot.lane.b32.xlu1 %v7436_v8, %s7185_s11 }
0x1ae9   :  { %2729 = vrot.lane.b32.xlu1 %v7434_v59, %s7185_s11 }
0x1b0d   :  { %2108 = vmax.xlane.f32.xlu1 %v2107_v42 }
0x1b1e   :  { %2888 = vrot.lane.b32.xlu1 %v7436_v8, %s7186_s12 }
0x1b2c   :  { %v2142_v45 = vpop.xlane.xlu1 %2141 }
0x1b2d   :  { %7062 = vrcp.f32 %v2142_v45 }
0x1b2e   :  { %7064 = vrcp.f32 %v2145_v46 }
0x1b30   :  { %v2419_v47 = vpop.permute.xlu1 %2418 }
0x1b31   :  { %6380 = vmatpush3.msra.mxu0 %v2419_v47 }
0x1b32   :  { %6394 = vmatprep.subr.mxu0 %v7162_v0 }
0x1b34   :  { %v2151_v48 = vpop.xlane.xlu0 %2150 }
0x1b36   :  { %v2251_v49 = vpop.f32.mrb[18].mxu1 }
0x1b37   :  { %v7063_v52 = vpop.eup %7062  ;;  %v6368_v53 = vpop.f32.mrb[19].mxu1  ;;  %6376 = vmatprep.mubr.msk.f32.mxu1 %vm1436_vm4, %v2251_v49 }
0x1b38   :  { %v2168_v54 = vmul.f32 %v7063_v52, %v7057_v29  ;;  %v7065_v55 = vpop.eup %7064  ;;  %v2495_v8 = vpop.permute.xlu0 %2494 }
0x1b39   :  { %v2169_v60 = vmul.f32 %v7065_v55, %v7536_v10 }
0x1b3a   :  { %v2327_v57 = vpop.f32.mrb[18].mxu0  ;;  %6382 = vmatmul.mubr.msk.f32.vlgmr.msra.gmra.mrb[20].mxu0 %vm1436_vm4, %v2168_v54 }
0x1b3b   :  { %v6373_v58 = vpop.f32.mrb[19].mxu0  ;;  %6377 = vmatmul.mubr.msk.f32.vlgmr.msra.gmra.mrb[20].mxu1 %vm1436_vm4, %v2327_v57  ;;  %6396 = vmatprep.mubr.msk.f32.mxu0 %vm7177_vm3, %v7162_v0 }
0x1b3c   :  { %6385 = vmatpush3.msra.mxu1 %v2495_v8  ;;  %6386 = vmatprep.mubr.msk.f32.mxu1 %vm7177_vm3, %v7162_v0 }
0x1b3d   :  { %6389 = vmatprep.subr.mxu1 %v2175_v16 }
0x1b3f   :  { %6387 = vmatmul.mubr.msk.f32.vlgmr.msra.gmra.mrb[22].mxu1 %vm1436_vm4, %v2169_v60 }
0x1b40   :  { %6390 = vmatpush3.msra.mxu1 %v2175_v16 }
0x1b41   :  { %6404 = vmatprep.subr.mxu1 %v2176_v22 }
0x1b61   :  { %v2148_v61 = vpop.xlane.xlu1 %2147 }
0x1b62   :  { %7066 = vrcp.f32 %v2148_v61 }
0x1b63   :  { %7068 = vrcp.f32 %v2151_v48 }
0x1b65   :  { %v2654_v11 = vpop.permute.xlu1 %2653 }
0x1b66   :  { %6395 = vmatpush3.msra.mxu0 %v2654_v11  ;;  %v3166_v11 = vld [vmem:[#allocation2 + $0xa0] sm:$0xff] }
0x1b67   :  { %6399 = vmatprep.subr.mxu0 %v7162_v0 }
0x1b69   :  { %v2106_v62 = vpop.xlane.xlu0 %2105  ;;  %v2730_v13 = vpop.permute.xlu1 %2729 }
0x1b6a   :  { %v2116_v63 = vsub.f32 %v2084_v39, %v2106_v62  ;;  %v3167_v62 = vld [vmem:[#allocation2 + $0xa8] sm:$0xff] }
0x1b6c   :  { %v7067_v1 = vpop.eup %7066  ;;  %v2130_v3 = vmul.f32 1.442695, %v2116_v63  ;;  %v6727_v63 = vpack.c.bf16 %v3167_v62, %v3166_v11 }
0x1b6d   :  { %v2170_v9 = vmul.f32 %v7067_v1, %v7061_v36  ;;  %v7069_v12 = vpop.eup %7068  ;;  %v2177_v36 = vld [vmem:[#allocation2 + $0x80] sm:$0xff]  ;;  %v3168_v1 = vld [vmem:[#allocation2 + $0xb0] sm:$0xff] }
0x1b6e   :  { %7070 = vpow2.f32 %v2130_v3  ;;  %v2171_v10 = vmul.f32 %v7069_v12, %v7545_v31  ;;  %v3169_v3 = vld [vmem:[#allocation2 + $0xb8] sm:$0xff]  ;;  %v3258_v12 = vld [vmem:[#allocation2 + $0xc8] sm:$0xff] }
0x1b6f   :  { %6397 = vmatmul.mubr.msk.f32.vlgmr.msra.gmra.mrb[22].mxu0 %vm1436_vm4, %v2170_v9  ;;  %v6731_v9 = vpack.c.bf16 %v3169_v3, %v3168_v1 }
0x1b70   :  { %6400 = vmatpush3.msra.mxu0 %v2730_v13  ;;  %6401 = vmatprep.mubr.msk.f32.mxu0 %vm7177_vm3, %v7162_v0  ;;  %v3259_v13 = vld [vmem:[#allocation2 + $0xd0] sm:$0xff] }
0x1b71   :  { %6409 = vmatprep.subr.mxu0 %v7162_v0 }
0x1b73   :  { %6402 = vmatmul.mubr.msk.f32.vlgmr.msra.gmra.mrb[24].mxu0 %vm1436_vm4, %v2171_v10  ;;  %v3260_v10 = vld [vmem:[#allocation2 + $0xd8] sm:$0xff] }
0x1b74   :  { %6411 = vmatprep.mubr.msk.f32.mxu0 %vm7177_vm3, %v7162_v0 }
0x1b78   :  { %v7071_v14 = vpop.eup %7070 }
0x1b79   :  { %v2152_v15 = vsel %vm1436_vm4, %v7071_v14, 0.0 }
0x1b7a   :  { %2153 = vadd.xlane.f32.xlu0 %v2152_v15  ;;  %v3261_v15 = vld [vmem:[#allocation2 + $0xe0] sm:$0xff] }
0x1b7b   :  { %v6739_v16 = vpack.c.bf16 %v3261_v15, %v3260_v10 }
0x1b9a   :  { %v2109_v17 = vpop.xlane.xlu1 %2108 }
0x1b9b   :  { %v2117_v18 = vsub.f32 %v2085_v5, %v2109_v17  ;;  %v3262_v17 = vld [vmem:[#allocation2 + $0xe8] sm:$0xff] }
0x1b9d   :  { %v2132_v19 = vmul.f32 1.442695, %v2117_v18  ;;  %v3263_v18 = vld [vmem:[#allocation2 + $0xf0] sm:$0xff] }
0x1b9e   :  { %v2889_v20 = vpop.permute.xlu1 %2888 }
0x1b9f   :  { %7072 = vpow2.f32 %v2132_v19  ;;  %6410 = vmatpush3.msra.mxu0 %v2889_v20  ;;  %v6743_v19 = vpack.c.bf16 %v3263_v18, %v3262_v17  ;;  %v3264_v20 = vld [vmem:[#allocation2 + $0xf8] sm:$0xff] }
0x1ba0   :  { %6728 = vmatprep.subr.bf16.mxu0 %v6727_v63 }
0x1ba9   :  { %v7073_v21 = vpop.eup %7072 }
0x1baa   :  { %v2155_v6 = vsel %vm1436_vm4, %v7073_v21, 0.0 }
0x1bab   :  { %2156 = vadd.xlane.f32.xlu0 %v2155_v6 }
0x1bc1   :  { %2964 = vrot.lane.b32.xlu0 %v7434_v59, %s7186_s12 }
0x1c07   :  { %v2154_v4 = vpop.xlane.xlu0 %2153 }
0x1c08   :  { %7074 = vrcp.f32 %v2154_v4  ;;  %v3267_v4 = vld [vmem:[#allocation2 + $0x110] sm:$0xff] }
0x1c0d   :  { %v2490_v23 = vpop.f32.mrb[20].mxu0 }
0x1c0e   :  { %v6383_v24 = vpop.f32.mrb[21].mxu0  ;;  %6391 = vmatprep.mubr.msk.f32.mxu1 %vm1436_vm4, %v2490_v23 }
0x1c0f   :  { %v3268_v24 = vld [vmem:[#allocation2 + $0x118] sm:$0xff] }
0x1c12   :  { %v7075_v25 = vpop.eup %7074  ;;  %v2566_v26 = vpop.f32.mrb[22].mxu1 }
0x1c13   :  { %v2172_v27 = vmul.f32 %v7075_v25, %v7071_v14  ;;  %v6388_v28 = vpop.f32.mrb[23].mxu1  ;;  %6392 = vmatmul.mubr.msk.f32.vlgmr.msra.gmra.mrb[20].mxu1 %vm1436_vm4, %v2566_v26  ;;  %v6735_v14 = vpack.c.bf16 %v3259_v13, %v3258_v12  ;;  %v3269_v25 = vld [vmem:[#allocation2 + $0x120] sm:$0xff] }
0x1c14   :  { %6405 = vmatpush3.msra.mxu1 %v2176_v22  ;;  %v3266_v22 = vld [vmem:[#allocation2 + $0x108] sm:$0xff]  ;;  %v6755_v26 = vpack.c.bf16 %v3269_v25, %v3268_v24  ;;  %v3271_v28 = vld [vmem:[#allocation2 + $0x130] sm:$0xff] }
0x1c15   :  { %6412 = vmatmul.mubr.msk.f32.vlgmr.msra.gmra.mrb[26].mxu0 %vm1436_vm4, %v2172_v27  ;;  %6414 = vmatprep.subr.mxu1 %v7162_v0  ;;  %v6751_v23 = vpack.c.bf16 %v3267_v4, %v3266_v22  ;;  %v3270_v27 = vld [vmem:[#allocation2 + $0x128] sm:$0xff]  ;;  %v3399_v22 = vld [vmem:[#allocation2 + $0x178] sm:$0xff] }
0x1c16   :  { %6730 = vmatpush3.bf16.msra.mxu0 %v6727_v63 }
0x1c17   :  { %6732 = vmatprep.subr.bf16.mxu0 %v6731_v9 }
0x1c1a   :  { %6734 = vmatpush3.bf16.msra.mxu0 %v6731_v9 }
0x1c38   :  { %v2157_v59 = vpop.xlane.xlu0 %2156 }
0x1c39   :  { %7076 = vrcp.f32 %v2157_v59  ;;  %v6759_v59 = vpack.c.bf16 %v3271_v28, %v3270_v27 }
0x1c3c   :  { %v2965_v33 = vpop.permute.xlu0 %2964 }
0x1c42   :  { %v2725_v29 = vpop.f32.mrb[22].mxu0 }
0x1c43   :  { %v6398_v30 = vpop.f32.mrb[23].mxu0  ;;  %6406 = vmatprep.mubr.msk.f32.mxu1 %vm1436_vm4, %v2725_v29  ;;  %v7077_v31 = vpop.eup %7076 }
0x1c44   :  { %v2173_v35 = vmul.f32 %v7077_v31, %v7073_v21  ;;  %v3265_v21 = vld [vmem:[#allocation2 + $0x100] sm:$0xff] }
0x1c45   :  { %v6747_v6 = vpack.c.bf16 %v3265_v21, %v3264_v20  ;;  %v3397_v20 = vld [vmem:[#allocation2 + $0x168] sm:$0xff] }
0x1c46   :  { %v2801_v32 = vpop.f32.mrb[24].mxu0 }
0x1c47   :  { %v6403_v34 = vpop.f32.mrb[25].mxu0  ;;  %6407 = vmatmul.mubr.msk.f32.vlgmr.msra.gmra.mrb[20].mxu1 %vm1436_vm4, %v2801_v32 }
0x1c48   :  { %6415 = vmatpush3.msra.mxu1 %v2965_v33  ;;  %6416 = vmatprep.mubr.msk.f32.mxu1 %vm7177_vm3, %v7162_v0 }
0x1c49   :  { %6419 = vmatprep.subr.mxu1 %v2177_v36 }
0x1c4b   :  { %6417 = vmatmul.mubr.msk.f32.vlgmr.msra.gmra.mrb[24].mxu1 %vm1436_vm4, %v2173_v35 }
0x1c4c   :  { %6420 = vmatpush3.msra.mxu1 %v2177_v36  ;;  %v5979_v36 = vld [vmem:[#allocation2 + $0x90] ss:$0 sm:$0xff] }
0x1c4d   :  { %6736 = vmatprep.subr.bf16.mxu1 %v6735_v14 }
0x1ce8   :  { %v2960_v37 = vpop.f32.mrb[26].mxu0 }
0x1ce9   :  { %v6413_v38 = vpop.f32.mrb[27].mxu0  ;;  %6421 = vmatprep.mubr.msk.f32.mxu1 %vm1436_vm4, %v2960_v37 }
0x1d1e   :  { %v3036_v39 = vpop.f32.mrb[24].mxu1 }
0x1d1f   :  { %v6418_v40 = vpop.f32.mrb[25].mxu1  ;;  %6422 = vmatmul.mubr.msk.f32.vlgmr.msra.gmra.mrb[20].mxu1 %vm1436_vm4, %v3036_v39 }
0x1d20   :  { %6738 = vmatpush3.bf16.msra.mxu1 %v6735_v14  ;;  %v5980_v40 = vld [vmem:[#allocation2 + $0x98] ss:$0 sm:$0xff] }
0x1d21   :  { %6740 = vmatprep.subr.bf16.mxu1 %v6739_v16 }
0x1d24   :  { %6742 = vmatpush3.bf16.msra.mxu1 %v6739_v16 }
0x1d25   :  { %6744 = vmatprep.subr.bf16.mxu1 %v6743_v19 }
0x1d28   :  { %6746 = vmatpush3.bf16.msra.mxu1 %v6743_v19  ;;  %v3396_v19 = vld [vmem:[#allocation2 + $0x160] sm:$0xff] }
0x1d29   :  { %6748 = vmatprep.subr.bf16.mxu1 %v6747_v6  ;;  %v6767_v21 = vpack.c.bf16 %v3397_v20, %v3396_v19 }
0x1d2b   :  { %6768 = vmatprep.subr.bf16.mxu0 %v6767_v21 }
0x1d2c   :  { %6750 = vmatpush3.bf16.msra.mxu1 %v6747_v6  ;;  %v3398_v6 = vld [vmem:[#allocation2 + $0x170] sm:$0xff] }
0x1d2d   :  { %6752 = vmatprep.subr.bf16.mxu1 %v6751_v23  ;;  %v6771_v4 = vpack.c.bf16 %v3399_v22, %v3398_v6 }
0x1d30   :  { %6754 = vmatpush3.bf16.msra.mxu1 %v6751_v23 }
0x1d31   :  { %6756 = vmatprep.subr.bf16.mxu1 %v6755_v26 }
0x1d34   :  { %6758 = vmatpush3.bf16.msra.mxu1 %v6755_v26 }
0x1d35   :  { %6760 = vmatprep.subr.bf16.mxu1 %v6759_v59 }
0x1d38   :  { %6762 = vmatpush3.bf16.msra.mxu1 %v6759_v59 }
0x1df2   :  { %v6423_v5 = vpop.f32.mrb[20].mxu1 }
0x1df3   :  { %v6850_v42 = vadd.f32 %v6423_v5, %v5966_v41  ;;  %v3112_v45 = vpop.f32.mrb[21].mxu1 }
0x1df4   :  { %v6851_v46 = vadd.f32 %v5966_v41, %v3112_v45 }
0x1df5   :  { %v3124_v47 = vadd.f32 %v6850_v42, %v7410_v44 }
0x1df6   :  { %v3123_v48 = vadd.f32 %v6851_v46, %v7408_v43  ;;  %v3272_v46 = vld [vmem:[#allocation2 + $0x138] sm:$0xff] }
0x1df7   :  { %v3130_v49 = vsel %vm1351_vm1, %v3124_v47, 0.0 }
0x1df8   :  { %3131 = vadd.xlane.f32.xlu0 %v3130_v49  ;;  %v3127_v52 = vsel %vm1351_vm1, %v3123_v48, 0.0  ;;  %v5981_v49 = vld [vmem:[#allocation2 + $0xc0] ss:$0 sm:$0xff] }
0x1df9   :  { %3128 = vadd.xlane.f32.xlu1 %v3127_v52 }
0x1e85   :  { %v3132_v53 = vpop.xlane.xlu0 %3131 }
0x1e86   :  { %v3135_v54 = vmul.f32 0.03125, %v3132_v53  ;;  %v3129_v55 = vpop.xlane.xlu1 %3128 }
0x1e87   :  { %v3134_v57 = vmul.f32 0.03125, %v3129_v55 }
0x1e88   :  { %v7603_v8 = vsub.f32 %v3124_v47, %v3135_v54  ;;  %v3273_v47 = vld [vmem:[#allocation2 + $0x140] sm:$0xff] }
0x1e89   :  { %v7605_v58 = vsub.f32 %v3123_v48, %v3134_v57  ;;  %v6763_v48 = vpack.c.bf16 %v3273_v47, %v3272_v46 }
0x1e8a   :  { %v3139_v60 = vmul.f32 %v7603_v8, %v7603_v8 }
0x1e8b   :  { %v3138_v43 = vmul.f32 %v7605_v58, %v7605_v58  ;;  %6764 = vmatprep.subr.bf16.mxu1 %v6763_v48 }
0x1e8c   :  { %v3143_v44 = vsel %vm1351_vm1, %v3139_v60, 0.0  ;;  %6766 = vmatpush3.bf16.msra.mxu1 %v6763_v48 }
0x1e8d   :  { %3144 = vadd.xlane.f32.xlu0 %v3143_v44  ;;  %v3140_v61 = vsel %vm1351_vm1, %v3138_v43, 0.0  ;;  %6511 = vmatprep.subr.mxu1 %v7162_v0 }
0x1e8e   :  { %3141 = vadd.xlane.f32.xlu1 %v3140_v61 }
0x1f1a   :  { %v3145_v29 = vpop.xlane.xlu0 %3144 }
0x1f1b   :  { %v3147_v30 = vmul.f32 0.03125, %v3145_v29  ;;  %v3142_v31 = vpop.xlane.xlu1 %3141  ;;  %v5985_v29 = vld [vmem:[#allocation2 + $0x150] ss:$0 sm:$0xff] }
0x1f1c   :  { %v3146_v32 = vmul.f32 0.03125, %v3142_v31 }
0x1f1d   :  { %v3149_v33 = vadd.f32 1e-05, %v3147_v30 }
0x1f1e   :  { %v3148_v34 = vadd.f32 1e-05, %v3146_v32 }
0x1f1f   :  { %7078 = vrsqrt.f32 %v3149_v33  ;;  %v5986_v33 = vld [vmem:[#allocation2 + $0x158] ss:$0 sm:$0xff] }
0x1f20   :  { %7080 = vrsqrt.f32 %v3148_v34 }
0x1f29   :  { %v7079_v35 = vpop.eup %7078 }
0x1f2a   :  { %v7081_v37 = vpop.eup %7080  ;;  %v3153_v38 = vmul.f32 %v7079_v35, %v7603_v8 }
0x1f2b   :  { %v3152_v39 = vmul.f32 %v7081_v37, %v7605_v58  ;;  %v5984_v58 = vld [vmem:[#allocation2 + $0x148] ss:$0 sm:$0xff] }
0x1f2c   :  { %v3159_v41 = vmul.f32 %v5979_v36, %v3153_v38  ;;  %v5987_v38 = vld [vmem:[#allocation2 + $0x180] ss:$0 sm:$0xff] }
0x1f2d   :  { %v3158_v5 = vmul.f32 %v5979_v36, %v3152_v39 }
0x1f2e   :  { %v3165_v45 = vadd.f32 %v5980_v40, %v3159_v41 }
0x1f2f   :  { %v3164_v42 = vadd.f32 %v5980_v40, %v3158_v5 }
0x1f31   :  { %6432 = vmatprep.mubr.msk.f32.mxu0 %vm1351_vm1, %v3164_v42 }
0x1f32   :  { %6433 = vmatmul.mubr.msk.f32.vlgmr.msra.gmra.mrb[28].mxu0 %vm1351_vm1, %v3165_v45 }
0x1f33   :  { %6770 = vmatpush3.bf16.msra.mxu0 %v6767_v21 }
0x1f34   :  { %6772 = vmatprep.subr.bf16.mxu0 %v6771_v4 }
0x1f37   :  { %6774 = vmatpush3.bf16.msra.mxu0 %v6771_v4 }
0x1f38   :  { %6481 = vmatprep.subr.mxu0 %v7162_v0 }
0x2005   :  { %v6434_v52 = vpop.f32.mrb[28].mxu0 }
0x2006   :  { %v3253_v53 = vadd.f32 %v6434_v52, %v5981_v49  ;;  %v3247_v54 = vpop.f32.mrb[29].mxu0 }
0x2007   :  { %v3248_v55 = vadd.f32 %v5981_v49, %v3247_v54 }
0x2008   :  { %v3257_v8 = vmax.f32 %v3253_v53, 0.0 }
0x2009   :  { %v3256_v57 = vmax.f32 %v3248_v55, 0.0 }
0x200b   :  { %6467 = vmatprep.mubr.f32.mxu1 %v3256_v57 }
0x200c   :  { %6468 = vmatmul.mubr.f32.vlgmr.msra.gmra.mrb[26].mxu1 %v3257_v8 }
0x200d   :  { %6513 = vmatprep.mubr.msk.f32.mxu1 %vm7177_vm3, %v7162_v0 }
0x20df   :  { %v6469_v60 = vpop.f32.mrb[26].mxu1 }
0x20e0   :  { %v3351_v43 = vadd.f32 %v6469_v60, %v5984_v58  ;;  %v3345_v44 = vpop.f32.mrb[27].mxu1 }
0x20e1   :  { %v3346_v61 = vadd.f32 %v5984_v58, %v3345_v44 }
0x20e2   :  { %v3355_v11 = vadd.f32 %v3351_v43, %v3165_v45 }
0x20e3   :  { %v3354_v62 = vadd.f32 %v3346_v61, %v3164_v42 }
0x20e4   :  { %v3361_v63 = vsel %vm1351_vm1, %v3355_v11, 0.0 }
0x20e5   :  { %3362 = vadd.xlane.f32.xlu0 %v3361_v63  ;;  %v3358_v1 = vsel %vm1351_vm1, %v3354_v62, 0.0 }
0x20e6   :  { %3359 = vadd.xlane.f32.xlu1 %v3358_v1 }
0x2172   :  { %v3363_v3 = vpop.xlane.xlu0 %3362 }
0x2173   :  { %v3365_v9 = vmul.f32 0.03125, %v3363_v3  ;;  %v3360_v12 = vpop.xlane.xlu1 %3359 }
0x2174   :  { %v3364_v13 = vmul.f32 0.03125, %v3360_v12 }
0x2175   :  { %v3367_v10 = vsub.f32 %v3355_v11, %v3365_v9 }
0x2176   :  { %v3366_v14 = vsub.f32 %v3354_v62, %v3364_v13 }
0x2177   :  { %v3369_v15 = vmul.f32 %v3367_v10, %v3367_v10 }
0x2178   :  { %v3368_v16 = vmul.f32 %v3366_v14, %v3366_v14 }
0x2179   :  { %v3373_v17 = vsel %vm1351_vm1, %v3369_v15, 0.0 }
0x217a   :  { %3374 = vadd.xlane.f32.xlu0 %v3373_v17  ;;  %v3370_v18 = vsel %vm1351_vm1, %v3368_v16, 0.0 }
0x217b   :  { %3371 = vadd.xlane.f32.xlu1 %v3370_v18 }
0x2207   :  { %v3375_v23 = vpop.xlane.xlu0 %3374 }
0x2208   :  { %v3377_v24 = vmul.f32 0.03125, %v3375_v23  ;;  %v3372_v25 = vpop.xlane.xlu1 %3371 }
0x2209   :  { %v3376_v26 = vmul.f32 0.03125, %v3372_v25 }
0x220a   :  { %v3379_v27 = vadd.f32 1e-05, %v3377_v24 }
0x220b   :  { %v3378_v28 = vadd.f32 1e-05, %v3376_v26 }
0x220c   :  { %7082 = vrsqrt.f32 %v3379_v27 }
0x220d   :  { %7084 = vrsqrt.f32 %v3378_v28 }
0x2216   :  { %v7083_v59 = vpop.eup %7082 }
0x2217   :  { %v7085_v30 = vpop.eup %7084  ;;  %v3383_v31 = vmul.f32 %v7083_v59, %v3367_v10 }
0x2218   :  { %v3382_v32 = vmul.f32 %v7085_v30, %v3366_v14 }
0x2219   :  { %v3389_v34 = vmul.f32 %v5985_v29, %v3383_v31 }
0x221a   :  { %v3388_v35 = vmul.f32 %v5985_v29, %v3382_v32 }
0x221b   :  { %v7627_v37 = vadd.f32 %v5986_v33, %v3389_v34 }
0x221c   :  { %v7625_v36 = vadd.f32 %v5986_v33, %v3388_v35 }
0x221e   :  { %6478 = vmatprep.mubr.msk.f32.mxu0 %vm1351_vm1, %v7625_v36 }
0x221f   :  { %6479 = vmatmul.mubr.msk.f32.vlgmr.msra.gmra.mrb[30].mxu0 %vm1351_vm1, %v7627_v37 }
0x2220   :  { %6483 = vmatprep.mubr.msk.f32.mxu0 %vm7177_vm3, %v7162_v0 }
0x22f2   :  { %v6480_v39 = vpop.f32.mrb[30].mxu0 }
0x22f3   :  { %v7635_v40 = vadd.f32 %v6480_v39, %v5987_v38  ;;  %v3477_v41 = vpop.f32.mrb[31].mxu0 }
0x22f4   :  { %v7637_v5 = vadd.f32 %v5987_v38, %v3477_v41 }
0x22f5   :  { %3564 = vrot.lane.b32.xlu0 %v7635_v40, %s7164_s26 }
0x22f6   :  { %3487 = vrot.lane.b32.xlu1 %v7637_v5, %s7164_s26 }
0x22f9   :  { %3724 = vrot.lane.b32.xlu0 %v7635_v40, %s7179_s5 }
0x22fa   :  { %3646 = vrot.lane.b32.xlu1 %v7637_v5, %s7179_s5 }
0x22fd   :  { %3806 = vrot.lane.b32.xlu0 %v7637_v5, %s7168_s29 }
0x22fe   :  { %3644 = vrot.lane.b32.xlu1 %v7637_v5, %s7180_s6 }
0x2301   :  { %3884 = vrot.lane.b32.xlu0 %v7635_v40, %s7168_s29 }
0x2302   :  { %3722 = vrot.lane.b32.xlu1 %v7635_v40, %s7180_s6 }
0x2306   :  { %3804 = vrot.lane.b32.xlu1 %v7637_v5, %s7178_s4 }
0x230a   :  { %3882 = vrot.lane.b32.xlu1 %v7635_v40, %s7178_s4 }
0x2367   :  { %v3565_v45 = vpop.permute.xlu0 %3564 }
0x2368   :  { %v3488_v42 = vpop.permute.xlu1 %3487 }
0x2369   :  { %6482 = vmatpush3.xpose.msk.msra.mxu0 %vm1436_vm4, %v3488_v42 }
0x236a   :  { %6486 = vmatprep.subr.mxu0 %v7162_v0 }
0x236b   :  { %v3725_v47 = vpop.permute.xlu0 %3724 }
0x236c   :  { %6484 = vmatmul.mubr.msk.f32.vlgmr.msra.gmra.mrb[32].mxu0 %vm1436_vm4, %v7637_v5  ;;  %v3647_v46 = vpop.permute.xlu1 %3646 }
0x236d   :  { %6487 = vmatpush3.xpose.msk.msra.mxu0 %vm1436_vm4, %v3565_v45  ;;  %6488 = vmatprep.mubr.msk.f32.mxu0 %vm7177_vm3, %v7162_v0 }
0x236e   :  { %6491 = vmatprep.subr.mxu0 %v7162_v0 }
0x236f   :  { %v3807_v52 = vpop.permute.xlu0 %3806 }
0x2370   :  { %6489 = vmatmul.mubr.msk.f32.vlgmr.msra.gmra.mrb[34].mxu0 %vm1436_vm4, %v7635_v40  ;;  %v3645_v48 = vpop.permute.xlu1 %3644 }
0x2371   :  { %6492 = vmatpush3.xpose.msk.msra.mxu0 %vm1436_vm4, %v3647_v46  ;;  %6493 = vmatprep.mubr.msk.f32.mxu0 %vm7177_vm3, %v7162_v0 }
0x2372   :  { %6496 = vmatprep.subr.mxu0 %v7162_v0 }
0x2373   :  { %v3885_v54 = vpop.permute.xlu0 %3884 }
0x2374   :  { %6494 = vmatmul.mubr.msk.f32.vlgmr.msra.gmra.mrb[36].mxu0 %vm1436_vm4, %v3645_v48  ;;  %v3723_v49 = vpop.permute.xlu1 %3722 }
0x2375   :  { %6497 = vmatpush3.xpose.msk.msra.mxu0 %vm1436_vm4, %v3725_v47  ;;  %6498 = vmatprep.mubr.msk.f32.mxu0 %vm7177_vm3, %v7162_v0 }
0x2376   :  { %6501 = vmatprep.subr.mxu0 %v7162_v0 }
0x2378   :  { %6499 = vmatmul.mubr.msk.f32.vlgmr.msra.gmra.mrb[38].mxu0 %vm1436_vm4, %v3723_v49  ;;  %v3805_v53 = vpop.permute.xlu1 %3804 }
0x2379   :  { %6502 = vmatpush3.xpose.msk.msra.mxu0 %vm1436_vm4, %v3807_v52  ;;  %6503 = vmatprep.mubr.msk.f32.mxu0 %vm7177_vm3, %v7162_v0 }
0x237a   :  { %6506 = vmatprep.subr.mxu0 %v7162_v0 }
0x237c   :  { %6504 = vmatmul.mubr.msk.f32.vlgmr.msra.gmra.mrb[40].mxu0 %vm1436_vm4, %v3805_v53  ;;  %v3883_v55 = vpop.permute.xlu1 %3882 }
0x237d   :  { %6507 = vmatpush3.xpose.msk.msra.mxu0 %vm1436_vm4, %v3885_v54  ;;  %6508 = vmatprep.mubr.msk.f32.mxu0 %vm7177_vm3, %v7162_v0 }
0x237e   :  { %6516 = vmatprep.subr.mxu0 %v7162_v0 }
0x2380   :  { %6509 = vmatmul.mubr.msk.f32.vlgmr.msra.gmra.mrb[42].mxu0 %vm1436_vm4, %v3883_v55 }
0x2381   :  { %6518 = vmatprep.mubr.msk.f32.mxu0 %vm7177_vm3, %v7162_v0 }
0x243f   :  { %v3559_v57 = vpop.f32.mrb[32].mxu0 }
0x2440   :  { %v3640_v8 = vmul.f32 0.35355338, %v3559_v57  ;;  %v6485_v58 = vpop.f32.mrb[33].mxu0 }
0x2442   :  { %v3642_v60 = vadd.f32 %v3640_v8, %v7465_v2 }
0x2443   :  { %v3636_v43 = vpop.f32.mrb[34].mxu0 }
0x2444   :  { %v3641_v44 = vmul.f32 0.35355338, %v3636_v43  ;;  %v6490_v61 = vpop.f32.mrb[35].mxu0  ;;  %v4124_v11 = vsel %vm1436_vm4, %v3642_v60, -inf }
0x2445   :  { %4125 = vmax.xlane.f32.xlu0 %v4124_v11 }
0x2446   :  { %v3643_v62 = vadd.f32 %v3641_v44, %v7473_v7 }
0x2447   :  { %v3718_v63 = vpop.f32.mrb[36].mxu0 }
0x2448   :  { %v6495_v1 = vpop.f32.mrb[37].mxu0  ;;  %v4127_v3 = vsel %vm1436_vm4, %v3643_v62, -inf  ;;  %v3800_v31 = vmul.f32 0.35355338, %v3718_v63 }
0x2449   :  { %4128 = vmax.xlane.f32.xlu1 %v4127_v3 }
0x244a   :  { %v3802_v32 = vadd.f32 %v3800_v31, %v7465_v2 }
0x244b   :  { %v3796_v9 = vpop.f32.mrb[38].mxu0 }
0x244c   :  { %v6500_v12 = vpop.f32.mrb[39].mxu0  ;;  %v3801_v16 = vmul.f32 0.35355338, %v3796_v9  ;;  %v4130_v42 = vsel %vm1436_vm4, %v3802_v32, -inf }
0x244e   :  { %v3803_v17 = vadd.f32 %v3801_v16, %v7473_v7 }
0x244f   :  { %v3878_v13 = vpop.f32.mrb[40].mxu0 }
0x2450   :  { %v6505_v10 = vpop.f32.mrb[41].mxu0  ;;  %v4133_v18 = vsel %vm1436_vm4, %v3803_v17, -inf  ;;  %v3960_v33 = vmul.f32 0.35355338, %v3878_v13 }
0x2452   :  { %v3962_v39 = vadd.f32 %v3960_v33, %v7465_v2 }
0x2453   :  { %v3956_v14 = vpop.f32.mrb[42].mxu0 }
0x2454   :  { %v6510_v15 = vpop.f32.mrb[43].mxu0  ;;  %v3961_v41 = vmul.f32 0.35355338, %v3956_v14  ;;  %v4136_v46 = vsel %vm1436_vm4, %v3962_v39, -inf }
0x2456   :  { %v3963_v45 = vadd.f32 %v3961_v41, %v7473_v7 }
0x2458   :  { %v4139_v47 = vsel %vm1436_vm4, %v3963_v45, -inf }
0x245a   :  { %3966 = vrot.lane.b32.xlu1 %v7637_v5, %s7181_s7 }
0x245b   :  { %4044 = vrot.lane.b32.xlu0 %v7635_v40, %s7181_s7 }
0x245e   :  { %3964 = vrot.lane.b32.xlu1 %v7637_v5, %s7182_s8 }
0x2462   :  { %4042 = vrot.lane.b32.xlu1 %v7635_v40, %s7182_s8 }
0x2466   :  { %4293 = vrot.lane.b32.xlu1 %v7635_v40, %s7183_s9 }
0x248a   :  { %4134 = vmax.xlane.f32.xlu1 %v4133_v18 }
0x249b   :  { %4456 = vrot.lane.b32.xlu1 %v7637_v5, %s7184_s10 }
0x24d2   :  { %v4126_v19 = vpop.xlane.xlu0 %4125 }
0x24d3   :  { %v4148_v20 = vsub.f32 %v3642_v60, %v4126_v19 }
0x24d5   :  { %v4156_v21 = vmul.f32 1.442695, %v4148_v20 }
0x24d6   :  { %v4045_v6 = vpop.permute.xlu0 %4044  ;;  %v4129_v22 = vpop.xlane.xlu1 %4128 }
0x24d7   :  { %7086 = vpow2.f32 %v4156_v21  ;;  %v4149_v4 = vsub.f32 %v3643_v62, %v4129_v22  ;;  %6517 = vmatpush3.xpose.msk.msra.mxu0 %vm1436_vm4, %v4045_v6  ;;  %v4212_v21 = vld [vmem:[#allocation2 + $0x188] sm:$0xff] }
0x24d8   :  { %6526 = vmatprep.subr.mxu0 %v7162_v0 }
0x24d9   :  { %v4158_v23 = vmul.f32 1.442695, %v4149_v4 }
0x24da   :  { %v3967_v24 = vpop.permute.xlu1 %3966 }
0x24db   :  { %7088 = vpow2.f32 %v4158_v23  ;;  %6512 = vmatpush3.xpose.msk.msra.mxu1 %vm1436_vm4, %v3967_v24 }
0x24dc   :  { %6521 = vmatprep.subr.mxu1 %v7162_v0 }
0x24de   :  { %v3965_v25 = vpop.permute.xlu1 %3964 }
0x24df   :  { %6514 = vmatmul.mubr.msk.f32.vlgmr.msra.gmra.mrb[28].mxu1 %vm1436_vm4, %v3965_v25 }
0x24e0   :  { %6523 = vmatprep.mubr.msk.f32.mxu1 %vm7177_vm3, %v7162_v0 }
0x24e1   :  { %v7087_v26 = vpop.eup %7086 }
0x24e2   :  { %v4043_v27 = vpop.permute.xlu1 %4042  ;;  %v4172_v28 = vsel %vm1436_vm4, %v7087_v26, 0.0 }
0x24e3   :  { %4173 = vadd.xlane.f32.xlu0 %v4172_v28  ;;  %6519 = vmatmul.mubr.msk.f32.vlgmr.msra.gmra.mrb[44].mxu0 %vm1436_vm4, %v4043_v27 }
0x24e4   :  { %6528 = vmatprep.mubr.msk.f32.mxu0 %vm7177_vm3, %v7162_v0 }
0x24e5   :  { %v7089_v59 = vpop.eup %7088 }
0x24e6   :  { %v4294_v29 = vpop.permute.xlu1 %4293  ;;  %v4175_v30 = vsel %vm1436_vm4, %v7089_v59, 0.0 }
0x24e7   :  { %4176 = vadd.xlane.f32.xlu0 %v4175_v30  ;;  %6527 = vmatpush3.msra.mxu0 %v4294_v29 }
0x24e8   :  { %6536 = vmatprep.subr.mxu0 %v7162_v0 }
0x24fd   :  { %4217 = vrot.lane.b32.xlu0 %v7637_v5, %s7183_s9 }
0x2517   :  { %v4135_v34 = vpop.xlane.xlu1 %4134 }
0x2518   :  { %v4151_v35 = vsub.f32 %v3803_v17, %v4135_v34 }
0x251a   :  { %v4162_v38 = vmul.f32 1.442695, %v4151_v35 }
0x251b   :  { %v4457_v60 = vpop.permute.xlu1 %4456 }
0x251c   :  { %7090 = vpow2.f32 %v4162_v38  ;;  %4131 = vmax.xlane.f32.xlu0 %v4130_v42 }
0x2520   :  { %4137 = vmax.xlane.f32.xlu0 %v4136_v46 }
0x2524   :  { %4140 = vmax.xlane.f32.xlu0 %v4139_v47 }
0x2526   :  { %v7730_v48 = vpop.eup %7090 }
0x2527   :  { %v4181_v49 = vsel %vm1436_vm4, %v7730_v48, 0.0 }
0x2528   :  { %4182 = vadd.xlane.f32.xlu0 %v4181_v49 }
0x2570   :  { %v4174_v52 = vpop.xlane.xlu0 %4173 }
0x2571   :  { %7092 = vrcp.f32 %v4174_v52 }
0x2574   :  { %v4177_v53 = vpop.xlane.xlu0 %4176 }
0x2575   :  { %7094 = vrcp.f32 %v4177_v53 }
0x2578   :  { %v4218_v54 = vpop.permute.xlu0 %4217 }
0x2579   :  { %6522 = vmatpush3.msra.mxu1 %v4218_v54 }
0x257a   :  { %6531 = vmatprep.subr.mxu1 %v4212_v21 }
0x257b   :  { %v7093_v55 = vpop.eup %7092 }
0x257c   :  { %v4204_v57 = vmul.f32 %v7093_v55, %v7087_v26 }
0x257e   :  { %6524 = vmatmul.mubr.msk.f32.vlgmr.msra.gmra.mrb[30].mxu1 %vm1436_vm4, %v4204_v57 }
0x257f   :  { %v7095_v8 = vpop.eup %7094  ;;  %6532 = vmatpush3.msra.mxu1 %v4212_v21 }
0x2580   :  { %v4205_v58 = vmul.f32 %v7095_v8, %v7089_v59  ;;  %6541 = vmatprep.subr.mxu1 %v7162_v0 }
0x2582   :  { %6529 = vmatmul.mubr.msk.f32.vlgmr.msra.gmra.mrb[46].mxu0 %vm1436_vm4, %v4205_v58 }
0x2583   :  { %6537 = vmatpush3.msra.mxu0 %v4457_v60  ;;  %6538 = vmatprep.mubr.msk.f32.mxu0 %vm7177_vm3, %v7162_v0  ;;  %v4213_v60 = vld [vmem:[#allocation2 + $0x190] sm:$0xff] }
0x2584   :  { %6551 = vmatprep.subr.mxu0 %v7162_v0 }
0x25a9   :  { %v4132_v43 = vpop.xlane.xlu0 %4131 }
0x25aa   :  { %v4150_v44 = vsub.f32 %v3802_v32, %v4132_v43  ;;  %v4214_v43 = vld [vmem:[#allocation2 + $0x198] sm:$0xff] }
0x25ac   :  { %v4160_v61 = vmul.f32 1.442695, %v4150_v44 }
0x25ad   :  { %v4138_v11 = vpop.xlane.xlu0 %4137 }
0x25ae   :  { %7096 = vpow2.f32 %v4160_v61  ;;  %v4152_v62 = vsub.f32 %v3962_v39, %v4138_v11 }
0x25b0   :  { %v4164_v63 = vmul.f32 1.442695, %v4152_v62 }
0x25b1   :  { %v4141_v1 = vpop.xlane.xlu0 %4140 }
0x25b2   :  { %7098 = vpow2.f32 %v4164_v63  ;;  %v4153_v3 = vsub.f32 %v3963_v45, %v4141_v1  ;;  %v4038_v9 = vpop.f32.mrb[28].mxu1 }
0x25b3   :  { %v6515_v12 = vpop.f32.mrb[29].mxu1  ;;  %v4120_v6 = vmul.f32 0.35355338, %v4038_v9 }
0x25b4   :  { %v4166_v13 = vmul.f32 1.442695, %v4153_v3 }
0x25b5   :  { %v4122_v4 = vadd.f32 %v4120_v6, %v7465_v2  ;;  %v4183_v27 = vpop.xlane.xlu0 %4182  ;;  %v6010_v6 = vld [vmem:[#allocation2 + $0x1a8] ss:$0 sm:$0xff] }
0x25b6   :  { %7100 = vpow2.f32 %v4166_v13  ;;  %v4116_v10 = vpop.f32.mrb[44].mxu0 }
0x25b7   :  { %v6520_v14 = vpop.f32.mrb[45].mxu0  ;;  %v4121_v22 = vmul.f32 0.35355338, %v4116_v10  ;;  %v4142_v25 = vsel %vm1436_vm4, %v4122_v4, -inf }
0x25b8   :  { %v7097_v15 = vpop.eup %7096 }
0x25b9   :  { %v4178_v16 = vsel %vm1436_vm4, %v7097_v15, 0.0  ;;  %v4123_v23 = vadd.f32 %v4121_v22, %v7473_v7 }
0x25ba   :  { %4179 = vadd.xlane.f32.xlu1 %v4178_v16 }
0x25bb   :  { %v4145_v24 = vsel %vm1436_vm4, %v4123_v23, -inf }
0x25bc   :  { %v7099_v17 = vpop.eup %7098 }
0x25bd   :  { %v4184_v18 = vsel %vm1436_vm4, %v7099_v17, 0.0 }
0x25be   :  { %4185 = vadd.xlane.f32.xlu1 %v4184_v18 }
0x25c0   :  { %v7101_v19 = vpop.eup %7100 }
0x25c1   :  { %v4187_v20 = vsel %vm1436_vm4, %v7101_v19, 0.0 }
0x25c2   :  { %4188 = vadd.xlane.f32.xlu0 %v4187_v20 }
0x25cf   :  { %4691 = vrot.lane.b32.xlu1 %v7637_v5, %s7185_s11 }
0x25d3   :  { %4767 = vrot.lane.b32.xlu1 %v7635_v40, %s7185_s11 }
0x25d8   :  { %4532 = vrot.lane.b32.xlu0 %v7635_v40, %s7184_s10 }
0x25f7   :  { %4146 = vmax.xlane.f32.xlu1 %v4145_v24  ;;  %4143 = vmax.xlane.f32.xlu0 %v4142_v25 }
0x2608   :  { %4926 = vrot.lane.b32.xlu1 %v7637_v5, %s7186_s12 }
0x2647   :  { %v4180_v26 = vpop.xlane.xlu1 %4179 }
0x2648   :  { %7102 = vrcp.f32 %v4180_v26 }
0x2649   :  { %7104 = vrcp.f32 %v4183_v27 }
0x264b   :  { %v4186_v28 = vpop.xlane.xlu1 %4185 }
0x264c   :  { %7106 = vrcp.f32 %v4186_v28 }
0x264f   :  { %v4189_v59 = vpop.xlane.xlu0 %4188  ;;  %v4692_v31 = vpop.permute.xlu1 %4691 }
0x2650   :  { %7108 = vrcp.f32 %v4189_v59 }
0x2651   :  { %v4289_v2 = vpop.f32.mrb[30].mxu1 }
0x2652   :  { %v7103_v29 = vpop.eup %7102  ;;  %v6525_v7 = vpop.f32.mrb[31].mxu1  ;;  %6533 = vmatprep.mubr.msk.f32.mxu1 %vm1436_vm4, %v4289_v2 }
0x2653   :  { %v4206_v30 = vmul.f32 %v7103_v29, %v7097_v15  ;;  %v7105_v32 = vpop.eup %7104  ;;  %v4533_v34 = vpop.permute.xlu0 %4532 }
0x2654   :  { %v4207_v39 = vmul.f32 %v7105_v32, %v7730_v48  ;;  %v4768_v41 = vpop.permute.xlu1 %4767 }
0x2655   :  { %v4365_v33 = vpop.f32.mrb[46].mxu0  ;;  %6539 = vmatmul.mubr.msk.f32.vlgmr.msra.gmra.mrb[48].mxu0 %vm1436_vm4, %v4206_v30 }
0x2656   :  { %v7107_v5 = vpop.eup %7106  ;;  %6552 = vmatpush3.msra.mxu0 %v4692_v31  ;;  %v6530_v35 = vpop.f32.mrb[47].mxu0  ;;  %6534 = vmatmul.mubr.msk.f32.vlgmr.msra.gmra.mrb[32].mxu1 %vm1436_vm4, %v4365_v33 }
0x2657   :  { %v4208_v38 = vmul.f32 %v7107_v5, %v7099_v17  ;;  %6542 = vmatpush3.msra.mxu1 %v4533_v34  ;;  %6553 = vmatprep.mubr.msk.f32.mxu0 %vm7177_vm3, %v7162_v0  ;;  %v4215_v17 = vld [vmem:[#allocation2 + $0x1a0] sm:$0xff]  ;;  %v5204_v34 = vld [vmem:[#allocation2 + $0x1c8] sm:$0xff] }
0x2658   :  { %6556 = vmatprep.subr.mxu0 %v7162_v0  ;;  %6543 = vmatprep.mubr.msk.f32.mxu1 %vm7177_vm3, %v7162_v0  ;;  %v5203_v5 = vld [vmem:[#allocation2 + $0x1c0] sm:$0xff] }
0x2659   :  { %6554 = vmatmul.mubr.msk.f32.vlgmr.msra.gmra.mrb[50].mxu0 %vm1436_vm4, %v4208_v38  ;;  %6546 = vmatprep.subr.mxu1 %v4213_v60  ;;  %v6775_v35 = vpack.c.bf16 %v5204_v34, %v5203_v5  ;;  %v5205_v38 = vld [vmem:[#allocation2 + $0x1d0] sm:$0xff] }
0x265a   :  { %v7109_v42 = vpop.eup %7108  ;;  %6557 = vmatpush3.msra.mxu0 %v4768_v41  ;;  %6544 = vmatmul.mubr.msk.f32.vlgmr.msra.gmra.mrb[34].mxu1 %vm1436_vm4, %v4207_v39  ;;  %v5206_v39 = vld [vmem:[#allocation2 + $0x1d8] sm:$0xff] }
0x265b   :  { %v4209_v45 = vmul.f32 %v7109_v42, %v7101_v19  ;;  %6558 = vmatprep.mubr.msk.f32.mxu0 %vm7177_vm3, %v7162_v0  ;;  %6566 = vmatprep.subr.mxu0 %v7162_v0  ;;  %v6779_v41 = vpack.c.bf16 %v5206_v39, %v5205_v38  ;;  %v5295_v42 = vld [vmem:[#allocation2 + $0x1e8] sm:$0xff] }
0x265c   :  { %6547 = vmatpush3.msra.mxu1 %v4213_v60  ;;  %v5304_v60 = vld [vmem:[#allocation2 + $0x230] sm:$0xff] }
0x265d   :  { %6559 = vmatmul.mubr.msk.f32.vlgmr.msra.gmra.mrb[52].mxu0 %vm1436_vm4, %v4209_v45  ;;  %6561 = vmatprep.subr.mxu1 %v4214_v43  ;;  %v5296_v45 = vld [vmem:[#allocation2 + $0x1f0] sm:$0xff] }
0x265e   :  { %6568 = vmatprep.mubr.msk.f32.mxu0 %vm7177_vm3, %v7162_v0 }
0x2684   :  { %v4144_v46 = vpop.xlane.xlu0 %4143  ;;  %v4147_v47 = vpop.xlane.xlu1 %4146 }
0x2685   :  { %v4154_v48 = vsub.f32 %v4122_v4, %v4144_v46  ;;  %v4155_v49 = vsub.f32 %v4123_v23, %v4147_v47  ;;  %v5297_v46 = vld [vmem:[#allocation2 + $0x1f8] sm:$0xff]  ;;  %v6783_v47 = vpack.c.bf16 %v5296_v45, %v5295_v42 }
0x2687   :  { %v4168_v52 = vmul.f32 1.442695, %v4154_v48  ;;  %v4170_v53 = vmul.f32 1.442695, %v4155_v49  ;;  %v5298_v48 = vld [vmem:[#allocation2 + $0x200] sm:$0xff] }
0x2688   :  { %v4927_v54 = vpop.permute.xlu1 %4926  ;;  %v6787_v49 = vpack.c.bf16 %v5298_v48, %v5297_v46 }
0x2689   :  { %7110 = vpow2.f32 %v4168_v52  ;;  %6567 = vmatpush3.msra.mxu0 %v4927_v54  ;;  %v5299_v52 = vld [vmem:[#allocation2 + $0x208] sm:$0xff] }
0x268a   :  { %7112 = vpow2.f32 %v4170_v53  ;;  %6776 = vmatprep.subr.bf16.mxu0 %v6775_v35  ;;  %v5300_v53 = vld [vmem:[#allocation2 + $0x210] sm:$0xff] }
0x268b   :  { %v6791_v54 = vpack.c.bf16 %v5300_v53, %v5299_v52 }
0x2693   :  { %v7111_v55 = vpop.eup %7110 }
0x2694   :  { %v4190_v57 = vsel %vm1436_vm4, %v7111_v55, 0.0  ;;  %v7113_v8 = vpop.eup %7112 }
0x2695   :  { %4191 = vadd.xlane.f32.xlu0 %v4190_v57  ;;  %v4193_v58 = vsel %vm1436_vm4, %v7113_v8, 0.0  ;;  %v5302_v57 = vld [vmem:[#allocation2 + $0x220] sm:$0xff] }
0x2699   :  { %4194 = vadd.xlane.f32.xlu0 %v4193_v58  ;;  %v5303_v58 = vld [vmem:[#allocation2 + $0x228] sm:$0xff] }
0x26af   :  { %5002 = vrot.lane.b32.xlu0 %v7635_v40, %s7186_s12 }
0x2722   :  { %v4192_v44 = vpop.xlane.xlu0 %4191 }
0x2723   :  { %7114 = vrcp.f32 %v4192_v44  ;;  %v5305_v44 = vld [vmem:[#allocation2 + $0x238] sm:$0xff] }
0x2726   :  { %v4195_v61 = vpop.xlane.xlu0 %4194 }
0x2727   :  { %7116 = vrcp.f32 %v4195_v61  ;;  %v5306_v61 = vld [vmem:[#allocation2 + $0x240] sm:$0xff] }
0x2728   :  { %v4528_v11 = vpop.f32.mrb[48].mxu0 }
0x2729   :  { %v6540_v62 = vpop.f32.mrb[49].mxu0  ;;  %6548 = vmatprep.mubr.msk.f32.mxu1 %vm1436_vm4, %v4528_v11  ;;  %v6803_v11 = vpack.c.bf16 %v5306_v61, %v5305_v44  ;;  %v7187_v44 = vmov 0.0|0.0   ;;  %v5484_v61 = vld [vmem:[#allocation2 + $0x290] sm:$0xff] }
0x272a   :  { %v5003_v15 = vpop.permute.xlu0 %5002  ;;  %v5307_v62 = vld [vmem:[#allocation2 + $0x248] sm:$0xff] }
0x272c   :  { %v4763_v63 = vpop.f32.mrb[50].mxu0 }
0x272d   :  { %v7115_v1 = vpop.eup %7114  ;;  %v4604_v3 = vpop.f32.mrb[34].mxu1 }
0x272e   :  { %v6555_v9 = vpop.f32.mrb[51].mxu0  ;;  %v4210_v12 = vmul.f32 %v7115_v1, %v7111_v55  ;;  %v6545_v13 = vpop.f32.mrb[35].mxu1  ;;  %6549 = vmatmul.mubr.msk.f32.vlgmr.msra.gmra.mrb[32].mxu1 %vm1436_vm4, %v4604_v3  ;;  %v5301_v55 = vld [vmem:[#allocation2 + $0x218] sm:$0xff] }
0x272f   :  { %6562 = vmatpush3.msra.mxu1 %v4214_v43  ;;  %6563 = vmatprep.mubr.msk.f32.mxu1 %vm1436_vm4, %v4763_v63  ;;  %v6799_v43 = vpack.c.bf16 %v5304_v60, %v5303_v58  ;;  %v5308_v63 = vld [vmem:[#allocation2 + $0x250] sm:$0xff]  ;;  %v5482_v58 = vld [vmem:[#allocation2 + $0x280] sm:$0xff]  ;;  %v5483_v60 = vld [vmem:[#allocation2 + $0x288] sm:$0xff] }
0x2730   :  { %v4839_v40 = vpop.f32.mrb[52].mxu0  ;;  %6569 = vmatmul.mubr.msk.f32.vlgmr.msra.gmra.mrb[54].mxu0 %vm1436_vm4, %v4210_v12  ;;  %6571 = vmatprep.subr.mxu1 %v7162_v0  ;;  %v6807_v1 = vpack.c.bf16 %v5308_v63, %v5307_v62 }
0x2731   :  { %v6560_v10 = vpop.f32.mrb[53].mxu0  ;;  %v7117_v14 = vpop.eup %7116  ;;  %6778 = vmatpush3.bf16.msra.mxu0 %v6775_v35  ;;  %v7134_v35 = vld [vmem:[%s7858_s0] sm:$0x3] }
0x2732   :  { %v4211_v16 = vmul.f32 %v7117_v14, %v7113_v8  ;;  %6780 = vmatprep.subr.bf16.mxu0 %v6779_v41  ;;  %v6795_v8 = vpack.c.bf16 %v5302_v57, %v5301_v55  ;;  %v5436_v38 = vrot.slane %v7134_v35, %v7432_v56  ;;  %v5443_v57 = vsub.s32 1, %v7419_v50 }
0x2735   :  { %6782 = vmatpush3.bf16.msra.mxu0 %v6779_v41 }
0x2736   :  { %6564 = vmatmul.mubr.msk.f32.vlgmr.msra.gmra.mrb[32].mxu1 %vm1436_vm4, %v4839_v40  ;;  %6815 = vmatprep.subr.bf16.mxu0 %v7187_v44 }
0x2737   :  { %6572 = vmatpush3.msra.mxu1 %v5003_v15  ;;  %6573 = vmatprep.mubr.msk.f32.mxu1 %vm7177_vm3, %v7162_v0  ;;  %v6023_v15 = vld [vmem:[#allocation2 + $0x1b0] ss:$0 sm:$0xff] }
0x2738   :  { %6576 = vmatprep.subr.mxu1 %v4215_v17 }
0x273a   :  { %6574 = vmatmul.mubr.msk.f32.vlgmr.msra.gmra.mrb[36].mxu1 %vm1436_vm4, %v4211_v16 }
0x273b   :  { %6577 = vmatpush3.msra.mxu1 %v4215_v17 }
0x273c   :  { %6784 = vmatprep.subr.bf16.mxu1 %v6783_v47 }
0x2803   :  { %v4998_v18 = vpop.f32.mrb[54].mxu0 }
0x2804   :  { %v6570_v19 = vpop.f32.mrb[55].mxu0  ;;  %6578 = vmatprep.mubr.msk.f32.mxu1 %vm1436_vm4, %v4998_v18 }
0x2805   :  { %v6024_v19 = vld [vmem:[#allocation2 + $0x1b8] ss:$0 sm:$0xff] }
0x280d   :  { %v5074_v20 = vpop.f32.mrb[36].mxu1 }
0x280e   :  { %v6575_v21 = vpop.f32.mrb[37].mxu1  ;;  %6579 = vmatmul.mubr.msk.f32.vlgmr.msra.gmra.mrb[32].mxu1 %vm1436_vm4, %v5074_v20 }
0x280f   :  { %6786 = vmatpush3.bf16.msra.mxu1 %v6783_v47 }
0x2810   :  { %6788 = vmatprep.subr.bf16.mxu1 %v6787_v49 }
0x2813   :  { %6790 = vmatpush3.bf16.msra.mxu1 %v6787_v49 }
0x2814   :  { %6792 = vmatprep.subr.bf16.mxu1 %v6791_v54 }
0x2817   :  { %6794 = vmatpush3.bf16.msra.mxu1 %v6791_v54 }
0x2818   :  { %6796 = vmatprep.subr.bf16.mxu1 %v6795_v8 }
0x281b   :  { %6798 = vmatpush3.bf16.msra.mxu1 %v6795_v8  ;;  %v5444_v8 = vrot.slane %v7134_v35, %v5443_v57  ;;  %v5592_v57 = vld [vmem:[#allocation2 + $0x2d8] sm:$0xff] }
0x281c   :  { %6800 = vmatprep.subr.bf16.mxu1 %v6799_v43 }
0x281f   :  { %6802 = vmatpush3.bf16.msra.mxu1 %v6799_v43  ;;  %v6816_v43 = vpack.c.bf16 %v5483_v60, %v5482_v58  ;;  %v5594_v60 = vld [vmem:[#allocation2 + $0x2e8] sm:$0xff] }
0x2820   :  { %6804 = vmatprep.subr.bf16.mxu1 %v6803_v11 }
0x2823   :  { %6806 = vmatpush3.bf16.msra.mxu1 %v6803_v11  ;;  %v5485_v11 = vld [vmem:[#allocation2 + $0x298] sm:$0xff] }
0x2824   :  { %6808 = vmatprep.subr.bf16.mxu1 %v6807_v1  ;;  %v6819_v62 = vpack.c.bf16 %v5485_v11, %v5484_v61  ;;  %v5597_v11 = vld [vmem:[#allocation2 + $0x300] sm:$0xff] }
0x2827   :  { %6810 = vmatpush3.bf16.msra.mxu1 %v6807_v1 }
0x28e1   :  { %v6580_v22 = vpop.f32.mrb[32].mxu1 }
0x28e2   :  { %v6852_v4 = vadd.f32 %v6580_v22, %v6010_v6  ;;  %v5150_v23 = vpop.f32.mrb[33].mxu1 }
0x28e3   :  { %v6853_v24 = vadd.f32 %v6010_v6, %v5150_v23  ;;  %v5310_v23 = vld [vmem:[#allocation2 + $0x260] sm:$0xff] }
0x28e4   :  { %v5162_v25 = vadd.f32 %v6852_v4, %v7627_v37  ;;  %v5309_v4 = vld [vmem:[#allocation2 + $0x258] sm:$0xff] }
0x28e5   :  { %v5161_v26 = vadd.f32 %v6853_v24, %v7625_v36  ;;  %v6811_v24 = vpack.c.bf16 %v5310_v23, %v5309_v4 }
0x28e6   :  { %v5168_v27 = vsel %vm1351_vm1, %v5162_v25, 0.0 }
0x28e7   :  { %5169 = vadd.xlane.f32.xlu0 %v5168_v27  ;;  %v5165_v28 = vsel %vm1351_vm1, %v5161_v26, 0.0  ;;  %6812 = vmatprep.subr.bf16.mxu1 %v6811_v24 }
0x28e8   :  { %5166 = vadd.xlane.f32.xlu1 %v5165_v28  ;;  %6814 = vmatpush3.bf16.msra.mxu1 %v6811_v24 }
0x28e9   :  { %6839 = vmatprep.subr.bf16.mxu1 %v7187_v44 }
0x2974   :  { %v5170_v59 = vpop.xlane.xlu0 %5169 }
0x2975   :  { %v5172_v2 = vmul.f32 0.03125, %v5170_v59  ;;  %v5167_v29 = vpop.xlane.xlu1 %5166 }
0x2976   :  { %v5171_v7 = vmul.f32 0.03125, %v5167_v29 }
0x2977   :  { %v7791_v30 = vsub.f32 %v5162_v25, %v5172_v2  ;;  %v6025_v25 = vld [vmem:[#allocation2 + $0x1e0] ss:$0 sm:$0xff] }
0x2978   :  { %v7793_v31 = vsub.f32 %v5161_v26, %v5171_v7  ;;  %v6028_v7 = vld [vmem:[#allocation2 + $0x268] ss:$0 sm:$0xff] }
0x2979   :  { %v5176_v32 = vmul.f32 %v7791_v30, %v7791_v30 }
0x297a   :  { %v5175_v36 = vmul.f32 %v7793_v31, %v7793_v31 }
0x297b   :  { %v5180_v37 = vsel %vm1351_vm1, %v5176_v32, 0.0 }
0x297c   :  { %5181 = vadd.xlane.f32.xlu0 %v5180_v37  ;;  %v5177_v33 = vsel %vm1351_vm1, %v5175_v36, 0.0 }
0x297d   :  { %5178 = vadd.xlane.f32.xlu1 %v5177_v33 }
0x2a09   :  { %v5182_v3 = vpop.xlane.xlu0 %5181 }
0x2a0a   :  { %v5184_v9 = vmul.f32 0.03125, %v5182_v3  ;;  %v5179_v12 = vpop.xlane.xlu1 %5178 }
0x2a0b   :  { %v5183_v13 = vmul.f32 0.03125, %v5179_v12 }
0x2a0c   :  { %v5186_v40 = vadd.f32 1e-05, %v5184_v9 }
0x2a0d   :  { %v5185_v10 = vadd.f32 1e-05, %v5183_v13 }
0x2a0e   :  { %7118 = vrsqrt.f32 %v5186_v40 }
0x2a0f   :  { %7120 = vrsqrt.f32 %v5185_v10  ;;  %v6029_v10 = vld [vmem:[#allocation2 + $0x270] ss:$0 sm:$0xff] }
0x2a18   :  { %v7119_v14 = vpop.eup %7118 }
0x2a19   :  { %v7121_v16 = vpop.eup %7120  ;;  %v5190_v17 = vmul.f32 %v7119_v14, %v7791_v30 }
0x2a1a   :  { %v5189_v18 = vmul.f32 %v7121_v16, %v7793_v31 }
0x2a1b   :  { %v5196_v20 = vmul.f32 %v6023_v15, %v5190_v17 }
0x2a1c   :  { %v5195_v21 = vmul.f32 %v6023_v15, %v5189_v18  ;;  %v6030_v15 = vld [vmem:[#allocation2 + $0x278] ss:$0 sm:$0xff] }
0x2a1d   :  { %v5202_v22 = vadd.f32 %v6024_v19, %v5196_v20 }
0x2a1e   :  { %v5201_v6 = vadd.f32 %v6024_v19, %v5195_v21 }
0x2a20   :  { %6589 = vmatprep.mubr.msk.f32.mxu0 %vm1351_vm1, %v5201_v6 }
0x2a21   :  { %6590 = vmatmul.mubr.msk.f32.vlgmr.msra.gmra.mrb[56].mxu0 %vm1351_vm1, %v5202_v22 }
0x2a22   :  { %6635 = vmatprep.mubr.msk.f32.mxu0 %vm7177_vm3, %v7162_v0  ;;  %6817 = vmatpush3.bf16.msra.mxu0 %v6816_v43  ;;  %v5595_v43 = vld [vmem:[#allocation2 + $0x2f0] sm:$0xff] }
0x2a23   :  { %6818 = vmatprep.subr.bf16.mxu0 %v7187_v44  ;;  %v6834_v61 = vpack.c.bf16 %v5595_v43, %v5594_v60 }
0x2a26   :  { %6820 = vmatpush3.bf16.msra.mxu0 %v6819_v62 }
0x2a27   :  { %6821 = vmatprep.subr.bf16.mxu0 %v7187_v44 }
0x2af4   :  { %v6591_v26 = vpop.f32.mrb[56].mxu0 }
0x2af5   :  { %v5290_v27 = vadd.f32 %v6591_v26, %v6025_v25  ;;  %v5284_v28 = vpop.f32.mrb[57].mxu0 }
0x2af6   :  { %v5285_v59 = vadd.f32 %v6025_v25, %v5284_v28 }
0x2af7   :  { %v5294_v29 = vmax.f32 %v5290_v27, 0.0 }
0x2af8   :  { %v5293_v2 = vmax.f32 %v5285_v59, 0.0 }
0x2afa   :  { %6624 = vmatprep.mubr.f32.mxu1 %v5293_v2 }
0x2afb   :  { %6625 = vmatmul.mubr.f32.vlgmr.msra.gmra.mrb[38].mxu1 %v5294_v29 }
0x2afc   :  { %6669 = vmatprep.mubr.msk.f32.mxu1 %vm7177_vm3, %v7162_v0 }
0x2bce   :  { %v6626_v30 = vpop.f32.mrb[38].mxu1 }
0x2bcf   :  { %v5388_v31 = vadd.f32 %v6626_v30, %v6028_v7  ;;  %v5382_v32 = vpop.f32.mrb[39].mxu1 }
0x2bd0   :  { %v5383_v36 = vadd.f32 %v6028_v7, %v5382_v32 }
0x2bd1   :  { %v5392_v37 = vadd.f32 %v5388_v31, %v5202_v22 }
0x2bd2   :  { %v5391_v33 = vadd.f32 %v5383_v36, %v5201_v6 }
0x2bd3   :  { %v5398_v5 = vsel %vm1351_vm1, %v5392_v37, 0.0 }
0x2bd4   :  { %5399 = vadd.xlane.f32.xlu1 %v5398_v5  ;;  %v5395_v34 = vsel %vm1351_vm1, %v5391_v33, 0.0 }
0x2bd5   :  { %5396 = vadd.xlane.f32.xlu0 %v5395_v34 }
0x2be5   :  { %5466 = vrot.lane.b32.xlu1 %v7134_v35, %s7178_s4  ;;  %v5586_v35 = vld [vmem:[#allocation2 + $0x2a8] sm:$0xff] }
0x2be9   :  { %5439 = vbcast.lane.b32.xlu1 %v5436_v38, 272  ;;  %v5587_v38 = vld [vmem:[#allocation2 + $0x2b0] sm:$0xff] }
0x2c61   :  { %v5400_v39 = vpop.xlane.xlu1 %5399 }
0x2c62   :  { %v5402_v41 = vmul.f32 0.03125, %v5400_v39  ;;  %v5397_v42 = vpop.xlane.xlu0 %5396 }
0x2c63   :  { %v5401_v45 = vmul.f32 0.03125, %v5397_v42 }
0x2c64   :  { %v5404_v46 = vsub.f32 %v5392_v37, %v5402_v41 }
0x2c65   :  { %v5403_v47 = vsub.f32 %v5391_v33, %v5401_v45  ;;  %v5467_v53 = vpop.permute.xlu1 %5466 }
0x2c66   :  { %v5406_v48 = vmul.f32 %v5404_v46, %v5404_v46  ;;  %v5470_v55 = vsel %vm5469_vm5, %v5467_v53, 0.0  ;;  %v5590_v53 = vld [vmem:[#allocation2 + $0x2c8] sm:$0xff] }
0x2c67   :  { %v5405_v52 = vmul.f32 %v5403_v47, %v5403_v47 }
0x2c68   :  { %v5410_v49 = vsel %vm1351_vm1, %v5406_v48, 0.0  ;;  %v5589_v48 = vld [vmem:[#allocation2 + $0x2c0] sm:$0xff] }
0x2c69   :  { %5411 = vadd.xlane.f32.xlu0 %v5410_v49  ;;  %v5407_v54 = vsel %vm1351_vm1, %v5405_v52, 0.0  ;;  %v5440_v23 = vpop.permute.xlu1 %5439 }
0x2c6d   :  { %5408 = vadd.xlane.f32.xlu0 %v5407_v54  ;;  %v5591_v54 = vld [vmem:[#allocation2 + $0x2d0] sm:$0xff] }
0x2c71   :  { %5471 = vadd.xlane.f32.xlu0 %v5470_v55  ;;  %v6828_v55 = vpack.c.bf16 %v5591_v54, %v5590_v53 }
0x2c87   :  { %5447 = vbcast.lane.b32.xlu0 %v5444_v8, 272  ;;  %v5593_v8 = vld [vmem:[#allocation2 + $0x2e0] sm:$0xff] }
0x2c88   :  { %v6831_v58 = vpack.c.bf16 %v5593_v8, %v5592_v57 }
0x2cf6   :  { %v5412_v50 = vpop.xlane.xlu0 %5411 }
0x2cf7   :  { %v5414_v63 = vmul.f32 0.03125, %v5412_v50  ;;  %v5816_v50 = vld [vmem:[#allocation2 + $0x310] sm:$0xff] }
0x2cf9   :  { %v5416_v1 = vadd.f32 1e-05, %v5414_v63  ;;  %v5817_v63 = vld [vmem:[#allocation2 + $0x318] sm:$0xff] }
0x2cfa   :  { %v5409_v3 = vpop.xlane.xlu0 %5408 }
0x2cfb   :  { %7122 = vrsqrt.f32 %v5416_v1  ;;  %v5413_v9 = vmul.f32 0.03125, %v5409_v3  ;;  %v6842_v1 = vpack.c.bf16 %v5817_v63, %v5816_v50  ;;  %v6031_v3 = vld [vmem:[#allocation2 + $0x2a0] ss:$0 sm:$0xff] }
0x2cfd   :  { %v5415_v12 = vadd.f32 1e-05, %v5413_v9 }
0x2cfe   :  { %v5472_v13 = vpop.xlane.xlu0 %5471 }
0x2cff   :  { %7124 = vrsqrt.f32 %v5415_v12  ;;  %v5473_v16 = vmax.f32 %v5472_v13, 1.0  ;;  %v5818_v12 = vld [vmem:[#allocation2 + $0x320] sm:$0xff]  ;;  %v5819_v13 = vld [vmem:[#allocation2 + $0x328] sm:$0xff] }
0x2d01   :  { %v5475_v6 = vrot.slane %v5473_v16, 1 }
0x2d02   :  { %v5448_v19 = vpop.permute.xlu0 %5447 }
0x2d03   :  { %7126 = vrcp.f32 %v5475_v6 }
0x2d04   :  { %7128 = vrcp.f32 %v5473_v16  ;;  %v6846_v16 = vpack.c.bf16 %v5819_v13, %v5818_v12 }
0x2d05   :  { %v7123_v40 = vpop.eup %7122 }
0x2d06   :  { %v5420_v14 = vmul.f32 %v7123_v40, %v5404_v46  ;;  %v6822_v46 = vpack.c.bf16 %v5587_v38, %v5586_v35 }
0x2d08   :  { %v5426_v17 = vmul.f32 %v6029_v10, %v5420_v14 }
0x2d09   :  { %v7125_v18 = vpop.eup %7124 }
0x2d0a   :  { %v7823_v20 = vadd.f32 %v6030_v15, %v5426_v17  ;;  %v5419_v21 = vmul.f32 %v7125_v18, %v5403_v47  ;;  %v5588_v47 = vld [vmem:[#allocation2 + $0x2b8] sm:$0xff] }
0x2d0b   :  { %v6825_v52 = vpack.c.bf16 %v5589_v48, %v5588_v47 }
0x2d0c   :  { %v5450_v22 = vmul.f32 %v5448_v19, %v7823_v20  ;;  %v5425_v4 = vmul.f32 %v6029_v10, %v5419_v21 }
0x2d0d   :  { %v7127_v33 = vpop.eup %7126 }
0x2d0e   :  { %v5458_v24 = vsel %vm1351_vm1, %v5450_v22, 0.0  ;;  %v7827_v25 = vadd.f32 %v6030_v15, %v5425_v4  ;;  %v7129_v41 = vpop.eup %7128 }
0x2d0f   :  { %v5459_v26 = vrot.slane %v5458_v24, 4 }
0x2d10   :  { %v5449_v27 = vmul.f32 %v5440_v23, %v7827_v25 }
0x2d11   :  { %v5460_v28 = vadd.f32 %v5459_v26, %v5458_v24  ;;  %v7189_v26 = vmov 98  }
0x2d12   :  { %v5451_v59 = vsel %vm1351_vm1, %v5449_v27, 0.0  ;;  %6916 = vset.pattern.permute.xlu0 %v7189_v26 }
0x2d13   :  { %v5461_v2 = vrot.slane %v5460_v28, 2  ;;  %v5452_v29 = vrot.slane %v5451_v59, 4 }
0x2d15   :  { %v5462_v7 = vadd.f32 %v5461_v2, %v5460_v28  ;;  %v5453_v30 = vadd.f32 %v5452_v29, %v5451_v59  ;;  %v7190_v59 = vmov 96   ;;  %v5703_v2 = vld [vmem:[#allocation2 + $0x330] sm:$0xff]  ;;  %v5704_v29 = vld [vmem:[#allocation2 + $0x338] sm:$0xff] }
0x2d17   :  { %v5463_v31 = vrot.slane %v5462_v7, 1  ;;  %v5454_v32 = vrot.slane %v5453_v30, 2 }
0x2d19   :  { %v5464_v36 = vadd.f32 %v5463_v31, %v5462_v7  ;;  %v5455_v37 = vadd.f32 %v5454_v32, %v5453_v30  ;;  %v6840_v7 = vpack.c.bf16 %v5704_v29, %v5703_v2  ;;  %v6033_v30 = vld [vmem:[#allocation2 + $0x308] ss:$0 sm:$0xff] }
0x2d1b   :  { %v5481_v5 = vmul.f32 %v7127_v33, %v5464_v36  ;;  %v5456_v34 = vrot.slane %v5455_v37, 1  ;;  %6841 = vmatpush3.bf16.msra.mxu1 %v6840_v7 }
0x2d1d   :  { %v5457_v39 = vadd.f32 %v5456_v34, %v5455_v37  ;;  %v5493_v42 = vrot.slane %v5481_v5, 7 }
0x2d1f   :  { %v5479_v45 = vmul.f32 %v7129_v41, %v5457_v39 }
0x2d21   :  { %v5495_v49 = vsel %vm5494_vm6, %v5493_v42, %v5479_v45  ;;  %v6035_v42 = vld [vmem:[#allocation2 + $0x340] ss:$0 sm:$0xff] }
0x2d22   :  { %6636 = vmatmul.mubr.msk.f32.vlgmr.msra.gmra.mrb[58].mxu0 %vm1351_vm1, %v5495_v49 }
0x2d23   :  { %6823 = vmatpush3.bf16.msra.mxu0 %v6822_v46  ;;  %6662 = vmatprep.mubr.msk.f32.mxu0 %vm7177_vm3, %v7162_v0  ;;  %v5596_v0 = vld [vmem:[#allocation2 + $0x2f8] sm:$0xff] }
0x2d24   :  { %6824 = vmatprep.subr.bf16.mxu0 %v7187_v44  ;;  %v6837_v62 = vpack.c.bf16 %v5597_v11, %v5596_v0 }
0x2d27   :  { %6826 = vmatpush3.bf16.msra.mxu0 %v6825_v52 }
0x2d28   :  { %6827 = vmatprep.subr.bf16.mxu0 %v7187_v44 }
0x2d2b   :  { %6829 = vmatpush3.bf16.msra.mxu0 %v6828_v55 }
0x2d2c   :  { %6830 = vmatprep.subr.bf16.mxu0 %v7187_v44 }
0x2d2f   :  { %6832 = vmatpush3.bf16.msra.mxu0 %v6831_v58 }
0x2d30   :  { %6833 = vmatprep.subr.bf16.mxu0 %v7187_v44 }
0x2d33   :  { %6835 = vmatpush3.bf16.msra.mxu0 %v6834_v61 }
0x2d34   :  { %6836 = vmatprep.subr.bf16.mxu0 %v7187_v44 }
0x2d37   :  { %6838 = vmatpush3.bf16.msra.mxu0 %v6837_v62 }
0x2d38   :  { %6843 = vmatprep.subr.bf16.mxu0 %v6842_v1 }
0x2df5   :  { %v5564_v9 = vpop.f32.mrb[58].mxu0 }
0x2df6   :  { %v5565_v40 = vadd.f32 %v6031_v3, %v5564_v9  ;;  %v6637_v10 = vpop.f32.mrb[59].mxu0 }
0x2df8   :  { %v5585_v14 = vmax.f32 %v5565_v40, 0.0  ;;  %v5569_v15 = vsel %vm5568_vm7, %v5565_v40, -inf }
0x2df9   :  { %5570 = vmax.xlane.f32.xlu1 %v5569_v15 }
0x2dfa   :  { %6663 = vmatmul.mubr.msk.f32.vlgmr.msra.gmra.mrb[60].mxu0 %vm5603_vm8, %v5585_v14 }
0x2dfb   :  { %6845 = vmatpush3.bf16.msra.mxu0 %v6842_v1  ;;  %6680 = vmatprep.mubr.msk.f32.mxu0 %vm1351_vm1, %v7827_v25  ;;  %v7188_v25 = vmov 97  }
0x2dfc   :  { %6847 = vmatprep.subr.bf16.mxu0 %v6846_v16  ;;  %6915 = vset.pattern.permute.xlu1 %v7188_v25 }
0x2dff   :  { %6849 = vmatpush3.bf16.msra.mxu0 %v6846_v16 }
0x2e02   :  { %6681 = vmatmul.mubr.msk.f32.vlgmr.msra.gmra.mrb[62].mxu0 %vm1351_vm1, %v7823_v20 }
0x2e86   :  { %v5571_v44 = vpop.xlane.xlu1 %5570 }
0x2e87   :  { %v5572_v17 = vsub.f32 %v5565_v40, %v5571_v44 }
0x2e89   :  { %v5573_v18 = vmul.f32 1.442695, %v5572_v17 }
0x2e8b   :  { %7130 = vpow2.f32 %v5573_v18 }
0x2e95   :  { %v7131_v19 = vpop.eup %7130 }
0x2e96   :  { %5576 = vrot.lane.b32.xlu0 %v7131_v19, %s7166_s28 }
0x2ecd   :  { %v5673_v21 = vpop.f32.mrb[60].mxu0 }
0x2ece   :  { %v6664_v6 = vpop.f32.mrb[61].mxu0  ;;  %v5674_v31 = vadd.f32 %v6033_v30, %v5673_v21 }
0x2ed5   :  { %v6682_v22 = vpop.f32.mrb[62].mxu0 }
0x2ed6   :  { %v5892_v4 = vpop.f32.mrb[63].mxu0 }
0x2f08   :  { %v5577_v23 = vpop.permute.xlu0 %5576 }
0x2f09   :  { %v5580_v24 = vsel %vm5579_vm9, %v5577_v23, 0.0 }
0x2f0a   :  { %5581 = vadd.xlane.f32.xlu0 %v5580_v24 }
0x2f97   :  { %v5582_v20 = vpop.xlane.xlu0 %5581 }
0x2f98   :  { %7132 = vrcp.f32 %v5582_v20 }
0x2fa2   :  { %v7133_v27 = vpop.eup %7132 }
0x2fa3   :  { %v5584_v28 = vmul.f32 %v7133_v27, %v7131_v19 }
0x2fa5   :  { %5694 = vperm.xlu0 %6916, %v5584_v28   ;;  %5684 = vperm.xlu1 %6915, %v5584_v28  }
0x2fa9   :  { %6917 = vset.pattern.permute.xlu1 %v7190_v59 }
0x2faa   :  { %5679 = vperm.xlu1 %6917, %v5584_v28  }
0x3024   :  { %v5685_v32 = vpop.permute.xlu1 %5684  ;;  %v5695_v37 = vpop.permute.xlu0 %5694 }
0x3025   :  { %v5687_v36 = vmul.f32 %v5685_v32, %v5674_v31  ;;  %v5697_v33 = vmul.f32 %v5695_v37, %v5674_v31 }
0x3027   :  { %5689 = vrot.lane.b32.xlu1 %v5687_v36, %s7178_s4 }
0x3029   :  { %v5680_v5 = vpop.permute.xlu1 %5679 }
0x302a   :  { %v5682_v35 = vmul.f32 %v5680_v5, %v5674_v31 }
0x302b   :  { %5699 = vrot.lane.b32.xlu1 %v5697_v33, %s7164_s26 }
0x3099   :  { %v5690_v34 = vpop.permute.xlu1 %5689 }
0x309a   :  { %v5692_v38 = vadd.f32 %v5690_v34, %v5682_v35 }
0x309d   :  { %v5700_v39 = vpop.permute.xlu1 %5699 }
0x309e   :  { %v5702_v41 = vadd.f32 %v5700_v39, %v5692_v38 }
0x30a0   :  { %6670 = vmatmul.mubr.msk.f32.vlgmr.msra.gmra.mrb[40].mxu1 %vm138_vm0, %v5702_v41 }
0x3173   :  { %v5779_v45 = vpop.f32.mrb[40].mxu1 }
0x3174   :  { %v5780_v46 = vadd.f32 %v6035_v42, %v5779_v45  ;;  %v6671_v47 = vpop.f32.mrb[41].mxu1 }
0x3176   :  { %v5790_v48 = vrot.slane %v5780_v46, %v7422_v51 }
0x3178   :  { %v5791_v49 = vcombine.high %v5790_v48, %v5790_v48  ;;  %v5798_v52 = vrot.slane %v5790_v48, %v7422_v51 }
0x317a   :  { %v5805_v53 = vrot.slane %v5791_v49, %v7422_v51  ;;  %v5809_v54 = vrot.slane %v5798_v52, %v7432_v56 }
0x317c   :  { %v5813_v55 = vrot.slane %v5805_v53, %v7432_v56  ;;  %v5893_v57 = vadd.f32 %v5892_v4, %v5809_v54 }
0x317e   :  { %v5898_v8 = vadd.f32 %v6682_v22, %v5813_v55  ;;  %5901 = vst [vmem:[%s7860_s2] sm:$0xff] %v5893_v57 }
0x3180   :  { %5902 = vst [vmem:[%s7860_s2 + $0x8] sm:$0xff] %v5898_v8 }
0x3181   :  { %5907 = vsyncpa [#allocation3], 1 }

</bundles_post_ra>
